<compile_context>
chip_gen: v7x
topology: tpu7x:2x2x1
jax: 0.10.0
libtpu: 0.0.40
codegen_flags: <defaults>
</compile_context>

<pallas_src>
import functools

import jax
import jax.numpy as jnp
import numpy as np
from jax.experimental import pallas as pl
from jax.experimental.pallas import tpu as pltpu

B = 2                                # batch
N_JOINTS = 14                        # pred_3d_joints: (B, 14, 3)
FEAT_C, FEAT_H, FEAT_W = 2048, 7, 7
FEAT_IN = FEAT_C * FEAT_H * FEAT_W   # 100352 = feat_mlp1 fan-in
HID = 64                             # feat_mlp1 fan-out
ENC1 = 250                           # encoder1 fan-out
NK_PER_CORE = 4                      # K steps per core (swept {2,4,7}; 4 = big tiles, ~15 MiB VMEM)


def feat_mlp1_kernel(feat_ref, w1_ref, out_ref):
    """Accumulate one K tile of  feat(B, tk) @ W1(HID, tk)^T  into the per-core partial."""
    k = pl.program_id(1)

    @pl.when(k == 0)
    def _():
        out_ref[...] = jnp.zeros_like(out_ref)

    # Weight arrives bf16 (halved HBM stream); upcast to f32 so the contraction
    # runs at f32 MXU precision.  The VPU upcast (~0.4 us/tile) hides under DMA.
    w = w1_ref[...].astype(jnp.float32)                      # (HID, tk)
    # NT contraction (tk vs tk): K stays on lanes for BOTH operands, so the
    # weight tile is lane-dense and no relayout/transpose is needed.
    out_ref[...] += jax.lax.dot_general(
        feat_ref[...], w,
        dimension_numbers=(((1,), (1,)), ((), ())),
        preferred_element_type=jnp.float32)                  # (B, HID)


@functools.partial(jax.jit, static_argnames=("num_cores",))
def gaze_from_body(pred_3d_joints, image_feat_flat, params, *, num_cores=1):
    """GAZEFROMBODY.forward(..., render=False).

    image_feat_flat: (B, 2048*7*7) f32 — the backbone's image_feat_newview,
    already flattened (nn.Flatten of the contiguous NCHW tensor is a view).
    params[0] is the feat_mlp1 weight in torch-native (64, 100352) layout, bf16.
    """
    w1_bf16, b1, w2t, b2, e1t, be1, e2t, be2 = params

    per_core_k = FEAT_IN // num_cores
    tk = per_core_k // NK_PER_CORE            # 25088 (1 core) or 12544 (2 cores)
    assert tk % 128 == 0 and tk * NK_PER_CORE * num_cores == FEAT_IN

    grid_spec = pltpu.PrefetchScalarGridSpec(
        num_scalar_prefetch=0,
        grid=(num_cores, NK_PER_CORE),
        in_specs=[
            # activation: (B, tk) f32 tile at K block c*NK + k
            pl.BlockSpec((B, tk), lambda c, k: (0, c * NK_PER_CORE + k)),
            # feat_mlp1 weight: (HID, tk) bf16 tile — K on lanes (dense stream)
            pl.BlockSpec((HID, tk), lambda c, k: (0, c * NK_PER_CORE + k)),
        ],
        # one resident (B, HID) partial accumulator per core; leading dim squeezed
        out_specs=pl.BlockSpec((None, B, HID), lambda c, k: (c, 0, 0)),
    )

    partials = pl.pallas_call(
        feat_mlp1_kernel,
        out_shape=jax.ShapeDtypeStruct((num_cores, B, HID), jnp.float32),
        grid_spec=grid_spec,
        compiler_params=pltpu.CompilerParams(
            dimension_semantics=("parallel", "arbitrary"),
            vmem_limit_bytes=32 * 1024 * 1024),
        cost_estimate=pl.CostEstimate(
            flops=2 * B * FEAT_IN * HID,
            transcendentals=0,
            bytes_accessed=(HID * FEAT_IN * 2        # bf16 weight stream
                            + B * FEAT_IN * 4        # f32 activation
                            + num_cores * B * HID * 4)),
    )(image_feat_flat, w1_bf16)

    # ---- tiny tail in plain XLA (lane-ragged 3/9/250-wide shapes gain nothing from Pallas) ----
    feat1 = jnp.sum(partials, axis=0) + b1                        # feat_mlp1 bias (+ cross-core sum)
    feat_dir = jnp.dot(feat1, w2t) + b2                           # feat_mlp2 -> (B, 3)

    head = pred_3d_joints[:, 9, :]
    rel = pred_3d_joints - head[:, None, :]
    x = rel[:, jnp.array([7, 10, 13]), :].reshape(B, 9)           # gather + flatten
    x = jnp.dot(x, e1t) + be1                                     # encoder1
    x = jnp.dot(x, e2t) + be2                                     # encoder2
    x = x + feat_dir
    l2 = jnp.sum(x * x, axis=1, keepdims=True)                    # sum of squares (no sqrt, as in module)
    return x / l2


def init_linear(key, fan_in, fan_out, transpose=True):
    """Deterministic PyTorch-style nn.Linear init.

    transpose=True  -> returns (W^T:(in,out), b:(1,out))   (convenient for x @ W^T)
    transpose=False -> returns (W:(out,in),   b:(1,out))   (torch-native layout)
    """
    kw, kb = jax.random.split(key)
    bound = 1.0 / np.sqrt(fan_in)
    w = jax.random.uniform(kw, (fan_out, fan_in), jnp.float32, -bound, bound)
    b = jax.random.uniform(kb, (fan_out,), jnp.float32, -bound, bound)
    return (w.T if transpose else w), b.reshape(1, fan_out)


def reference(pred_3d_joints, image_feat_flat, params_f32):
    (w1, b1, w2t, b2, e1t, be1, e2t, be2) = params_f32            # w1: (64, 100352) f32
    hp = jax.lax.Precision.HIGHEST
    feat_dir = jnp.dot(image_feat_flat, w1.T, precision=hp) + b1
    feat_dir = jnp.dot(feat_dir, w2t, precision=hp) + b2
    head = pred_3d_joints[:, 9, :]
    rel = pred_3d_joints - head[:, None, :]
    x = rel[:, jnp.array([7, 10, 13]), :].reshape(B, 9)
    x = jnp.dot(x, e1t, precision=hp) + be1
    x = jnp.dot(x, e2t, precision=hp) + be2
    x = x + feat_dir
    l2 = x[:, 0] ** 2 + x[:, 1] ** 2 + x[:, 2] ** 2
    return x / l2[:, None]


def _num_tensorcores():
    """Split the K reduction across TensorCores only where it helps (2 TCs on v7x)."""
    try:
        kind = jax.devices()[0].device_kind.lower()
    except Exception:
        return 1
    return 2 if any(tag in kind for tag in ("v7", "tpu7", "7x")) else 1


if __name__ == "__main__":
    key = jax.random.PRNGKey(0)
    k_j, k_f, k1, k2, k3, k4 = jax.random.split(key, 6)

    # Synthetic stand-ins for the bert backbone outputs.  The feature map is
    # produced directly in its flattened (B, 2048*7*7) form: the module's
    # nn.Flatten on the contiguous backbone output is a pure view, and feeding
    # it flat avoids a ~20 MB (7,7)->(8,128)-padded relayout on the wrapper side.
    pred_3d_joints = jax.random.normal(k_j, (B, N_JOINTS, 3), jnp.float32) * 0.2
    image_feat_flat = jax.random.normal(k_f, (B, FEAT_IN), jnp.float32)

    w1_f32, b1 = init_linear(k1, FEAT_IN, HID, transpose=False)   # torch-native (64, 100352)
    w2t, b2 = init_linear(k2, HID, 3)
    e1t, be1 = init_linear(k3, 9, ENC1)
    e2t, be2 = init_linear(k4, ENC1, 3)

    params_f32 = (w1_f32, b1, w2t, b2, e1t, be1, e2t, be2)
    # Pre-cast the heavy feat_mlp1 weight to bf16 once (weights are constant);
    # it is upcast to f32 inside the kernel before the MXU contraction.
    kernel_params = (w1_f32.astype(jnp.bfloat16),) + params_f32[1:]

    num_cores = _num_tensorcores()
    out = gaze_from_body(pred_3d_joints, image_feat_flat, kernel_params,
                         num_cores=num_cores)
    out = jax.block_until_ready(out)

    ref = reference(pred_3d_joints, image_feat_flat, params_f32)
    np.testing.assert_allclose(np.asarray(out), np.asarray(ref),
                               rtol=5e-2, atol=1e-2)
    print("KERNEL_OK")
</pallas_src>

<mosaic_0001>
module attributes {stable_mosaic.version = 11 : i64} {
  func.func @feat_mlp1_kernel(%arg0: i32, %arg1: i32, %arg2: memref<2x25088xf32, #tpu.memory_space<vmem>>, %arg3: memref<64x25088xbf16, #tpu.memory_space<vmem>>, %arg4: memref<1x2x64xf32, #tpu.memory_space<vmem>>) attributes {dimension_semantics = [#tpu.dimension_semantics<parallel>, #tpu.dimension_semantics<arbitrary>], iteration_bounds = array<i64: 1, 4>, scalar_prefetch = 0 : i64, scratch_operands = 0 : i64, tpu.core_type = #tpu.core_type<tc>, window_params = [{transform_indices = @transform_0, window_bounds = array<i64: 2, 25088>}, {transform_indices = @transform_1, window_bounds = array<i64: 64, 25088>}, {transform_indices = @transform_2, window_bounds = array<i64: 1, 2, 64>}]} {
    %c0_i32 = arith.constant 0 : i32
    %0 = arith.cmpi eq, %arg1, %c0_i32 : i32
    %1 = arith.extui %0 : i1 to i32
    %c0_i32_0 = arith.constant 0 : i32
    %2 = arith.cmpi ne, %1, %c0_i32_0 : i32
    scf.if %2 {
      %cst_10 = arith.constant 0.000000e+00 : f32
      %13 = vector.broadcast %cst_10 : f32 to vector<2x64xf32>
      %c0_11 = arith.constant 0 : index
      %c0_12 = arith.constant 0 : index
      %c0_13 = arith.constant 0 : index
      %14 = vector.load %arg4[%c0_11, %c0_12, %c0_13] : memref<1x2x64xf32, #tpu.memory_space<vmem>>, vector<1x2x64xf32>
      %15 = vector.shape_cast %14 : vector<1x2x64xf32> to vector<2x64xf32>
      %16 = vector.shape_cast %13 : vector<2x64xf32> to vector<1x2x64xf32>
      tpu.vector_store %arg4[%c0_11, %c0_12, %c0_13], %16 {strides = array<i32>} : memref<1x2x64xf32, #tpu.memory_space<vmem>>, vector<1x2x64xf32>,
    } else {
    }
    %c0 = arith.constant 0 : index
    %c0_1 = arith.constant 0 : index
    %3 = vector.load %arg3[%c0, %c0_1] : memref<64x25088xbf16, #tpu.memory_space<vmem>>, vector<64x25088xbf16>
    %4 = arith.extf %3 : vector<64x25088xbf16> to vector<64x25088xf32>
    %c0_2 = arith.constant 0 : index
    %c0_3 = arith.constant 0 : index
    %c0_4 = arith.constant 0 : index
    %5 = vector.load %arg4[%c0_2, %c0_3, %c0_4] : memref<1x2x64xf32, #tpu.memory_space<vmem>>, vector<1x2x64xf32>
    %6 = vector.shape_cast %5 : vector<1x2x64xf32> to vector<2x64xf32>
    %c0_5 = arith.constant 0 : index
    %c0_6 = arith.constant 0 : index
    %7 = vector.load %arg2[%c0_5, %c0_6] : memref<2x25088xf32, #tpu.memory_space<vmem>>, vector<2x25088xf32>
    %cst = arith.constant dense<0.000000e+00> : vector<2x64xf32>
    %8 = tpu.matmul %7, %4, %cst {dimension_numbers = #tpu.dot_dimension_numbers<[1], [1], [0], [0], [0, 0, 1, 0], [], []>} : vector<2x25088xf32>, vector<64x25088xf32>, vector<2x64xf32> -> vector<2x64xf32>
    %9 = arith.addf %6, %8 : vector<2x64xf32>
    %c0_7 = arith.constant 0 : index
    %c0_8 = arith.constant 0 : index
    %c0_9 = arith.constant 0 : index
    %10 = vector.load %arg4[%c0_7, %c0_8, %c0_9] : memref<1x2x64xf32, #tpu.memory_space<vmem>>, vector<1x2x64xf32>
    %11 = vector.shape_cast %10 : vector<1x2x64xf32> to vector<2x64xf32>
    %12 = vector.shape_cast %9 : vector<2x64xf32> to vector<1x2x64xf32>
    tpu.vector_store %arg4[%c0_7, %c0_8, %c0_9], %12 {strides = array<i32>} : memref<1x2x64xf32, #tpu.memory_space<vmem>>, vector<1x2x64xf32>,
    return
  }
  func.func @transform_0(%arg0: i32, %arg1: i32) -> (i32, i32) {
    %c4_i32 = arith.constant 4 : i32
    %0 = arith.muli %arg0, %c4_i32 : i32
    %1 = arith.addi %0, %arg1 : i32
    %c0_i32 = arith.constant 0 : i32
    %c0_i32_0 = arith.constant 0 : i32
    return %c0_i32, %1 : i32, i32
  }
  func.func @transform_1(%arg0: i32, %arg1: i32) -> (i32, i32) {
    %c4_i32 = arith.constant 4 : i32
    %0 = arith.muli %arg0, %c4_i32 : i32
    %1 = arith.addi %0, %arg1 : i32
    %c0_i32 = arith.constant 0 : i32
    %c0_i32_0 = arith.constant 0 : i32
    return %c0_i32, %1 : i32, i32
  }
  func.func @transform_2(%arg0: i32, %arg1: i32) -> (i32, i32, i32) {
    %c0_i32 = arith.constant 0 : i32
    %c0_i32_0 = arith.constant 0 : i32
    %c0_i32_1 = arith.constant 0 : i32
    return %arg0, %c0_i32, %c0_i32_0 : i32, i32, i32
  }
}

</mosaic_0001>

<bundles_post_ra>
// kernel: gaze_from_body.1
= control target key start
LH: loop header
LB: loop body
LE: loop exit
PB: predicated region body
PF: predicated region fallthrough
CT: control target
= control target key end

     0   :  { %7 = vsyncpa [#allocation3], 0  ;;  %s15580_s0 = inlined_call_operand.hbm [shape: f32[2,100352], index: 0, kind: input, shape index: {}]   ;;  %s15581_s1 = inlined_call_operand.hbm [shape: bf16[64,100352], index: 1, kind: input, shape index: {}]   ;;  %s15582_s2 = inlined_call_operand.vmem [shape: f32[1,2,64], index: 2, kind: output, shape index: {}]  }
   0x1   :  { %9 = vsyncpa [#allocation3 + $0x1], 0 }
   0x2   :  { %10 = vsyncpa [#allocation5], 0 }
   0x3   :  { %12 = vsyncpa [#allocation5 + $0x1], 0  ;;  %s14472_s9 = smov 0   ;;  %s14474_s10 = smov 0  }
   0x4   :  { %s14476_s11 = smov 0   ;;  %s14478_s12 = smov 0  }
   0x5   :  { %s14480_s13 = smov 0   ;;  %s14482_s14 = smov 0  }
   0x6 LB: > { %s10676_s15 = sadd.s32 4294967295, %s14448_s14   ;;  %s27_s16 = sadd.s32 1, %s14444_s13  ;;  %s14448_s14 = sphi %s14482_s14, %s18_s14   ;;  %s14444_s13 = sphi %s14480_s13, %s15592_s13   ;;  %s14440_s12 = sphi %s14478_s12, %s15591_s12   ;;  %s14436_s11 = sphi %s14476_s11, %s15590_s11   ;;  %s14432_s10 = sphi %s14474_s10, %s15589_s10   ;;  %s14428_s9 = sphi %s14472_s9, %s15588_s9  }
   0x7   : > { %p28_p0 = scmp.ge.s32.totalorder %s27_s16, 4  ;;  %s41_s17 = sadd.s32 1, %s14436_s11 }
   0x8   : > { %p48_p1 = scmp.ne.s32.totalorder %s14436_s11, %s14432_s10  ;;  %p49_p2 = scmp.eq.s32.totalorder %s14448_s14, 0 }
   0x9   : > { %s15594_s16 = smov (%p28_p0, %s27_s16), 0  ;;  %p54_p4 = scmp.ne.s32.totalorder %s14432_s10, %s14428_s9 }
   0xa   : > { %p50_p3 = por %p49_p2, %p48_p1  ;;  %s38_s18 = ssub.s32 %s14444_s13, %s15594_s16 }
   0xb   : > { %p55_p5 = scmp.eq.s32.totalorder %s10676_s15, 0  ;;  %p39_p6 = scmp.eq.s32.totalorder %s38_s18, 0 }
   0xc   : > { %p13055_p8 = scmp.lt.s32.totalorder %s14448_s14, 4  ;;  %s14520_s21 = sand.u32 1, %s14436_s11  }
   0xd   : > { %p14511_p7 = por %p55_p5, %p54_p4  ;;  %s10686_s22 = smul.u32 6272, %s14444_s13 }
   0xe   : > { %s14517_s20 = scalar_select %p39_p6, %s14436_s11, %s41_s17  }
   0xf   : > { %s15584_s19 = scalar_select %p14511_p7, 1, 0 }
  0x10   : > { %s13040_s23 = smul.u32 392, %s14520_s21  ;;  %s14527_s26 = scalar_lea.hbm %s15580_s0, %s10686_s22 }
  0x11   : > { %p14529_p9 = pnand %p13055_p8, %p50_p3  ;;  %s13041_s30 = smul.u32 6272, %s14520_s21 }
  0x12   : > { %s138_s28 = scalar_lea.vmem [#allocation2], %s13040_s23  ;;  %s135_s3 = scalar_lea.sflag [#allocation3], %s14520_s21 }
  0x13   : > { %s148_s29 = sshll.u32 %s138_s28, 4  ;;  %s14334_s4 = scalar_lea.hbm %s14527_s26, 6272  ;;  %s14533_s29 = int_to_ptr.vmem [resolvable:$true] %s148_s29 }
  0x14   : > { %p14335_p10 = scmp.ne.s32.totalorder %s14527_s26, %s14334_s4  ;;  %p14336_p11 = pneg %p14529_p9 }
  0x15   : > { %s14339_s7 = scalar_lea.hbm %s15580_s0, 25088  ;;  %p14340_p0 = scmp.lt.u32.totalorder %s14527_s26, %s15580_s0 }
  0x16   : > { %p14337_p12 = pnand %p14336_p11, %p14335_p10  ;;  %p14341_p1 = scmp.lt.u32.totalorder %s14339_s7, %s14334_s4 }
  0x17   : > { %p14343_p3 = scmp.lt.u32.totalorder %s14334_s4, %s14527_s26 }
  0x18   : > { %p14338_p13 = pneg %p14337_p12  ;;  %p14342_p2 = por %p14341_p1, %p14340_p0 }
  0x1a   : > { %p14344_p4 = por %p14343_p3, %p14342_p2 }
  0x1c   : > { %p14345_p5 = pnand %p14344_p4, %p14338_p13 }
  0x1e   : > { %14348 = shalt.err (!%p14345_p5)
}
  0x1f   : > { %s14349_s15 = scalar_lea.vmem %s14533_s29, 6272  ;;  %s14450_s17 = smov [#allocation2]  }
  0x20   : > { %p14350_p6 = scmp.ne.s32.totalorder %s14533_s29, %s14349_s15  ;;  %s14354_s18 = sshll.u32 %s14450_s17, 4  ;;  %s14355_s18 = int_to_ptr.vmem [resolvable:$false] %s14354_s18 }
  0x21   : > { %s14356_s22 = scalar_lea.vmem %s14355_s18, 12544  ;;  %p14357_p12 = scmp.lt.s32.totalorder %s14533_s29, %s14355_s18 }
  0x22   : > { %p14352_p8 = pnand %p14350_p6, %p14336_p11  ;;  %p14358_p0 = scmp.lt.s32.totalorder %s14356_s22, %s14349_s15 }
  0x24   : > { %p14353_p10 = pneg %p14352_p8  ;;  %p14359_p1 = por %p14358_p0, %p14357_p12 }
  0x26   : > { %p14360_p2 = pnand %p14359_p1, %p14353_p10 }
  0x28   : > { %14363 = shalt.err (!%p14360_p2)
}
  0x29   : > { %13051 = dma.hbm_to_vmem [thread:$0]  (!%p14529_p9), %s14527_s26, 6272, %s14533_s29, %s135_s3  }
  0x2a   : > { %s10687_s23 = smul.u32 12544, %s14444_s13  ;;  %p10681_p13 = scmp.ge.s32.totalorder %s14448_s14, 1 }
  0x2b   : > { %p176_p3 = scmp.lt.s32.totalorder %s14448_s14, 5  ;;  %s159_s4 = scalar_lea.vmem [#allocation4], %s13041_s30 }
  0x2c   : > { %s14568_s28 = scalar_lea.hbm %s15581_s1, %s10687_s23  ;;  %s168_s5 = sshll.u32 %s159_s4, 4  ;;  %s14576_s5 = int_to_ptr.vmem [resolvable:$true] %s168_s5 }
  0x2d   : > { %p14572_p4 = pnand %p10681_p13, %p176_p3  ;;  %s156_s26 = scalar_lea.sflag [#allocation5], %s14520_s21 }
  0x2e   : > { %s14364_s29 = scalar_lea.hbm %s14568_s28, 100352  ;;  %s14369_s8 = scalar_lea.hbm %s15581_s1, 401408 }
  0x2f   : > { %p14365_p5 = scmp.ne.s32.totalorder %s14568_s28, %s14364_s29  ;;  %p14370_p10 = scmp.lt.u32.totalorder %s14568_s28, %s15581_s1 }
  0x30   : > { %p14371_p12 = scmp.lt.u32.totalorder %s14369_s8, %s14364_s29  ;;  %p14373_p1 = scmp.lt.u32.totalorder %s14364_s29, %s14568_s28 }
  0x31   : > { %p14367_p6 = pnand %p14365_p5, %p14336_p11 }
  0x32   : > { %p14372_p0 = por %p14371_p12, %p14370_p10 }
  0x33   : > { %p14368_p8 = pneg %p14367_p6 }
  0x34   : > { %p14374_p2 = por %p14373_p1, %p14372_p0 }
  0x36   : > { %p14375_p13 = pnand %p14374_p2, %p14368_p8 }
  0x38   : > { %14378 = shalt.err (!%p14375_p13)
}
  0x39   : > { %s14379_s15 = scalar_lea.vmem %s14576_s5, 100352  ;;  %s14451_s17 = smov [#allocation4]  }
  0x3a   : > { %p14380_p3 = scmp.ne.s32.totalorder %s14576_s5, %s14379_s15  ;;  %s14384_s18 = sshll.u32 %s14451_s17, 4  ;;  %s14385_s18 = int_to_ptr.vmem [resolvable:$false] %s14384_s18 }
  0x3b   : > { %s14386_s22 = scalar_lea.vmem %s14385_s18, 200704  ;;  %p14387_p7 = scmp.lt.s32.totalorder %s14576_s5, %s14385_s18 }
  0x3c   : > { %p14382_p5 = pnand %p14380_p3, %p14336_p11  ;;  %p14388_p10 = scmp.lt.s32.totalorder %s14386_s22, %s14379_s15 }
  0x3e   : > { %p14383_p6 = pneg %p14382_p5  ;;  %p14389_p12 = por %p14388_p10, %p14387_p7 }
  0x40   : > { %p14390_p0 = pnand %p14389_p12, %p14383_p6 }
  0x42   : > { %14393 = shalt.err (!%p14390_p0)
}
  0x43   : > { %s14452_s23 = smov 50176   ;;  %s14453_s24 = smov 12544  }
  0x44   : > { %s14454_s25 = smov 784   ;;  %180 = sbr.rel (%p14572_p4) target bundleno = 1877 (0x755), region = 28 }
  0x45   : > { %13054 = dma.hbm_to_vmem [thread:$0]  (!%p14529_p9), %s14568_s28, 100352, %s14576_s5, %s156_s26, %s14452_s23, %s14453_s24, %s14454_s25  }
  0x46   : > { %s182_s4 = sand.u32 (!%p14572_p4), 1, %s14432_s10   ;;  %p15587_p7 = scmp.ne.s32.totalorder (!%p14572_p4), %s15584_s19, 0 }
  0x47   : > { %s13042_s29 = smul.u32 (!%p14572_p4), 392, %s182_s4  ;;  %s183_s3 = scalar_lea.sflag (!%p14572_p4), [#allocation3], %s182_s4 }
  0x49   : > { %s14607_s7 = scalar_lea.vmem (!%p14572_p4), [#allocation2], %s13042_s29 }
  0x4b   : > { %14419 = dma.done.wait (%p15587_p7), %s183_s3, 6272  }
  0x4c   : > { %14421 = vsyncadd (%p15587_p7), %s183_s3, 4294961024  ;;  %s13043_s8 = smul.u32 6272, %s182_s4  ;;  %s192_s27 = scalar_lea.sflag [#allocation5], %s182_s4 }
  0x4e   : > { %s14613_s21 = scalar_lea.vmem [#allocation4], %s13043_s8 }
  0x4f   : > { %14423 = dma.done.wait (%p15587_p7), %s192_s27, 100352  }
  0x50   : > { %14425 = vsyncadd (%p15587_p7), %s192_s27, 4294866944  ;;  %p10682_p9 = scmp.ne.s32.totalorder %s14440_s12, 0 }
  0x51   : > { %vm234_vm0 = vcmask (!%p10682_p9), 517120   ;;  %v14455_v0 = vmov (!%p10682_p9), 0.0  }
  0x52   : > { %233 = sbr.rel (%p10682_p9) target bundleno = 89 (0x59), region = 40  ;;  %235 = vst.msk [vmem:[%s15582_s2] sm:$0x3] (!%p10682_p9), %vm234_vm0, %v14455_v0 }
  0x59 PF: > { %v13109_v1 = vld [vmem:[%s14613_s21 + $0x4] ss:$784 sps:$4 sm:$0xff]   ;;  %v2691_v2 = vlaneseq  ;;  %v13111_v3 = vld [vmem:[%s14613_s21] ss:$784 sps:$4 sm:$0xff]   ;;  %v14456_v4 = vmov 1983009808  }
  0x5a   : > { %v2689_v5 = vunpack.c.l.s4 %v14456_v4  ;;  %10689 = vmatprep.subr.bf16.mxu0 %v13109_v1  ;;  %v13112_v6 = vld [vmem:[%s14613_s21 + $0xc] ss:$784 sps:$4 sm:$0xff]   ;;  %v13114_v7 = vld [vmem:[%s14613_s21 + $0x8] ss:$784 sps:$4 sm:$0xff]   ;;  %v13115_v8 = vld [vmem:[%s14613_s21 + $0x624] ss:$784 sps:$4 sm:$0xff]  }
  0x5b   : > { %10691 = vmatpush1.bf16.xpose.msra.mxu0 %v13111_v3  ;;  %v2692_v10 = vshrl.u32 %v2691_v2, 7  ;;  %10705 = vmatprep.subr.bf16.mxu1 %v13112_v6  ;;  %v13118_v11 = vld [vmem:[%s14613_s21 + $0x62c] ss:$784 sps:$4 sm:$0xff]   ;;  %v13117_v12 = vld [vmem:[%s14613_s21 + $0x620] ss:$784 sps:$4 sm:$0xff]   ;;  %vm10577_vm1 = vcmask 517120  }
  0x5c   : > { %v2690_v9 = vunpack.c.0.s8 %v2689_v5  ;;  %10707 = vmatpush1.bf16.xpose.msra.mxu1 %v13114_v7  ;;  %10693 = vmatprep.subr.bf16.mxu0 %v13115_v8  ;;  %v13121_v14 = vld [vmem:[%s14613_s21 + $0xc44] ss:$784 sps:$4 sm:$0xff]   ;;  %v13120_v15 = vld [vmem:[%s14613_s21 + $0x628] ss:$784 sps:$4 sm:$0xff]   ;;  %v13124_v16 = vld [vmem:[%s14613_s21 + $0xc4c] ss:$784 sps:$4 sm:$0xff]  }
  0x5d   : > { %10709 = vmatprep.subr.bf16.mxu1 %v13118_v11  ;;  %v2589_v17 = vld [vmem:[%s14607_s7] sm:$0xff]  ;;  %v2590_v27 = vld [vmem:[%s14607_s7 + $0x8] sm:$0xff]  ;;  %v2591_v49 = vld [vmem:[%s14607_s7 + $0x10] sm:$0xff] }
  0x5e   : > { %v14630_v13 = vsub.s32 %v2690_v9, %v2692_v10  ;;  %v2687_v19 = vcombine.high %v2589_v17, %v2589_v17  ;;  %v13123_v22 = vld [vmem:[%s14613_s21 + $0xc40] ss:$784 sps:$4 sm:$0xff]   ;;  %v13127_v24 = vld [vmem:[%s14613_s21 + $0x1264] ss:$784 sps:$4 sm:$0xff]   ;;  %v13126_v25 = vld [vmem:[%s14613_s21 + $0xc48] ss:$784 sps:$4 sm:$0xff]   ;;  %v2704_v31 = vcombine.high %v2590_v27, %v2590_v27  ;;  %v2721_v53 = vcombine.high %v2591_v49, %v2591_v49 }
  0x5f   : > { %v13130_v26 = vld [vmem:[%s14613_s21 + $0x126c] ss:$784 sps:$4 sm:$0xff]   ;;  %v13129_v28 = vld [vmem:[%s14613_s21 + $0x1260] ss:$784 sps:$4 sm:$0xff]   ;;  %v13134_v29 = vld [vmem:[%s14613_s21 + $0x14] ss:$784 sps:$4 sm:$0xff]  }
  0x60   : > { %v2694_v18 = vrot.slane %v2589_v17, %v14630_v13  ;;  %v2701_v21 = vrot.slane %v2687_v19, %v14630_v13  ;;  %v13132_v30 = vld [vmem:[%s14613_s21 + $0x1268] ss:$784 sps:$4 sm:$0xff]   ;;  %v13137_v32 = vld [vmem:[%s14613_s21 + $0x1c] ss:$784 sps:$4 sm:$0xff]   ;;  %v2711_v33 = vrot.slane %v2590_v27, %v14630_v13  ;;  %v2718_v34 = vrot.slane %v2704_v31, %v14630_v13  ;;  %v13136_v35 = vld [vmem:[%s14613_s21 + $0x10] ss:$784 sps:$4 sm:$0xff]  }
  0x61   : > { %v13140_v37 = vld [vmem:[%s14613_s21 + $0x634] ss:$784 sps:$4 sm:$0xff]   ;;  %v13139_v38 = vld [vmem:[%s14613_s21 + $0x18] ss:$784 sps:$4 sm:$0xff]   ;;  %v13143_v40 = vld [vmem:[%s14613_s21 + $0x63c] ss:$784 sps:$4 sm:$0xff]   ;;  %v2728_v55 = vrot.slane %v2591_v49, %v14630_v13  ;;  %v2735_v56 = vrot.slane %v2721_v53, %v14630_v13 }
  0x62   : > { %v2702_v20 = vcombine.high %v2694_v18, %v2694_v18  ;;  %v2703_v23 = vcombine.high %v2701_v21, %v2701_v21  ;;  %v2719_v36 = vcombine.high %v2711_v33, %v2711_v33  ;;  %v2720_v39 = vcombine.high %v2718_v34, %v2718_v34  ;;  %v13142_v41 = vld [vmem:[%s14613_s21 + $0x630] ss:$784 sps:$4 sm:$0xff]   ;;  %v13146_v42 = vld [vmem:[%s14613_s21 + $0xc54] ss:$784 sps:$4 sm:$0xff]   ;;  %v13145_v43 = vld [vmem:[%s14613_s21 + $0x638] ss:$784 sps:$4 sm:$0xff]  }
  0x63   : > { %10695 = vmatpush1.bf16.xpose.msra.mxu0 %v13117_v12  ;;  %v13149_v44 = vld [vmem:[%s14613_s21 + $0xc5c] ss:$784 sps:$4 sm:$0xff]   ;;  %v13148_v45 = vld [vmem:[%s14613_s21 + $0xc50] ss:$784 sps:$4 sm:$0xff]   ;;  %v13152_v46 = vld [vmem:[%s14613_s21 + $0x1274] ss:$784 sps:$4 sm:$0xff]   ;;  %v2736_v58 = vcombine.high %v2728_v55, %v2728_v55  ;;  %v2737_v61 = vcombine.high %v2735_v56, %v2735_v56 }
  0x64   : > { %10697 = vmatprep.subr.bf16.mxu0 %v13121_v14  ;;  %10711 = vmatpush1.bf16.xpose.msra.mxu1 %v13120_v15  ;;  %v13151_v47 = vld [vmem:[%s14613_s21 + $0xc58] ss:$784 sps:$4 sm:$0xff]   ;;  %v13155_v48 = vld [vmem:[%s14613_s21 + $0x127c] ss:$784 sps:$4 sm:$0xff]   ;;  %v13154_v50 = vld [vmem:[%s14613_s21 + $0x1270] ss:$784 sps:$4 sm:$0xff]  }
  0x65   : > { %10713 = vmatprep.subr.bf16.mxu1 %v13124_v16  ;;  %3780 = vmatprep.mubr.f32.mxu0 %v2702_v20  ;;  %v13158_v51 = vld [vmem:[%s14613_s21 + $0x24] ss:$784 sps:$4 sm:$0xff]   ;;  %v13157_v52 = vld [vmem:[%s14613_s21 + $0x1278] ss:$784 sps:$4 sm:$0xff]   ;;  %v13162_v54 = vld [vmem:[%s14613_s21 + $0x2c] ss:$784 sps:$4 sm:$0xff]  }
  0x66   : > { %3850 = vmatprep.mubr.f32.mxu1 %v2703_v23  ;;  %v13160_v57 = vld [vmem:[%s14613_s21 + $0x20] ss:$784 sps:$4 sm:$0xff]   ;;  %v13165_v59 = vld [vmem:[%s14613_s21 + $0x644] ss:$784 sps:$4 sm:$0xff]   ;;  %v13164_v60 = vld [vmem:[%s14613_s21 + $0x28] ss:$784 sps:$4 sm:$0xff]  }
  0x67   : > { %v13168_v62 = vld [vmem:[%s14613_s21 + $0x64c] ss:$784 sps:$4 sm:$0xff]   ;;  %v13167_v63 = vld [vmem:[%s14613_s21 + $0x640] ss:$784 sps:$4 sm:$0xff]   ;;  %v13171_v0 = vld [vmem:[%s14613_s21 + $0xc64] ss:$784 sps:$4 sm:$0xff]  }
  0x68   : > { %v13170_v1 = vld [vmem:[%s14613_s21 + $0x648] ss:$784 sps:$4 sm:$0xff]   ;;  %v13174_v2 = vld [vmem:[%s14613_s21 + $0xc6c] ss:$784 sps:$4 sm:$0xff]   ;;  %v13173_v3 = vld [vmem:[%s14613_s21 + $0xc60] ss:$784 sps:$4 sm:$0xff]  }
  0x69   : > { %v13177_v4 = vld [vmem:[%s14613_s21 + $0x1284] ss:$784 sps:$4 sm:$0xff]   ;;  %v13176_v5 = vld [vmem:[%s14613_s21 + $0xc68] ss:$784 sps:$4 sm:$0xff]   ;;  %v13180_v6 = vld [vmem:[%s14613_s21 + $0x128c] ss:$784 sps:$4 sm:$0xff]  }
  0x6a   : > { %v13179_v7 = vld [vmem:[%s14613_s21 + $0x1280] ss:$784 sps:$4 sm:$0xff]   ;;  %v13183_v9 = vld [vmem:[%s14613_s21 + $0x34] ss:$784 sps:$4 sm:$0xff]   ;;  %v13182_v10 = vld [vmem:[%s14613_s21 + $0x1288] ss:$784 sps:$4 sm:$0xff]  }
  0x6b   : > { %10699 = vmatpush1.bf16.xpose.msra.mxu0 %v13123_v22  ;;  %v2592_v8 = vld [vmem:[%s14607_s7 + $0x18] sm:$0xff] }
  0x6c   : > { %10701 = vmatprep.subr.bf16.mxu0 %v13127_v24  ;;  %10715 = vmatpush1.bf16.xpose.msra.mxu1 %v13126_v25  ;;  %v2738_v11 = vcombine.high %v2592_v8, %v2592_v8  ;;  %v13187_v12 = vld [vmem:[%s14613_s21 + $0x3c] ss:$784 sps:$4 sm:$0xff]   ;;  %v2745_v14 = vrot.slane %v2592_v8, %v14630_v13  ;;  %v13185_v15 = vld [vmem:[%s14613_s21 + $0x30] ss:$784 sps:$4 sm:$0xff]   ;;  %v13190_v17 = vld [vmem:[%s14613_s21 + $0x654] ss:$784 sps:$4 sm:$0xff]  }
  0x6d   : > { %10717 = vmatprep.subr.bf16.mxu1 %v13130_v26  ;;  %v13189_v19 = vld [vmem:[%s14613_s21 + $0x38] ss:$784 sps:$4 sm:$0xff]   ;;  %v13192_v22 = vld [vmem:[%s14613_s21 + $0x650] ss:$784 sps:$4 sm:$0xff]   ;;  %v13196_v23 = vld [vmem:[%s14613_s21 + $0xc74] ss:$784 sps:$4 sm:$0xff]  }
  0x6e   : > { %v2752_v16 = vrot.slane %v2738_v11, %v14630_v13  ;;  %v13195_v24 = vld [vmem:[%s14613_s21 + $0x658] ss:$784 sps:$4 sm:$0xff]   ;;  %v13199_v25 = vld [vmem:[%s14613_s21 + $0xc7c] ss:$784 sps:$4 sm:$0xff]   ;;  %v13198_v26 = vld [vmem:[%s14613_s21 + $0xc70] ss:$784 sps:$4 sm:$0xff]  }
  0x6f   : > { %v13202_v27 = vld [vmem:[%s14613_s21 + $0x1294] ss:$784 sps:$4 sm:$0xff]   ;;  %v13204_v31 = vld [vmem:[%s14613_s21 + $0x1290] ss:$784 sps:$4 sm:$0xff]   ;;  %v13251_v8 = vld [vmem:[%s14613_s21 + $0xc98] ss:$784 sps:$4 sm:$0xff]  }
  0x70   : > { %v2754_v20 = vcombine.high %v2752_v16, %v2752_v16  ;;  %v13227_v49 = vld [vmem:[%s14613_s21 + $0x12a4] ss:$784 sps:$4 sm:$0xff]   ;;  %v13229_v53 = vld [vmem:[%s14613_s21 + $0x12a0] ss:$784 sps:$4 sm:$0xff]  }
  0x71   : > { %v13254_v11 = vld [vmem:[%s14613_s21 + $0x12b0] ss:$784 sps:$4 sm:$0xff]  }
  0x73   : > { %10703 = vmatpush1.bf16.xpose.msra.mxu0 %v13129_v28  ;;  %v13201_v28 = vld [vmem:[%s14613_s21 + $0xc78] ss:$784 sps:$4 sm:$0xff]  }
  0x74   : > { %10721 = vmatprep.subr.bf16.mxu0 %v13134_v29  ;;  %10719 = vmatpush1.bf16.xpose.msra.mxu1 %v13132_v30  ;;  %v13205_v29 = vld [vmem:[%s14613_s21 + $0x129c] ss:$784 sps:$4 sm:$0xff]  }
  0x75   : > { %10737 = vmatprep.subr.bf16.mxu1 %v13137_v32  ;;  %v2593_v30 = vld [vmem:[%s14607_s7 + $0x20] sm:$0xff] }
  0x76   : > { %v13207_v32 = vld [vmem:[%s14613_s21 + $0x1298] ss:$784 sps:$4 sm:$0xff]  }
  0x7a   : > { %3781 = vmatmul.mubr.f32.vlgmr.msra.gmra.mrb[0].mxu0 %v2694_v18  ;;  %v2753_v18 = vcombine.high %v2745_v14, %v2745_v14 }
  0x7b   : > { %10723 = vmatpush1.bf16.xpose.msra.mxu0 %v13136_v35  ;;  %3920 = vmatprep.mubr.f32.mxu0 %v2719_v36  ;;  %v13212_v35 = vld [vmem:[%s14613_s21 + $0x4c] ss:$784 sps:$4 sm:$0xff]   ;;  %v2762_v36 = vrot.slane %v2593_v30, %v14630_v13 }
  0x7c   : > { %3851 = vmatmul.mubr.f32.vlgmr.msra.gmra.mrb[0].mxu1 %v2701_v21  ;;  %10725 = vmatprep.subr.bf16.mxu0 %v13140_v37  ;;  %v13193_v21 = vld [vmem:[%s14613_s21 + $0x65c] ss:$784 sps:$4 sm:$0xff]   ;;  %v13210_v37 = vld [vmem:[%s14613_s21 + $0x40] ss:$784 sps:$4 sm:$0xff]  }
  0x7d   : > { %10739 = vmatpush1.bf16.xpose.msra.mxu1 %v13139_v38  ;;  %3990 = vmatprep.mubr.f32.mxu1 %v2720_v39  ;;  %v13215_v39 = vld [vmem:[%s14613_s21 + $0x664] ss:$784 sps:$4 sm:$0xff]  }
  0x7e   : > { %10741 = vmatprep.subr.bf16.mxu1 %v13143_v40  ;;  %v2770_v40 = vcombine.high %v2762_v36, %v2762_v36 }
  0x83   : > { %10727 = vmatpush1.bf16.xpose.msra.mxu0 %v13142_v41  ;;  %v13214_v41 = vld [vmem:[%s14613_s21 + $0x48] ss:$784 sps:$4 sm:$0xff]  }
  0x84   : > { %10729 = vmatprep.subr.bf16.mxu0 %v13146_v42 }
  0x85   : > { %10743 = vmatpush1.bf16.xpose.msra.mxu1 %v13145_v43  ;;  %v13218_v43 = vld [vmem:[%s14613_s21 + $0x66c] ss:$784 sps:$4 sm:$0xff]  }
  0x86   : > { %10745 = vmatprep.subr.bf16.mxu1 %v13149_v44  ;;  %v13217_v44 = vld [vmem:[%s14613_s21 + $0x660] ss:$784 sps:$4 sm:$0xff]  }
  0x8b   : > { %10731 = vmatpush1.bf16.xpose.msra.mxu0 %v13148_v45  ;;  %v13221_v45 = vld [vmem:[%s14613_s21 + $0xc84] ss:$784 sps:$4 sm:$0xff]  }
  0x8c   : > { %10733 = vmatprep.subr.bf16.mxu0 %v13152_v46  ;;  %v13220_v46 = vld [vmem:[%s14613_s21 + $0x668] ss:$784 sps:$4 sm:$0xff]  }
  0x8d   : > { %10747 = vmatpush1.bf16.xpose.msra.mxu1 %v13151_v47  ;;  %v13224_v47 = vld [vmem:[%s14613_s21 + $0xc8c] ss:$784 sps:$4 sm:$0xff]  }
  0x8e   : > { %10749 = vmatprep.subr.bf16.mxu1 %v13155_v48  ;;  %v13223_v48 = vld [vmem:[%s14613_s21 + $0xc80] ss:$784 sps:$4 sm:$0xff]  }
  0x93   : > { %10735 = vmatpush1.bf16.xpose.msra.mxu0 %v13154_v50  ;;  %v13226_v50 = vld [vmem:[%s14613_s21 + $0xc88] ss:$784 sps:$4 sm:$0xff]  }
  0x94   : > { %10753 = vmatprep.subr.bf16.mxu0 %v13158_v51  ;;  %v13230_v51 = vld [vmem:[%s14613_s21 + $0x12ac] ss:$784 sps:$4 sm:$0xff]  }
  0x95   : > { %10751 = vmatpush1.bf16.xpose.msra.mxu1 %v13157_v52  ;;  %v2594_v52 = vld [vmem:[%s14607_s7 + $0x28] sm:$0xff] }
  0x96   : > { %10769 = vmatprep.subr.bf16.mxu1 %v13162_v54  ;;  %v13232_v54 = vld [vmem:[%s14613_s21 + $0x12a8] ss:$784 sps:$4 sm:$0xff]  }
  0x9a   : > { %3921 = vmatmul.mubr.f32.vlgmr.msra.gmra.mrb[2].mxu0 %v2711_v33  ;;  %v13208_v33 = vld [vmem:[%s14613_s21 + $0x44] ss:$784 sps:$4 sm:$0xff]  }
  0x9b   : > { %10755 = vmatpush1.bf16.xpose.msra.mxu0 %v13160_v57  ;;  %4060 = vmatprep.mubr.f32.mxu0 %v2736_v58  ;;  %v13237_v57 = vld [vmem:[%s14613_s21 + $0x5c] ss:$784 sps:$4 sm:$0xff]   ;;  %v2779_v58 = vrot.slane %v2594_v52, %v14630_v13 }
  0x9c   : > { %3991 = vmatmul.mubr.f32.vlgmr.msra.gmra.mrb[2].mxu1 %v2718_v34  ;;  %10757 = vmatprep.subr.bf16.mxu0 %v13165_v59  ;;  %v2755_v34 = vcombine.high %v2593_v30, %v2593_v30  ;;  %v13235_v59 = vld [vmem:[%s14613_s21 + $0x50] ss:$784 sps:$4 sm:$0xff]   ;;  %v13277_v30 = vld [vmem:[%s14613_s21 + $0x12c4] ss:$784 sps:$4 sm:$0xff]  }
  0x9d   : > { %10771 = vmatpush1.bf16.xpose.msra.mxu1 %v13164_v60  ;;  %4130 = vmatprep.mubr.f32.mxu1 %v2737_v61  ;;  %v13240_v61 = vld [vmem:[%s14613_s21 + $0x674] ss:$784 sps:$4 sm:$0xff]  }
  0x9e   : > { %10773 = vmatprep.subr.bf16.mxu1 %v13168_v62  ;;  %v2769_v38 = vrot.slane %v2755_v34, %v14630_v13  ;;  %v2787_v62 = vcombine.high %v2779_v58, %v2779_v58  ;;  %v13279_v34 = vld [vmem:[%s14613_s21 + $0x12c0] ss:$784 sps:$4 sm:$0xff]  }
  0xa0   : > { %v2771_v42 = vcombine.high %v2769_v38, %v2769_v38 }
  0xa3   : > { %10759 = vmatpush1.bf16.xpose.msra.mxu0 %v13167_v63  ;;  %v13239_v63 = vld [vmem:[%s14613_s21 + $0x58] ss:$784 sps:$4 sm:$0xff]  }
  0xa4   : > { %10761 = vmatprep.subr.bf16.mxu0 %v13171_v0 }
  0xa5   : > { %10775 = vmatpush1.bf16.xpose.msra.mxu1 %v13170_v1  ;;  %v13243_v1 = vld [vmem:[%s14613_s21 + $0x67c] ss:$784 sps:$4 sm:$0xff]  }
  0xa6   : > { %10777 = vmatprep.subr.bf16.mxu1 %v13174_v2  ;;  %v13242_v2 = vld [vmem:[%s14613_s21 + $0x670] ss:$784 sps:$4 sm:$0xff]  }
  0xab   : > { %10763 = vmatpush1.bf16.xpose.msra.mxu0 %v13173_v3  ;;  %v13246_v3 = vld [vmem:[%s14613_s21 + $0xc94] ss:$784 sps:$4 sm:$0xff]  }
  0xac   : > { %10765 = vmatprep.subr.bf16.mxu0 %v13177_v4  ;;  %v13245_v4 = vld [vmem:[%s14613_s21 + $0x678] ss:$784 sps:$4 sm:$0xff]  }
  0xad   : > { %10779 = vmatpush1.bf16.xpose.msra.mxu1 %v13176_v5  ;;  %v13249_v5 = vld [vmem:[%s14613_s21 + $0xc9c] ss:$784 sps:$4 sm:$0xff]  }
  0xae   : > { %10781 = vmatprep.subr.bf16.mxu1 %v13180_v6  ;;  %v13248_v6 = vld [vmem:[%s14613_s21 + $0xc90] ss:$784 sps:$4 sm:$0xff]  }
  0xb3   : > { %10767 = vmatpush1.bf16.xpose.msra.mxu0 %v13179_v7  ;;  %v13252_v7 = vld [vmem:[%s14613_s21 + $0x12b4] ss:$784 sps:$4 sm:$0xff]  }
  0xb4   : > { %10785 = vmatprep.subr.bf16.mxu0 %v13183_v9  ;;  %v13255_v9 = vld [vmem:[%s14613_s21 + $0x12bc] ss:$784 sps:$4 sm:$0xff]  }
  0xb5   : > { %10783 = vmatpush1.bf16.xpose.msra.mxu1 %v13182_v10  ;;  %v2595_v10 = vld [vmem:[%s14607_s7 + $0x30] sm:$0xff] }
  0xb6   : > { %10801 = vmatprep.subr.bf16.mxu1 %v13187_v12  ;;  %v13257_v12 = vld [vmem:[%s14613_s21 + $0x12b8] ss:$784 sps:$4 sm:$0xff]  }
  0xba   : > { %4061 = vmatmul.mubr.f32.vlgmr.msra.gmra.mrb[4].mxu0 %v2728_v55  ;;  %v13233_v55 = vld [vmem:[%s14613_s21 + $0x54] ss:$784 sps:$4 sm:$0xff]  }
  0xbb   : > { %10787 = vmatpush1.bf16.xpose.msra.mxu0 %v13185_v15  ;;  %4200 = vmatprep.mubr.f32.mxu0 %v2753_v18  ;;  %v2789_v15 = vcombine.high %v2595_v10, %v2595_v10  ;;  %v13260_v18 = vld [vmem:[%s14613_s21 + $0x60] ss:$784 sps:$4 sm:$0xff]  }
  0xbc   : > { %4131 = vmatmul.mubr.f32.vlgmr.msra.gmra.mrb[4].mxu1 %v2735_v56  ;;  %10789 = vmatprep.subr.bf16.mxu0 %v13190_v17  ;;  %v2772_v56 = vcombine.high %v2594_v52, %v2594_v52  ;;  %v2796_v17 = vrot.slane %v2595_v10, %v14630_v13  ;;  %v13302_v52 = vld [vmem:[%s14613_s21 + $0x12d4] ss:$784 sps:$4 sm:$0xff]   ;;  %v13317_v10 = vld [vmem:[%s14613_s21 + $0x6a0] ss:$784 sps:$4 sm:$0xff]  }
  0xbd   : > { %10803 = vmatpush1.bf16.xpose.msra.mxu1 %v13189_v19  ;;  %4270 = vmatprep.mubr.f32.mxu1 %v2754_v20  ;;  %v2803_v19 = vrot.slane %v2789_v15, %v14630_v13  ;;  %v13265_v20 = vld [vmem:[%s14613_s21 + $0x684] ss:$784 sps:$4 sm:$0xff]   ;;  %v13323_v15 = vld [vmem:[%s14613_s21 + $0xcc0] ss:$784 sps:$4 sm:$0xff]  }
  0xbe   : > { %10805 = vmatprep.subr.bf16.mxu1 %v13193_v21  ;;  %v2786_v60 = vrot.slane %v2772_v56, %v14630_v13  ;;  %v2804_v21 = vcombine.high %v2796_v17, %v2796_v17 }
  0xc0   : > { %v2788_v0 = vcombine.high %v2786_v60, %v2786_v60 }
  0xc3   : > { %10791 = vmatpush1.bf16.xpose.msra.mxu0 %v13192_v22  ;;  %v13264_v22 = vld [vmem:[%s14613_s21 + $0x68] ss:$784 sps:$4 sm:$0xff]  }
  0xc4   : > { %10793 = vmatprep.subr.bf16.mxu0 %v13196_v23  ;;  %v2805_v23 = vcombine.high %v2803_v19, %v2803_v19 }
  0xc5   : > { %10807 = vmatpush1.bf16.xpose.msra.mxu1 %v13195_v24  ;;  %v13268_v24 = vld [vmem:[%s14613_s21 + $0x68c] ss:$784 sps:$4 sm:$0xff]  }
  0xc6   : > { %10809 = vmatprep.subr.bf16.mxu1 %v13199_v25  ;;  %v13267_v25 = vld [vmem:[%s14613_s21 + $0x680] ss:$784 sps:$4 sm:$0xff]  }
  0xcb   : > { %10795 = vmatpush1.bf16.xpose.msra.mxu0 %v13198_v26  ;;  %v13271_v26 = vld [vmem:[%s14613_s21 + $0xca4] ss:$784 sps:$4 sm:$0xff]  }
  0xcc   : > { %10797 = vmatprep.subr.bf16.mxu0 %v13202_v27  ;;  %v13270_v27 = vld [vmem:[%s14613_s21 + $0x688] ss:$784 sps:$4 sm:$0xff]  }
  0xcd   : > { %10811 = vmatpush1.bf16.xpose.msra.mxu1 %v13201_v28  ;;  %v13274_v28 = vld [vmem:[%s14613_s21 + $0xcac] ss:$784 sps:$4 sm:$0xff]  }
  0xce   : > { %10813 = vmatprep.subr.bf16.mxu1 %v13205_v29  ;;  %v13273_v29 = vld [vmem:[%s14613_s21 + $0xca0] ss:$784 sps:$4 sm:$0xff]  }
  0xd3   : > { %10799 = vmatpush1.bf16.xpose.msra.mxu0 %v13204_v31  ;;  %v13276_v31 = vld [vmem:[%s14613_s21 + $0xca8] ss:$784 sps:$4 sm:$0xff]  }
  0xd4   : > { %10817 = vmatprep.subr.bf16.mxu0 %v13208_v33  ;;  %v2596_v33 = vld [vmem:[%s14607_s7 + $0x38] sm:$0xff] }
  0xd5   : > { %10815 = vmatpush1.bf16.xpose.msra.mxu1 %v13207_v32  ;;  %v13280_v32 = vld [vmem:[%s14613_s21 + $0x12cc] ss:$784 sps:$4 sm:$0xff]  }
  0xd6   : > { %10833 = vmatprep.subr.bf16.mxu1 %v13212_v35  ;;  %v13282_v35 = vld [vmem:[%s14613_s21 + $0x12c8] ss:$784 sps:$4 sm:$0xff]  }
  0xda   : > { %4201 = vmatmul.mubr.f32.vlgmr.msra.gmra.mrb[6].mxu0 %v2745_v14  ;;  %v13258_v14 = vld [vmem:[%s14613_s21 + $0x64] ss:$784 sps:$4 sm:$0xff]  }
  0xdb   : > { %10819 = vmatpush1.bf16.xpose.msra.mxu0 %v13210_v37  ;;  %4340 = vmatprep.mubr.f32.mxu0 %v2770_v40  ;;  %v2806_v37 = vcombine.high %v2596_v33, %v2596_v33  ;;  %v13285_v40 = vld [vmem:[%s14613_s21 + $0x70] ss:$784 sps:$4 sm:$0xff]  }
  0xdc   : > { %4271 = vmatmul.mubr.f32.vlgmr.msra.gmra.mrb[6].mxu1 %v2752_v16  ;;  %10821 = vmatprep.subr.bf16.mxu0 %v13215_v39  ;;  %v13262_v16 = vld [vmem:[%s14613_s21 + $0x6c] ss:$784 sps:$4 sm:$0xff]   ;;  %v2813_v39 = vrot.slane %v2596_v33, %v14630_v13 }
  0xdd   : > { %10835 = vmatpush1.bf16.xpose.msra.mxu1 %v13214_v41  ;;  %4410 = vmatprep.mubr.f32.mxu1 %v2771_v42  ;;  %v2820_v41 = vrot.slane %v2806_v37, %v14630_v13  ;;  %v13290_v42 = vld [vmem:[%s14613_s21 + $0x694] ss:$784 sps:$4 sm:$0xff]  }
  0xde   : > { %10837 = vmatprep.subr.bf16.mxu1 %v13218_v43  ;;  %v2821_v43 = vcombine.high %v2813_v39, %v2813_v39 }
  0xe3   : > { %10823 = vmatpush1.bf16.xpose.msra.mxu0 %v13217_v44  ;;  %v13289_v44 = vld [vmem:[%s14613_s21 + $0x78] ss:$784 sps:$4 sm:$0xff]  }
  0xe4   : > { %10825 = vmatprep.subr.bf16.mxu0 %v13221_v45  ;;  %v2822_v45 = vcombine.high %v2820_v41, %v2820_v41 }
  0xe5   : > { %10839 = vmatpush1.bf16.xpose.msra.mxu1 %v13220_v46  ;;  %v13293_v46 = vld [vmem:[%s14613_s21 + $0x69c] ss:$784 sps:$4 sm:$0xff]  }
  0xe6   : > { %10841 = vmatprep.subr.bf16.mxu1 %v13224_v47  ;;  %v13292_v47 = vld [vmem:[%s14613_s21 + $0x690] ss:$784 sps:$4 sm:$0xff]  }
  0xeb   : > { %10827 = vmatpush1.bf16.xpose.msra.mxu0 %v13223_v48  ;;  %v13296_v48 = vld [vmem:[%s14613_s21 + $0xcb4] ss:$784 sps:$4 sm:$0xff]  }
  0xec   : > { %10829 = vmatprep.subr.bf16.mxu0 %v13227_v49  ;;  %v13295_v49 = vld [vmem:[%s14613_s21 + $0x698] ss:$784 sps:$4 sm:$0xff]  }
  0xed   : > { %10843 = vmatpush1.bf16.xpose.msra.mxu1 %v13226_v50  ;;  %v13299_v50 = vld [vmem:[%s14613_s21 + $0xcbc] ss:$784 sps:$4 sm:$0xff]  }
  0xee   : > { %10845 = vmatprep.subr.bf16.mxu1 %v13230_v51  ;;  %v13298_v51 = vld [vmem:[%s14613_s21 + $0xcb0] ss:$784 sps:$4 sm:$0xff]  }
  0xf3   : > { %10831 = vmatpush1.bf16.xpose.msra.mxu0 %v13229_v53  ;;  %v13301_v53 = vld [vmem:[%s14613_s21 + $0xcb8] ss:$784 sps:$4 sm:$0xff]  }
  0xf4   : > { %10849 = vmatprep.subr.bf16.mxu0 %v13233_v55  ;;  %v2597_v55 = vld [vmem:[%s14607_s7 + $0x40] sm:$0xff] }
  0xf5   : > { %10847 = vmatpush1.bf16.xpose.msra.mxu1 %v13232_v54  ;;  %v13305_v54 = vld [vmem:[%s14613_s21 + $0x12dc] ss:$784 sps:$4 sm:$0xff]  }
  0xf6   : > { %10865 = vmatprep.subr.bf16.mxu1 %v13237_v57  ;;  %v13304_v57 = vld [vmem:[%s14613_s21 + $0x12d0] ss:$784 sps:$4 sm:$0xff]  }
  0xfa   : > { %4341 = vmatmul.mubr.f32.vlgmr.msra.gmra.mrb[8].mxu0 %v2762_v36  ;;  %v13283_v36 = vld [vmem:[%s14613_s21 + $0x74] ss:$784 sps:$4 sm:$0xff]  }
  0xfb   : > { %10851 = vmatpush1.bf16.xpose.msra.mxu0 %v13235_v59  ;;  %4480 = vmatprep.mubr.f32.mxu0 %v2787_v62  ;;  %v13307_v62 = vld [vmem:[%s14613_s21 + $0x12d8] ss:$784 sps:$4 sm:$0xff]  }
  0xfc   : > { %4411 = vmatmul.mubr.f32.vlgmr.msra.gmra.mrb[8].mxu1 %v2769_v38  ;;  %10853 = vmatprep.subr.bf16.mxu0 %v13240_v61  ;;  %v13287_v38 = vld [vmem:[%s14613_s21 + $0x7c] ss:$784 sps:$4 sm:$0xff]  }
  0xfd   : > { %10867 = vmatpush1.bf16.xpose.msra.mxu1 %v13239_v63  ;;  %4550 = vmatprep.mubr.f32.mxu1 %v2788_v0  ;;  %v13308_v63 = vld [vmem:[%s14613_s21 + $0x84] ss:$784 sps:$4 sm:$0xff]   ;;  %v2823_v0 = vcombine.high %v2597_v55, %v2597_v55 }
  0xfe   : > { %10869 = vmatprep.subr.bf16.mxu1 %v13243_v1  ;;  %v13312_v1 = vld [vmem:[%s14613_s21 + $0x8c] ss:$784 sps:$4 sm:$0xff]  }
 0x103   : > { %10855 = vmatpush1.bf16.xpose.msra.mxu0 %v13242_v2  ;;  %v2830_v2 = vrot.slane %v2597_v55, %v14630_v13  ;;  %v13357_v55 = vld [vmem:[%s14613_s21 + $0x12f8] ss:$784 sps:$4 sm:$0xff]  }
 0x104   : > { %10857 = vmatprep.subr.bf16.mxu0 %v13246_v3  ;;  %v13310_v3 = vld [vmem:[%s14613_s21 + $0x80] ss:$784 sps:$4 sm:$0xff]  }
 0x105   : > { %10871 = vmatpush1.bf16.xpose.msra.mxu1 %v13245_v4  ;;  %v2837_v4 = vrot.slane %v2823_v0, %v14630_v13  ;;  %v13364_v0 = vld [vmem:[%s14613_s21 + $0xa8] ss:$784 sps:$4 sm:$0xff]  }
 0x106   : > { %10873 = vmatprep.subr.bf16.mxu1 %v13249_v5  ;;  %v13315_v5 = vld [vmem:[%s14613_s21 + $0x6a4] ss:$784 sps:$4 sm:$0xff]  }
 0x10b   : > { %10859 = vmatpush1.bf16.xpose.msra.mxu0 %v13248_v6  ;;  %v2838_v6 = vcombine.high %v2830_v2, %v2830_v2 }
 0x10c   : > { %10861 = vmatprep.subr.bf16.mxu0 %v13252_v7  ;;  %v13314_v7 = vld [vmem:[%s14613_s21 + $0x88] ss:$784 sps:$4 sm:$0xff]  }
 0x10d   : > { %10875 = vmatpush1.bf16.xpose.msra.mxu1 %v13251_v8  ;;  %v2839_v8 = vcombine.high %v2837_v4, %v2837_v4 }
 0x10e   : > { %10877 = vmatprep.subr.bf16.mxu1 %v13255_v9  ;;  %v13318_v9 = vld [vmem:[%s14613_s21 + $0x6ac] ss:$784 sps:$4 sm:$0xff]  }
 0x113   : > { %10863 = vmatpush1.bf16.xpose.msra.mxu0 %v13254_v11  ;;  %v13321_v11 = vld [vmem:[%s14613_s21 + $0xcc4] ss:$784 sps:$4 sm:$0xff]  }
 0x114   : > { %10881 = vmatprep.subr.bf16.mxu0 %v13258_v14  ;;  %v13324_v14 = vld [vmem:[%s14613_s21 + $0xccc] ss:$784 sps:$4 sm:$0xff]  }
 0x115   : > { %10879 = vmatpush1.bf16.xpose.msra.mxu1 %v13257_v12  ;;  %v13320_v12 = vld [vmem:[%s14613_s21 + $0x6a8] ss:$784 sps:$4 sm:$0xff]  }
 0x116   : > { %10897 = vmatprep.subr.bf16.mxu1 %v13262_v16  ;;  %v13327_v16 = vld [vmem:[%s14613_s21 + $0x12e4] ss:$784 sps:$4 sm:$0xff]  }
 0x11a   : > { %4481 = vmatmul.mubr.f32.vlgmr.msra.gmra.mrb[10].mxu0 %v2779_v58 }
 0x11b   : > { %10883 = vmatpush1.bf16.xpose.msra.mxu0 %v13260_v18  ;;  %4620 = vmatprep.mubr.f32.mxu0 %v2804_v21  ;;  %v13330_v18 = vld [vmem:[%s14613_s21 + $0x12ec] ss:$784 sps:$4 sm:$0xff]   ;;  %v13329_v21 = vld [vmem:[%s14613_s21 + $0x12e0] ss:$784 sps:$4 sm:$0xff]  }
 0x11c   : > { %4551 = vmatmul.mubr.f32.vlgmr.msra.gmra.mrb[10].mxu1 %v2786_v60  ;;  %10885 = vmatprep.subr.bf16.mxu0 %v13265_v20 }
 0x11d   : > { %10899 = vmatpush1.bf16.xpose.msra.mxu1 %v13264_v22  ;;  %4690 = vmatprep.mubr.f32.mxu1 %v2805_v23 }
 0x11e   : > { %10901 = vmatprep.subr.bf16.mxu1 %v13268_v24 }
 0x123   : > { %10887 = vmatpush1.bf16.xpose.msra.mxu0 %v13267_v25 }
 0x124   : > { %10889 = vmatprep.subr.bf16.mxu0 %v13271_v26 }
 0x125   : > { %10903 = vmatpush1.bf16.xpose.msra.mxu1 %v13270_v27  ;;  %v13332_v27 = vld [vmem:[%s14613_s21 + $0x12e8] ss:$784 sps:$4 sm:$0xff]  }
 0x126   : > { %10905 = vmatprep.subr.bf16.mxu1 %v13274_v28  ;;  %v13333_v28 = vld [vmem:[%s14613_s21 + $0x94] ss:$784 sps:$4 sm:$0xff]  }
 0x12b   : > { %10891 = vmatpush1.bf16.xpose.msra.mxu0 %v13273_v29 }
 0x12c   : > { %10893 = vmatprep.subr.bf16.mxu0 %v13277_v30  ;;  %v13337_v30 = vld [vmem:[%s14613_s21 + $0x9c] ss:$784 sps:$4 sm:$0xff]  }
 0x12d   : > { %10907 = vmatpush1.bf16.xpose.msra.mxu1 %v13276_v31 }
 0x12e   : > { %10909 = vmatprep.subr.bf16.mxu1 %v13280_v32  ;;  %v13335_v32 = vld [vmem:[%s14613_s21 + $0x90] ss:$784 sps:$4 sm:$0xff]  }
 0x133   : > { %10895 = vmatpush1.bf16.xpose.msra.mxu0 %v13279_v34  ;;  %v13340_v34 = vld [vmem:[%s14613_s21 + $0x6b4] ss:$784 sps:$4 sm:$0xff]  }
 0x134   : > { %10913 = vmatprep.subr.bf16.mxu0 %v13283_v36  ;;  %v13339_v36 = vld [vmem:[%s14613_s21 + $0x98] ss:$784 sps:$4 sm:$0xff]  }
 0x135   : > { %10911 = vmatpush1.bf16.xpose.msra.mxu1 %v13282_v35 }
 0x136   : > { %10929 = vmatprep.subr.bf16.mxu1 %v13287_v38  ;;  %v13343_v38 = vld [vmem:[%s14613_s21 + $0x6bc] ss:$784 sps:$4 sm:$0xff]  }
 0x13a   : > { %4621 = vmatmul.mubr.f32.vlgmr.msra.gmra.mrb[12].mxu0 %v2796_v17  ;;  %v13326_v17 = vld [vmem:[%s14613_s21 + $0xcc8] ss:$784 sps:$4 sm:$0xff]  }
 0x13b   : > { %10915 = vmatpush1.bf16.xpose.msra.mxu0 %v13285_v40  ;;  %4760 = vmatprep.mubr.f32.mxu0 %v2821_v43  ;;  %v13346_v40 = vld [vmem:[%s14613_s21 + $0xcd4] ss:$784 sps:$4 sm:$0xff]   ;;  %v13348_v43 = vld [vmem:[%s14613_s21 + $0xcd0] ss:$784 sps:$4 sm:$0xff]  }
 0x13c   : > { %4691 = vmatmul.mubr.f32.vlgmr.msra.gmra.mrb[12].mxu1 %v2803_v19  ;;  %10917 = vmatprep.subr.bf16.mxu0 %v13290_v42  ;;  %v2598_v19 = vld [vmem:[%s14607_s7 + $0x48] sm:$0xff] }
 0x13d   : > { %10931 = vmatpush1.bf16.xpose.msra.mxu1 %v13289_v44  ;;  %4830 = vmatprep.mubr.f32.mxu1 %v2822_v45  ;;  %v2840_v29 = vcombine.high %v2598_v19, %v2598_v19  ;;  %v2847_v31 = vrot.slane %v2598_v19, %v14630_v13  ;;  %v13349_v42 = vld [vmem:[%s14613_s21 + $0xcdc] ss:$784 sps:$4 sm:$0xff]   ;;  %v13352_v44 = vld [vmem:[%s14613_s21 + $0x12f4] ss:$784 sps:$4 sm:$0xff]   ;;  %v13351_v45 = vld [vmem:[%s14613_s21 + $0xcd8] ss:$784 sps:$4 sm:$0xff]  }
 0x13e   : > { %10933 = vmatprep.subr.bf16.mxu1 %v13293_v46  ;;  %v13355_v46 = vld [vmem:[%s14613_s21 + $0x12fc] ss:$784 sps:$4 sm:$0xff]  }
 0x13f   : > { %v2854_v33 = vrot.slane %v2840_v29, %v14630_v13  ;;  %v2855_v35 = vcombine.high %v2847_v31, %v2847_v31  ;;  %v13389_v29 = vld [vmem:[%s14613_s21 + $0xb8] ss:$784 sps:$4 sm:$0xff]  }
 0x141   : > { %v2856_v37 = vcombine.high %v2854_v33, %v2854_v33 }
 0x143   : > { %10919 = vmatpush1.bf16.xpose.msra.mxu0 %v13292_v47  ;;  %v2599_v47 = vld [vmem:[%s14607_s7 + $0x50] sm:$0xff] }
 0x144   : > { %10921 = vmatprep.subr.bf16.mxu0 %v13296_v48 }
 0x145   : > { %10935 = vmatpush1.bf16.xpose.msra.mxu1 %v13295_v49  ;;  %v13354_v49 = vld [vmem:[%s14613_s21 + $0x12f0] ss:$784 sps:$4 sm:$0xff]  }
 0x146   : > { %10937 = vmatprep.subr.bf16.mxu1 %v13299_v50 }
 0x14b   : > { %10923 = vmatpush1.bf16.xpose.msra.mxu0 %v13298_v51 }
 0x14c   : > { %10925 = vmatprep.subr.bf16.mxu0 %v13302_v52 }
 0x14d   : > { %10939 = vmatpush1.bf16.xpose.msra.mxu1 %v13301_v53  ;;  %v3782_v56 = vpop.f32.mrb[0].mxu0 }
 0x14e   : > { %v3784_v58 = vpop.f32.mrb[1].mxu0  ;;  %10941 = vmatprep.subr.bf16.mxu1 %v13305_v54 }
 0x14f   : > { %v3852_v59 = vpop.f32.mrb[0].mxu1  ;;  %v13362_v58 = vld [vmem:[%s14613_s21 + $0xac] ss:$784 sps:$4 sm:$0xff]  }
 0x150   : > { %v3853_v60 = vadd.f32 %v3852_v59, %v3782_v56  ;;  %v3854_v61 = vpop.f32.mrb[1].mxu1  ;;  %v13358_v56 = vld [vmem:[%s14613_s21 + $0xa4] ss:$784 sps:$4 sm:$0xff]   ;;  %v2864_v59 = vrot.slane %v2599_v47, %v14630_v13 }
 0x153   : > { %10927 = vmatpush1.bf16.xpose.msra.mxu0 %v13304_v57  ;;  %v2857_v57 = vcombine.high %v2599_v47, %v2599_v47 }
 0x154   : > { %10945 = vmatprep.subr.bf16.mxu0 %v13308_v63  ;;  %v2872_v63 = vcombine.high %v2864_v59, %v2864_v59 }
 0x155   : > { %10943 = vmatpush1.bf16.xpose.msra.mxu1 %v13307_v62  ;;  %v2871_v61 = vrot.slane %v2857_v57, %v14630_v13  ;;  %v13365_v62 = vld [vmem:[%s14613_s21 + $0x6c4] ss:$784 sps:$4 sm:$0xff]   ;;  %v13414_v57 = vld [vmem:[%s14613_s21 + $0xc8] ss:$784 sps:$4 sm:$0xff]  }
 0x156   : > { %10961 = vmatprep.subr.bf16.mxu1 %v13312_v1 }
 0x157   : > { %v2873_v1 = vcombine.high %v2871_v61, %v2871_v61 }
 0x15a   : > { %4761 = vmatmul.mubr.f32.vlgmr.msra.gmra.mrb[14].mxu0 %v2813_v39  ;;  %v13342_v39 = vld [vmem:[%s14613_s21 + $0x6b0] ss:$784 sps:$4 sm:$0xff]  }
 0x15b   : > { %10947 = vmatpush1.bf16.xpose.msra.mxu0 %v13310_v3  ;;  %4900 = vmatprep.mubr.f32.mxu0 %v2838_v6  ;;  %v13367_v3 = vld [vmem:[%s14613_s21 + $0x6c0] ss:$784 sps:$4 sm:$0xff]   ;;  %v13374_v6 = vld [vmem:[%s14613_s21 + $0xcec] ss:$784 sps:$4 sm:$0xff]  }
 0x15c   : > { %4831 = vmatmul.mubr.f32.vlgmr.msra.gmra.mrb[14].mxu1 %v2820_v41  ;;  %10949 = vmatprep.subr.bf16.mxu0 %v13315_v5  ;;  %v13345_v41 = vld [vmem:[%s14613_s21 + $0x6b8] ss:$784 sps:$4 sm:$0xff]  }
 0x15d   : > { %10963 = vmatpush1.bf16.xpose.msra.mxu1 %v13314_v7  ;;  %4970 = vmatprep.mubr.f32.mxu1 %v2839_v8  ;;  %v13370_v5 = vld [vmem:[%s14613_s21 + $0x6c8] ss:$784 sps:$4 sm:$0xff]   ;;  %v13373_v7 = vld [vmem:[%s14613_s21 + $0xce0] ss:$784 sps:$4 sm:$0xff]   ;;  %v13377_v8 = vld [vmem:[%s14613_s21 + $0x1304] ss:$784 sps:$4 sm:$0xff]  }
 0x15e   : > { %10965 = vmatprep.subr.bf16.mxu1 %v13318_v9  ;;  %v13376_v9 = vld [vmem:[%s14613_s21 + $0xce8] ss:$784 sps:$4 sm:$0xff]  }
 0x163   : > { %10951 = vmatpush1.bf16.xpose.msra.mxu0 %v13317_v10  ;;  %v13380_v10 = vld [vmem:[%s14613_s21 + $0x130c] ss:$784 sps:$4 sm:$0xff]  }
 0x164   : > { %10953 = vmatprep.subr.bf16.mxu0 %v13321_v11  ;;  %v2600_v11 = vld [vmem:[%s14607_s7 + $0x58] sm:$0xff] }
 0x165   : > { %10967 = vmatpush1.bf16.xpose.msra.mxu1 %v13320_v12 }
 0x166   : > { %10969 = vmatprep.subr.bf16.mxu1 %v13324_v14  ;;  %v13379_v14 = vld [vmem:[%s14613_s21 + $0x1300] ss:$784 sps:$4 sm:$0xff]  }
 0x16b   : > { %10955 = vmatpush1.bf16.xpose.msra.mxu0 %v13323_v15 }
 0x16c   : > { %10957 = vmatprep.subr.bf16.mxu0 %v13327_v16 }
 0x16d   : > { %10971 = vmatpush1.bf16.xpose.msra.mxu1 %v13326_v17  ;;  %v3922_v20 = vpop.f32.mrb[2].mxu0 }
 0x16e   : > { %v3923_v22 = vadd.f32 %v3922_v20, %v3853_v60  ;;  %v3924_v23 = vpop.f32.mrb[3].mxu0  ;;  %10973 = vmatprep.subr.bf16.mxu1 %v13330_v18  ;;  %v13360_v60 = vld [vmem:[%s14613_s21 + $0xa0] ss:$784 sps:$4 sm:$0xff]   ;;  %v13383_v20 = vld [vmem:[%s14613_s21 + $0xb4] ss:$784 sps:$4 sm:$0xff]  }
 0x16f   : > { %v3992_v24 = vpop.f32.mrb[2].mxu1  ;;  %v13387_v23 = vld [vmem:[%s14613_s21 + $0xbc] ss:$784 sps:$4 sm:$0xff]  }
 0x170   : > { %v3993_v25 = vadd.f32 %v3992_v24, %v3923_v22  ;;  %v3994_v26 = vpop.f32.mrb[3].mxu1  ;;  %v2874_v22 = vcombine.high %v2600_v11, %v2600_v11  ;;  %v2881_v24 = vrot.slane %v2600_v11, %v14630_v13 }
 0x171   : > { %v13385_v26 = vld [vmem:[%s14613_s21 + $0xb0] ss:$784 sps:$4 sm:$0xff]  }
 0x173   : > { %10959 = vmatpush1.bf16.xpose.msra.mxu0 %v13329_v21  ;;  %v13382_v21 = vld [vmem:[%s14613_s21 + $0x1308] ss:$784 sps:$4 sm:$0xff]  }
 0x174   : > { %10977 = vmatprep.subr.bf16.mxu0 %v13333_v28  ;;  %v13390_v28 = vld [vmem:[%s14613_s21 + $0x6d4] ss:$784 sps:$4 sm:$0xff]  }
 0x175   : > { %10975 = vmatpush1.bf16.xpose.msra.mxu1 %v13332_v27  ;;  %v2889_v27 = vcombine.high %v2881_v24, %v2881_v24 }
 0x176   : > { %10993 = vmatprep.subr.bf16.mxu1 %v13337_v30 }
 0x17a   : > { %4901 = vmatmul.mubr.f32.vlgmr.msra.gmra.mrb[16].mxu0 %v2830_v2  ;;  %v13368_v2 = vld [vmem:[%s14613_s21 + $0x6cc] ss:$784 sps:$4 sm:$0xff]  }
 0x17b   : > { %10979 = vmatpush1.bf16.xpose.msra.mxu0 %v13335_v32  ;;  %5040 = vmatprep.mubr.f32.mxu0 %v2855_v35  ;;  %v13392_v32 = vld [vmem:[%s14613_s21 + $0x6d0] ss:$784 sps:$4 sm:$0xff]   ;;  %v13399_v35 = vld [vmem:[%s14613_s21 + $0xcfc] ss:$784 sps:$4 sm:$0xff]  }
 0x17c   : > { %4971 = vmatmul.mubr.f32.vlgmr.msra.gmra.mrb[16].mxu1 %v2837_v4  ;;  %10981 = vmatprep.subr.bf16.mxu0 %v13340_v34  ;;  %v13371_v4 = vld [vmem:[%s14613_s21 + $0xce4] ss:$784 sps:$4 sm:$0xff]   ;;  %v13395_v34 = vld [vmem:[%s14613_s21 + $0x6d8] ss:$784 sps:$4 sm:$0xff]  }
 0x17d   : > { %10995 = vmatpush1.bf16.xpose.msra.mxu1 %v13339_v36  ;;  %5110 = vmatprep.mubr.f32.mxu1 %v2856_v37  ;;  %v13398_v36 = vld [vmem:[%s14613_s21 + $0xcf0] ss:$784 sps:$4 sm:$0xff]   ;;  %v13402_v37 = vld [vmem:[%s14613_s21 + $0x1314] ss:$784 sps:$4 sm:$0xff]  }
 0x17e   : > { %10997 = vmatprep.subr.bf16.mxu1 %v13343_v38  ;;  %v13401_v38 = vld [vmem:[%s14613_s21 + $0xcf8] ss:$784 sps:$4 sm:$0xff]  }
 0x183   : > { %10983 = vmatpush1.bf16.xpose.msra.mxu0 %v13342_v39  ;;  %v13405_v39 = vld [vmem:[%s14613_s21 + $0x131c] ss:$784 sps:$4 sm:$0xff]  }
 0x184   : > { %10985 = vmatprep.subr.bf16.mxu0 %v13346_v40 }
 0x185   : > { %10999 = vmatpush1.bf16.xpose.msra.mxu1 %v13345_v41 }
 0x186   : > { %11001 = vmatprep.subr.bf16.mxu1 %v13349_v42 }
 0x18b   : > { %10987 = vmatpush1.bf16.xpose.msra.mxu0 %v13348_v43  ;;  %v2601_v43 = vld [vmem:[%s14607_s7 + $0x60] sm:$0xff] }
 0x18c   : > { %10989 = vmatprep.subr.bf16.mxu0 %v13352_v44 }
 0x18d   : > { %11003 = vmatpush1.bf16.xpose.msra.mxu1 %v13351_v45  ;;  %v4062_v48 = vpop.f32.mrb[4].mxu0  ;;  %v13404_v45 = vld [vmem:[%s14613_s21 + $0x1310] ss:$784 sps:$4 sm:$0xff]  }
 0x18e   : > { %v4063_v50 = vadd.f32 %v4062_v48, %v3993_v25  ;;  %v4064_v51 = vpop.f32.mrb[5].mxu0  ;;  %11005 = vmatprep.subr.bf16.mxu1 %v13355_v46  ;;  %v2888_v25 = vrot.slane %v2874_v22, %v14630_v13  ;;  %v13408_v48 = vld [vmem:[%s14613_s21 + $0xc4] ss:$784 sps:$4 sm:$0xff]   ;;  %v13439_v22 = vld [vmem:[%s14613_s21 + $0xd8] ss:$784 sps:$4 sm:$0xff]  }
 0x18f   : > { %v4132_v52 = vpop.f32.mrb[4].mxu1  ;;  %v13412_v51 = vld [vmem:[%s14613_s21 + $0xcc] ss:$784 sps:$4 sm:$0xff]  }
 0x190   : > { %v4133_v53 = vadd.f32 %v4132_v52, %v4063_v50  ;;  %v4134_v54 = vpop.f32.mrb[5].mxu1  ;;  %v2890_v30 = vcombine.high %v2888_v25, %v2888_v25  ;;  %v2891_v50 = vcombine.high %v2601_v43, %v2601_v43  ;;  %v2898_v52 = vrot.slane %v2601_v43, %v14630_v13 }
 0x191   : > { %v13410_v54 = vld [vmem:[%s14613_s21 + $0xc0] ss:$784 sps:$4 sm:$0xff]  }
 0x193   : > { %10991 = vmatpush1.bf16.xpose.msra.mxu0 %v13354_v49  ;;  %v13407_v49 = vld [vmem:[%s14613_s21 + $0x1318] ss:$784 sps:$4 sm:$0xff]  }
 0x194   : > { %11009 = vmatprep.subr.bf16.mxu0 %v13358_v56  ;;  %v13415_v56 = vld [vmem:[%s14613_s21 + $0x6e4] ss:$784 sps:$4 sm:$0xff]  }
 0x195   : > { %11007 = vmatpush1.bf16.xpose.msra.mxu1 %v13357_v55  ;;  %v2906_v55 = vcombine.high %v2898_v52, %v2898_v52 }
 0x196   : > { %11025 = vmatprep.subr.bf16.mxu1 %v13362_v58 }
 0x19a   : > { %5041 = vmatmul.mubr.f32.vlgmr.msra.gmra.mrb[18].mxu0 %v2847_v31  ;;  %v13393_v31 = vld [vmem:[%s14613_s21 + $0x6dc] ss:$784 sps:$4 sm:$0xff]  }
 0x19b   : > { %11011 = vmatpush1.bf16.xpose.msra.mxu0 %v13360_v60  ;;  %5180 = vmatprep.mubr.f32.mxu0 %v2872_v63  ;;  %v13417_v60 = vld [vmem:[%s14613_s21 + $0x6e0] ss:$784 sps:$4 sm:$0xff]   ;;  %v13424_v63 = vld [vmem:[%s14613_s21 + $0xd0c] ss:$784 sps:$4 sm:$0xff]  }
 0x19c   : > { %5111 = vmatmul.mubr.f32.vlgmr.msra.gmra.mrb[18].mxu1 %v2854_v33  ;;  %11013 = vmatprep.subr.bf16.mxu0 %v13365_v62  ;;  %v13396_v33 = vld [vmem:[%s14613_s21 + $0xcf4] ss:$784 sps:$4 sm:$0xff]   ;;  %v13420_v62 = vld [vmem:[%s14613_s21 + $0x6e8] ss:$784 sps:$4 sm:$0xff]  }
 0x19d   : > { %11027 = vmatpush1.bf16.xpose.msra.mxu1 %v13364_v0  ;;  %5250 = vmatprep.mubr.f32.mxu1 %v2873_v1  ;;  %v13423_v0 = vld [vmem:[%s14613_s21 + $0xd00] ss:$784 sps:$4 sm:$0xff]   ;;  %v13427_v1 = vld [vmem:[%s14613_s21 + $0x1324] ss:$784 sps:$4 sm:$0xff]  }
 0x19e   : > { %11029 = vmatprep.subr.bf16.mxu1 %v13368_v2  ;;  %v13426_v2 = vld [vmem:[%s14613_s21 + $0xd08] ss:$784 sps:$4 sm:$0xff]  }
 0x1a3   : > { %11015 = vmatpush1.bf16.xpose.msra.mxu0 %v13367_v3  ;;  %v13430_v3 = vld [vmem:[%s14613_s21 + $0x132c] ss:$784 sps:$4 sm:$0xff]  }
 0x1a4   : > { %11017 = vmatprep.subr.bf16.mxu0 %v13371_v4 }
 0x1a5   : > { %11031 = vmatpush1.bf16.xpose.msra.mxu1 %v13370_v5 }
 0x1a6   : > { %11033 = vmatprep.subr.bf16.mxu1 %v13374_v6 }
 0x1ab   : > { %11019 = vmatpush1.bf16.xpose.msra.mxu0 %v13373_v7  ;;  %v2602_v7 = vld [vmem:[%s14607_s7 + $0x68] sm:$0xff] }
 0x1ac   : > { %11021 = vmatprep.subr.bf16.mxu0 %v13377_v8 }
 0x1ad   : > { %11035 = vmatpush1.bf16.xpose.msra.mxu1 %v13376_v9  ;;  %v4202_v12 = vpop.f32.mrb[6].mxu0  ;;  %v13429_v9 = vld [vmem:[%s14613_s21 + $0x1320] ss:$784 sps:$4 sm:$0xff]  }
 0x1ae   : > { %v4203_v15 = vadd.f32 %v4202_v12, %v4133_v53  ;;  %v4204_v16 = vpop.f32.mrb[7].mxu0  ;;  %11037 = vmatprep.subr.bf16.mxu1 %v13380_v10  ;;  %v2905_v53 = vrot.slane %v2891_v50, %v14630_v13  ;;  %v13433_v12 = vld [vmem:[%s14613_s21 + $0xd4] ss:$784 sps:$4 sm:$0xff]   ;;  %v13464_v50 = vld [vmem:[%s14613_s21 + $0xe8] ss:$784 sps:$4 sm:$0xff]  }
 0x1af   : > { %v4272_v17 = vpop.f32.mrb[6].mxu1  ;;  %v13437_v16 = vld [vmem:[%s14613_s21 + $0xdc] ss:$784 sps:$4 sm:$0xff]  }
 0x1b0   : > { %v4273_v18 = vadd.f32 %v4272_v17, %v4203_v15  ;;  %v4274_v19 = vpop.f32.mrb[7].mxu1  ;;  %v2907_v58 = vcombine.high %v2905_v53, %v2905_v53  ;;  %v2908_v15 = vcombine.high %v2602_v7, %v2602_v7  ;;  %v2915_v17 = vrot.slane %v2602_v7, %v14630_v13 }
 0x1b1   : > { %v13435_v19 = vld [vmem:[%s14613_s21 + $0xd0] ss:$784 sps:$4 sm:$0xff]  }
 0x1b3   : > { %11023 = vmatpush1.bf16.xpose.msra.mxu0 %v13379_v14  ;;  %v13432_v14 = vld [vmem:[%s14613_s21 + $0x1328] ss:$784 sps:$4 sm:$0xff]  }
 0x1b4   : > { %11041 = vmatprep.subr.bf16.mxu0 %v13383_v20  ;;  %v2923_v20 = vcombine.high %v2915_v17, %v2915_v17 }
 0x1b5   : > { %11039 = vmatpush1.bf16.xpose.msra.mxu1 %v13382_v21  ;;  %v13440_v21 = vld [vmem:[%s14613_s21 + $0x6f4] ss:$784 sps:$4 sm:$0xff]  }
 0x1b6   : > { %11057 = vmatprep.subr.bf16.mxu1 %v13387_v23 }
 0x1ba   : > { %5181 = vmatmul.mubr.f32.vlgmr.msra.gmra.mrb[20].mxu0 %v2864_v59  ;;  %v13418_v59 = vld [vmem:[%s14613_s21 + $0x6ec] ss:$784 sps:$4 sm:$0xff]  }
 0x1bb   : > { %11043 = vmatpush1.bf16.xpose.msra.mxu0 %v13385_v26  ;;  %5320 = vmatprep.mubr.f32.mxu0 %v2889_v27  ;;  %v13446_v26 = vld [vmem:[%s14613_s21 + $0xd14] ss:$784 sps:$4 sm:$0xff]   ;;  %v13445_v27 = vld [vmem:[%s14613_s21 + $0x6f8] ss:$784 sps:$4 sm:$0xff]  }
 0x1bc   : > { %5251 = vmatmul.mubr.f32.vlgmr.msra.gmra.mrb[20].mxu1 %v2871_v61  ;;  %11045 = vmatprep.subr.bf16.mxu0 %v13390_v28  ;;  %v13421_v61 = vld [vmem:[%s14613_s21 + $0xd04] ss:$784 sps:$4 sm:$0xff]   ;;  %v13449_v28 = vld [vmem:[%s14613_s21 + $0xd1c] ss:$784 sps:$4 sm:$0xff]  }
 0x1bd   : > { %11059 = vmatpush1.bf16.xpose.msra.mxu1 %v13389_v29  ;;  %5390 = vmatprep.mubr.f32.mxu1 %v2890_v30  ;;  %v13448_v29 = vld [vmem:[%s14613_s21 + $0xd10] ss:$784 sps:$4 sm:$0xff]   ;;  %v13452_v30 = vld [vmem:[%s14613_s21 + $0x1334] ss:$784 sps:$4 sm:$0xff]  }
 0x1be   : > { %11061 = vmatprep.subr.bf16.mxu1 %v13393_v31  ;;  %v13451_v31 = vld [vmem:[%s14613_s21 + $0xd18] ss:$784 sps:$4 sm:$0xff]  }
 0x1c3   : > { %11047 = vmatpush1.bf16.xpose.msra.mxu0 %v13392_v32  ;;  %v13455_v32 = vld [vmem:[%s14613_s21 + $0x133c] ss:$784 sps:$4 sm:$0xff]  }
 0x1c4   : > { %11049 = vmatprep.subr.bf16.mxu0 %v13396_v33 }
 0x1c5   : > { %11063 = vmatpush1.bf16.xpose.msra.mxu1 %v13395_v34 }
 0x1c6   : > { %11065 = vmatprep.subr.bf16.mxu1 %v13399_v35 }
 0x1cb   : > { %11051 = vmatpush1.bf16.xpose.msra.mxu0 %v13398_v36  ;;  %v2603_v36 = vld [vmem:[%s14607_s7 + $0x70] sm:$0xff] }
 0x1cc   : > { %11053 = vmatprep.subr.bf16.mxu0 %v13402_v37  ;;  %v2925_v43 = vcombine.high %v2603_v36, %v2603_v36 }
 0x1cd   : > { %11067 = vmatpush1.bf16.xpose.msra.mxu1 %v13401_v38  ;;  %v4342_v40 = vpop.f32.mrb[8].mxu0  ;;  %v13454_v38 = vld [vmem:[%s14613_s21 + $0x1330] ss:$784 sps:$4 sm:$0xff]  }
 0x1ce   : > { %v4343_v41 = vadd.f32 %v4342_v40, %v4273_v18  ;;  %v4344_v42 = vpop.f32.mrb[9].mxu0  ;;  %11069 = vmatprep.subr.bf16.mxu1 %v13405_v39  ;;  %v2922_v18 = vrot.slane %v2908_v15, %v14630_v13  ;;  %v13489_v15 = vld [vmem:[%s14613_s21 + $0xf8] ss:$784 sps:$4 sm:$0xff]  }
 0x1cf   : > { %v4412_v44 = vpop.f32.mrb[8].mxu1  ;;  %v13457_v42 = vld [vmem:[%s14613_s21 + $0x1338] ss:$784 sps:$4 sm:$0xff]  }
 0x1d0   : > { %v4413_v46 = vadd.f32 %v4412_v44, %v4343_v41  ;;  %v4414_v47 = vpop.f32.mrb[9].mxu1  ;;  %v2924_v23 = vcombine.high %v2922_v18, %v2922_v18  ;;  %v13458_v41 = vld [vmem:[%s14613_s21 + $0xe4] ss:$784 sps:$4 sm:$0xff]   ;;  %v13462_v44 = vld [vmem:[%s14613_s21 + $0xec] ss:$784 sps:$4 sm:$0xff]  }
 0x1d1   : > { %v13460_v47 = vld [vmem:[%s14613_s21 + $0xe0] ss:$784 sps:$4 sm:$0xff]  }
 0x1d3   : > { %11055 = vmatpush1.bf16.xpose.msra.mxu0 %v13404_v45  ;;  %v2932_v45 = vrot.slane %v2603_v36, %v14630_v13 }
 0x1d4   : > { %11073 = vmatprep.subr.bf16.mxu0 %v13408_v48 }
 0x1d5   : > { %11071 = vmatpush1.bf16.xpose.msra.mxu1 %v13407_v49  ;;  %v2940_v48 = vcombine.high %v2932_v45, %v2932_v45  ;;  %v13465_v49 = vld [vmem:[%s14613_s21 + $0x704] ss:$784 sps:$4 sm:$0xff]  }
 0x1d6   : > { %11089 = vmatprep.subr.bf16.mxu1 %v13412_v51 }
 0x1da   : > { %5321 = vmatmul.mubr.f32.vlgmr.msra.gmra.mrb[22].mxu0 %v2881_v24  ;;  %v13443_v24 = vld [vmem:[%s14613_s21 + $0x6fc] ss:$784 sps:$4 sm:$0xff]  }
 0x1db   : > { %11075 = vmatpush1.bf16.xpose.msra.mxu0 %v13410_v54  ;;  %5460 = vmatprep.mubr.f32.mxu0 %v2906_v55  ;;  %v13471_v54 = vld [vmem:[%s14613_s21 + $0xd24] ss:$784 sps:$4 sm:$0xff]   ;;  %v13470_v55 = vld [vmem:[%s14613_s21 + $0x708] ss:$784 sps:$4 sm:$0xff]  }
 0x1dc   : > { %5391 = vmatmul.mubr.f32.vlgmr.msra.gmra.mrb[22].mxu1 %v2888_v25  ;;  %11077 = vmatprep.subr.bf16.mxu0 %v13415_v56  ;;  %v13442_v25 = vld [vmem:[%s14613_s21 + $0x6f0] ss:$784 sps:$4 sm:$0xff]   ;;  %v13474_v56 = vld [vmem:[%s14613_s21 + $0xd2c] ss:$784 sps:$4 sm:$0xff]  }
 0x1dd   : > { %11091 = vmatpush1.bf16.xpose.msra.mxu1 %v13414_v57  ;;  %5530 = vmatprep.mubr.f32.mxu1 %v2907_v58  ;;  %v13473_v57 = vld [vmem:[%s14613_s21 + $0xd20] ss:$784 sps:$4 sm:$0xff]   ;;  %v13477_v58 = vld [vmem:[%s14613_s21 + $0x1344] ss:$784 sps:$4 sm:$0xff]  }
 0x1de   : > { %11093 = vmatprep.subr.bf16.mxu1 %v13418_v59  ;;  %v13476_v59 = vld [vmem:[%s14613_s21 + $0xd28] ss:$784 sps:$4 sm:$0xff]  }
 0x1e3   : > { %11079 = vmatpush1.bf16.xpose.msra.mxu0 %v13417_v60  ;;  %v13480_v60 = vld [vmem:[%s14613_s21 + $0x134c] ss:$784 sps:$4 sm:$0xff]  }
 0x1e4   : > { %11081 = vmatprep.subr.bf16.mxu0 %v13421_v61 }
 0x1e5   : > { %11095 = vmatpush1.bf16.xpose.msra.mxu1 %v13420_v62 }
 0x1e6   : > { %11097 = vmatprep.subr.bf16.mxu1 %v13424_v63 }
 0x1eb   : > { %11083 = vmatpush1.bf16.xpose.msra.mxu0 %v13423_v0  ;;  %v2604_v0 = vld [vmem:[%s14607_s7 + $0x78] sm:$0xff] }
 0x1ec   : > { %11085 = vmatprep.subr.bf16.mxu0 %v13427_v1  ;;  %v2942_v7 = vcombine.high %v2604_v0, %v2604_v0 }
 0x1ed   : > { %11099 = vmatpush1.bf16.xpose.msra.mxu1 %v13426_v2  ;;  %v4482_v4 = vpop.f32.mrb[10].mxu0  ;;  %v13479_v2 = vld [vmem:[%s14613_s21 + $0x1340] ss:$784 sps:$4 sm:$0xff]  }
 0x1ee   : > { %v4483_v5 = vadd.f32 %v4482_v4, %v4413_v46  ;;  %v4484_v6 = vpop.f32.mrb[11].mxu0  ;;  %11101 = vmatprep.subr.bf16.mxu1 %v13430_v3  ;;  %v2939_v46 = vrot.slane %v2925_v43, %v14630_v13  ;;  %v13514_v43 = vld [vmem:[%s14613_s21 + $0x108] ss:$784 sps:$4 sm:$0xff]  }
 0x1ef   : > { %v4552_v8 = vpop.f32.mrb[10].mxu1  ;;  %v13482_v6 = vld [vmem:[%s14613_s21 + $0x1348] ss:$784 sps:$4 sm:$0xff]  }
 0x1f0   : > { %v4553_v10 = vadd.f32 %v4552_v8, %v4483_v5  ;;  %v4554_v11 = vpop.f32.mrb[11].mxu1  ;;  %v2941_v51 = vcombine.high %v2939_v46, %v2939_v46  ;;  %v13483_v5 = vld [vmem:[%s14613_s21 + $0xf4] ss:$784 sps:$4 sm:$0xff]   ;;  %v13487_v8 = vld [vmem:[%s14613_s21 + $0xfc] ss:$784 sps:$4 sm:$0xff]  }
 0x1f1   : > { %v13485_v11 = vld [vmem:[%s14613_s21 + $0xf0] ss:$784 sps:$4 sm:$0xff]  }
 0x1f3   : > { %11087 = vmatpush1.bf16.xpose.msra.mxu0 %v13429_v9  ;;  %v2949_v9 = vrot.slane %v2604_v0, %v14630_v13 }
 0x1f4   : > { %11105 = vmatprep.subr.bf16.mxu0 %v13433_v12 }
 0x1f5   : > { %11103 = vmatpush1.bf16.xpose.msra.mxu1 %v13432_v14  ;;  %v2957_v12 = vcombine.high %v2949_v9, %v2949_v9  ;;  %v13490_v14 = vld [vmem:[%s14613_s21 + $0x714] ss:$784 sps:$4 sm:$0xff]  }
 0x1f6   : > { %11121 = vmatprep.subr.bf16.mxu1 %v13437_v16 }
 0x1fa   : > { %5461 = vmatmul.mubr.f32.vlgmr.msra.gmra.mrb[24].mxu0 %v2898_v52  ;;  %v13468_v52 = vld [vmem:[%s14613_s21 + $0x70c] ss:$784 sps:$4 sm:$0xff]  }
 0x1fb   : > { %11107 = vmatpush1.bf16.xpose.msra.mxu0 %v13435_v19  ;;  %5600 = vmatprep.mubr.f32.mxu0 %v2923_v20  ;;  %v13496_v19 = vld [vmem:[%s14613_s21 + $0xd34] ss:$784 sps:$4 sm:$0xff]   ;;  %v13495_v20 = vld [vmem:[%s14613_s21 + $0x718] ss:$784 sps:$4 sm:$0xff]  }
 0x1fc   : > { %5531 = vmatmul.mubr.f32.vlgmr.msra.gmra.mrb[24].mxu1 %v2905_v53  ;;  %11109 = vmatprep.subr.bf16.mxu0 %v13440_v21  ;;  %v13467_v53 = vld [vmem:[%s14613_s21 + $0x700] ss:$784 sps:$4 sm:$0xff]   ;;  %v13499_v21 = vld [vmem:[%s14613_s21 + $0xd3c] ss:$784 sps:$4 sm:$0xff]  }
 0x1fd   : > { %11123 = vmatpush1.bf16.xpose.msra.mxu1 %v13439_v22  ;;  %5670 = vmatprep.mubr.f32.mxu1 %v2924_v23  ;;  %v13498_v22 = vld [vmem:[%s14613_s21 + $0xd30] ss:$784 sps:$4 sm:$0xff]   ;;  %v13502_v23 = vld [vmem:[%s14613_s21 + $0x1354] ss:$784 sps:$4 sm:$0xff]  }
 0x1fe   : > { %11125 = vmatprep.subr.bf16.mxu1 %v13443_v24  ;;  %v13501_v24 = vld [vmem:[%s14613_s21 + $0xd38] ss:$784 sps:$4 sm:$0xff]  }
 0x203   : > { %11111 = vmatpush1.bf16.xpose.msra.mxu0 %v13442_v25  ;;  %v13505_v25 = vld [vmem:[%s14613_s21 + $0x135c] ss:$784 sps:$4 sm:$0xff]  }
 0x204   : > { %11113 = vmatprep.subr.bf16.mxu0 %v13446_v26 }
 0x205   : > { %11127 = vmatpush1.bf16.xpose.msra.mxu1 %v13445_v27 }
 0x206   : > { %11129 = vmatprep.subr.bf16.mxu1 %v13449_v28 }
 0x20b   : > { %11115 = vmatpush1.bf16.xpose.msra.mxu0 %v13448_v29  ;;  %v2605_v29 = vld [vmem:[%s14607_s7 + $0x80] sm:$0xff] }
 0x20c   : > { %11117 = vmatprep.subr.bf16.mxu0 %v13452_v30  ;;  %v2959_v36 = vcombine.high %v2605_v29, %v2605_v29 }
 0x20d   : > { %11131 = vmatpush1.bf16.xpose.msra.mxu1 %v13451_v31  ;;  %v4622_v33 = vpop.f32.mrb[12].mxu0  ;;  %v13504_v31 = vld [vmem:[%s14613_s21 + $0x1350] ss:$784 sps:$4 sm:$0xff]  }
 0x20e   : > { %v4623_v34 = vadd.f32 %v4622_v33, %v4553_v10  ;;  %v4624_v35 = vpop.f32.mrb[13].mxu0  ;;  %11133 = vmatprep.subr.bf16.mxu1 %v13455_v32  ;;  %v2956_v10 = vrot.slane %v2942_v7, %v14630_v13  ;;  %v13539_v7 = vld [vmem:[%s14613_s21 + $0x118] ss:$784 sps:$4 sm:$0xff]  }
 0x20f   : > { %v4692_v37 = vpop.f32.mrb[12].mxu1  ;;  %v13507_v35 = vld [vmem:[%s14613_s21 + $0x1358] ss:$784 sps:$4 sm:$0xff]  }
 0x210   : > { %v4693_v39 = vadd.f32 %v4692_v37, %v4623_v34  ;;  %v4694_v40 = vpop.f32.mrb[13].mxu1  ;;  %v2958_v16 = vcombine.high %v2956_v10, %v2956_v10  ;;  %v13508_v34 = vld [vmem:[%s14613_s21 + $0x104] ss:$784 sps:$4 sm:$0xff]   ;;  %v13512_v37 = vld [vmem:[%s14613_s21 + $0x10c] ss:$784 sps:$4 sm:$0xff]  }
 0x211   : > { %v13510_v40 = vld [vmem:[%s14613_s21 + $0x100] ss:$784 sps:$4 sm:$0xff]  }
 0x213   : > { %11119 = vmatpush1.bf16.xpose.msra.mxu0 %v13454_v38  ;;  %v2966_v38 = vrot.slane %v2605_v29, %v14630_v13 }
 0x214   : > { %11137 = vmatprep.subr.bf16.mxu0 %v13458_v41 }
 0x215   : > { %11135 = vmatpush1.bf16.xpose.msra.mxu1 %v13457_v42  ;;  %v2974_v41 = vcombine.high %v2966_v38, %v2966_v38  ;;  %v13515_v42 = vld [vmem:[%s14613_s21 + $0x724] ss:$784 sps:$4 sm:$0xff]  }
 0x216   : > { %11153 = vmatprep.subr.bf16.mxu1 %v13462_v44 }
 0x21a   : > { %5601 = vmatmul.mubr.f32.vlgmr.msra.gmra.mrb[26].mxu0 %v2915_v17  ;;  %v13493_v17 = vld [vmem:[%s14613_s21 + $0x71c] ss:$784 sps:$4 sm:$0xff]  }
 0x21b   : > { %11139 = vmatpush1.bf16.xpose.msra.mxu0 %v13460_v47  ;;  %5740 = vmatprep.mubr.f32.mxu0 %v2940_v48  ;;  %v13521_v47 = vld [vmem:[%s14613_s21 + $0xd44] ss:$784 sps:$4 sm:$0xff]   ;;  %v13520_v48 = vld [vmem:[%s14613_s21 + $0x728] ss:$784 sps:$4 sm:$0xff]  }
 0x21c   : > { %5671 = vmatmul.mubr.f32.vlgmr.msra.gmra.mrb[26].mxu1 %v2922_v18  ;;  %11141 = vmatprep.subr.bf16.mxu0 %v13465_v49  ;;  %v13492_v18 = vld [vmem:[%s14613_s21 + $0x710] ss:$784 sps:$4 sm:$0xff]   ;;  %v13524_v49 = vld [vmem:[%s14613_s21 + $0xd4c] ss:$784 sps:$4 sm:$0xff]  }
 0x21d   : > { %11155 = vmatpush1.bf16.xpose.msra.mxu1 %v13464_v50  ;;  %5810 = vmatprep.mubr.f32.mxu1 %v2941_v51  ;;  %v13523_v50 = vld [vmem:[%s14613_s21 + $0xd40] ss:$784 sps:$4 sm:$0xff]   ;;  %v13527_v51 = vld [vmem:[%s14613_s21 + $0x1364] ss:$784 sps:$4 sm:$0xff]  }
 0x21e   : > { %11157 = vmatprep.subr.bf16.mxu1 %v13468_v52  ;;  %v13526_v52 = vld [vmem:[%s14613_s21 + $0xd48] ss:$784 sps:$4 sm:$0xff]  }
 0x223   : > { %11143 = vmatpush1.bf16.xpose.msra.mxu0 %v13467_v53  ;;  %v13530_v53 = vld [vmem:[%s14613_s21 + $0x136c] ss:$784 sps:$4 sm:$0xff]  }
 0x224   : > { %11145 = vmatprep.subr.bf16.mxu0 %v13471_v54 }
 0x225   : > { %11159 = vmatpush1.bf16.xpose.msra.mxu1 %v13470_v55 }
 0x226   : > { %11161 = vmatprep.subr.bf16.mxu1 %v13474_v56 }
 0x22b   : > { %11147 = vmatpush1.bf16.xpose.msra.mxu0 %v13473_v57  ;;  %v2606_v57 = vld [vmem:[%s14607_s7 + $0x88] sm:$0xff] }
 0x22c   : > { %11149 = vmatprep.subr.bf16.mxu0 %v13477_v58  ;;  %v2976_v0 = vcombine.high %v2606_v57, %v2606_v57 }
 0x22d   : > { %11163 = vmatpush1.bf16.xpose.msra.mxu1 %v13476_v59  ;;  %v4762_v61 = vpop.f32.mrb[14].mxu0  ;;  %v13529_v59 = vld [vmem:[%s14613_s21 + $0x1360] ss:$784 sps:$4 sm:$0xff]  }
 0x22e   : > { %v4763_v62 = vadd.f32 %v4762_v61, %v4693_v39  ;;  %v4764_v63 = vpop.f32.mrb[15].mxu0  ;;  %11165 = vmatprep.subr.bf16.mxu1 %v13480_v60  ;;  %v2973_v39 = vrot.slane %v2959_v36, %v14630_v13  ;;  %v13564_v36 = vld [vmem:[%s14613_s21 + $0x128] ss:$784 sps:$4 sm:$0xff]  }
 0x22f   : > { %v4832_v1 = vpop.f32.mrb[14].mxu1  ;;  %v13532_v63 = vld [vmem:[%s14613_s21 + $0x1368] ss:$784 sps:$4 sm:$0xff]  }
 0x230   : > { %v4833_v3 = vadd.f32 %v4832_v1, %v4763_v62  ;;  %v4834_v4 = vpop.f32.mrb[15].mxu1  ;;  %v2975_v44 = vcombine.high %v2973_v39, %v2973_v39  ;;  %v13533_v62 = vld [vmem:[%s14613_s21 + $0x114] ss:$784 sps:$4 sm:$0xff]   ;;  %v13537_v1 = vld [vmem:[%s14613_s21 + $0x11c] ss:$784 sps:$4 sm:$0xff]  }
 0x231   : > { %v13535_v4 = vld [vmem:[%s14613_s21 + $0x110] ss:$784 sps:$4 sm:$0xff]  }
 0x233   : > { %11151 = vmatpush1.bf16.xpose.msra.mxu0 %v13479_v2  ;;  %v2983_v2 = vrot.slane %v2606_v57, %v14630_v13 }
 0x234   : > { %11169 = vmatprep.subr.bf16.mxu0 %v13483_v5 }
 0x235   : > { %11167 = vmatpush1.bf16.xpose.msra.mxu1 %v13482_v6  ;;  %v2991_v5 = vcombine.high %v2983_v2, %v2983_v2  ;;  %v13540_v6 = vld [vmem:[%s14613_s21 + $0x734] ss:$784 sps:$4 sm:$0xff]  }
 0x236   : > { %11185 = vmatprep.subr.bf16.mxu1 %v13487_v8 }
 0x23a   : > { %5741 = vmatmul.mubr.f32.vlgmr.msra.gmra.mrb[28].mxu0 %v2932_v45  ;;  %v13518_v45 = vld [vmem:[%s14613_s21 + $0x72c] ss:$784 sps:$4 sm:$0xff]  }
 0x23b   : > { %11171 = vmatpush1.bf16.xpose.msra.mxu0 %v13485_v11  ;;  %5880 = vmatprep.mubr.f32.mxu0 %v2957_v12  ;;  %v13546_v11 = vld [vmem:[%s14613_s21 + $0xd54] ss:$784 sps:$4 sm:$0xff]   ;;  %v13545_v12 = vld [vmem:[%s14613_s21 + $0x738] ss:$784 sps:$4 sm:$0xff]  }
 0x23c   : > { %5811 = vmatmul.mubr.f32.vlgmr.msra.gmra.mrb[28].mxu1 %v2939_v46  ;;  %11173 = vmatprep.subr.bf16.mxu0 %v13490_v14  ;;  %v13517_v46 = vld [vmem:[%s14613_s21 + $0x720] ss:$784 sps:$4 sm:$0xff]   ;;  %v13549_v14 = vld [vmem:[%s14613_s21 + $0xd5c] ss:$784 sps:$4 sm:$0xff]  }
 0x23d   : > { %11187 = vmatpush1.bf16.xpose.msra.mxu1 %v13489_v15  ;;  %5950 = vmatprep.mubr.f32.mxu1 %v2958_v16  ;;  %v13548_v15 = vld [vmem:[%s14613_s21 + $0xd50] ss:$784 sps:$4 sm:$0xff]   ;;  %v13552_v16 = vld [vmem:[%s14613_s21 + $0x1374] ss:$784 sps:$4 sm:$0xff]  }
 0x23e   : > { %11189 = vmatprep.subr.bf16.mxu1 %v13493_v17  ;;  %v13551_v17 = vld [vmem:[%s14613_s21 + $0xd58] ss:$784 sps:$4 sm:$0xff]  }
 0x243   : > { %11175 = vmatpush1.bf16.xpose.msra.mxu0 %v13492_v18  ;;  %v13555_v18 = vld [vmem:[%s14613_s21 + $0x137c] ss:$784 sps:$4 sm:$0xff]  }
 0x244   : > { %11177 = vmatprep.subr.bf16.mxu0 %v13496_v19 }
 0x245   : > { %11191 = vmatpush1.bf16.xpose.msra.mxu1 %v13495_v20 }
 0x246   : > { %11193 = vmatprep.subr.bf16.mxu1 %v13499_v21 }
 0x24b   : > { %11179 = vmatpush1.bf16.xpose.msra.mxu0 %v13498_v22  ;;  %v2607_v22 = vld [vmem:[%s14607_s7 + $0x90] sm:$0xff] }
 0x24c   : > { %11181 = vmatprep.subr.bf16.mxu0 %v13502_v23  ;;  %v2993_v29 = vcombine.high %v2607_v22, %v2607_v22 }
 0x24d   : > { %11195 = vmatpush1.bf16.xpose.msra.mxu1 %v13501_v24  ;;  %v4902_v26 = vpop.f32.mrb[16].mxu0  ;;  %v13554_v24 = vld [vmem:[%s14613_s21 + $0x1370] ss:$784 sps:$4 sm:$0xff]  }
 0x24e   : > { %v4903_v27 = vadd.f32 %v4902_v26, %v4833_v3  ;;  %v4904_v28 = vpop.f32.mrb[17].mxu0  ;;  %11197 = vmatprep.subr.bf16.mxu1 %v13505_v25  ;;  %v2990_v3 = vrot.slane %v2976_v0, %v14630_v13  ;;  %v13589_v0 = vld [vmem:[%s14613_s21 + $0x138] ss:$784 sps:$4 sm:$0xff]  }
 0x24f   : > { %v4972_v30 = vpop.f32.mrb[16].mxu1  ;;  %v13557_v28 = vld [vmem:[%s14613_s21 + $0x1378] ss:$784 sps:$4 sm:$0xff]  }
 0x250   : > { %v4973_v32 = vadd.f32 %v4972_v30, %v4903_v27  ;;  %v4974_v33 = vpop.f32.mrb[17].mxu1  ;;  %v2992_v8 = vcombine.high %v2990_v3, %v2990_v3  ;;  %v13558_v27 = vld [vmem:[%s14613_s21 + $0x124] ss:$784 sps:$4 sm:$0xff]   ;;  %v13562_v30 = vld [vmem:[%s14613_s21 + $0x12c] ss:$784 sps:$4 sm:$0xff]  }
 0x251   : > { %v13560_v33 = vld [vmem:[%s14613_s21 + $0x120] ss:$784 sps:$4 sm:$0xff]  }
 0x253   : > { %11183 = vmatpush1.bf16.xpose.msra.mxu0 %v13504_v31  ;;  %v3000_v31 = vrot.slane %v2607_v22, %v14630_v13 }
 0x254   : > { %11201 = vmatprep.subr.bf16.mxu0 %v13508_v34 }
 0x255   : > { %11199 = vmatpush1.bf16.xpose.msra.mxu1 %v13507_v35  ;;  %v3008_v34 = vcombine.high %v3000_v31, %v3000_v31  ;;  %v13565_v35 = vld [vmem:[%s14613_s21 + $0x744] ss:$784 sps:$4 sm:$0xff]  }
 0x256   : > { %11217 = vmatprep.subr.bf16.mxu1 %v13512_v37 }
 0x25a   : > { %5881 = vmatmul.mubr.f32.vlgmr.msra.gmra.mrb[30].mxu0 %v2949_v9  ;;  %v13543_v9 = vld [vmem:[%s14613_s21 + $0x73c] ss:$784 sps:$4 sm:$0xff]  }
 0x25b   : > { %11203 = vmatpush1.bf16.xpose.msra.mxu0 %v13510_v40  ;;  %6020 = vmatprep.mubr.f32.mxu0 %v2974_v41  ;;  %v13571_v40 = vld [vmem:[%s14613_s21 + $0xd64] ss:$784 sps:$4 sm:$0xff]   ;;  %v13570_v41 = vld [vmem:[%s14613_s21 + $0x748] ss:$784 sps:$4 sm:$0xff]  }
 0x25c   : > { %5951 = vmatmul.mubr.f32.vlgmr.msra.gmra.mrb[30].mxu1 %v2956_v10  ;;  %11205 = vmatprep.subr.bf16.mxu0 %v13515_v42  ;;  %v13542_v10 = vld [vmem:[%s14613_s21 + $0x730] ss:$784 sps:$4 sm:$0xff]   ;;  %v13574_v42 = vld [vmem:[%s14613_s21 + $0xd6c] ss:$784 sps:$4 sm:$0xff]  }
 0x25d   : > { %11219 = vmatpush1.bf16.xpose.msra.mxu1 %v13514_v43  ;;  %6090 = vmatprep.mubr.f32.mxu1 %v2975_v44  ;;  %v13573_v43 = vld [vmem:[%s14613_s21 + $0xd60] ss:$784 sps:$4 sm:$0xff]   ;;  %v13577_v44 = vld [vmem:[%s14613_s21 + $0x1384] ss:$784 sps:$4 sm:$0xff]  }
 0x25e   : > { %11221 = vmatprep.subr.bf16.mxu1 %v13518_v45  ;;  %v13576_v45 = vld [vmem:[%s14613_s21 + $0xd68] ss:$784 sps:$4 sm:$0xff]  }
 0x263   : > { %11207 = vmatpush1.bf16.xpose.msra.mxu0 %v13517_v46  ;;  %v13580_v46 = vld [vmem:[%s14613_s21 + $0x138c] ss:$784 sps:$4 sm:$0xff]  }
 0x264   : > { %11209 = vmatprep.subr.bf16.mxu0 %v13521_v47 }
 0x265   : > { %11223 = vmatpush1.bf16.xpose.msra.mxu1 %v13520_v48 }
 0x266   : > { %11225 = vmatprep.subr.bf16.mxu1 %v13524_v49 }
 0x26b   : > { %11211 = vmatpush1.bf16.xpose.msra.mxu0 %v13523_v50  ;;  %v2608_v50 = vld [vmem:[%s14607_s7 + $0x98] sm:$0xff] }
 0x26c   : > { %11213 = vmatprep.subr.bf16.mxu0 %v13527_v51  ;;  %v3010_v57 = vcombine.high %v2608_v50, %v2608_v50 }
 0x26d   : > { %11227 = vmatpush1.bf16.xpose.msra.mxu1 %v13526_v52  ;;  %v5042_v54 = vpop.f32.mrb[18].mxu0  ;;  %v13579_v52 = vld [vmem:[%s14613_s21 + $0x1380] ss:$784 sps:$4 sm:$0xff]  }
 0x26e   : > { %v5043_v55 = vadd.f32 %v5042_v54, %v4973_v32  ;;  %v5044_v56 = vpop.f32.mrb[19].mxu0  ;;  %11229 = vmatprep.subr.bf16.mxu1 %v13530_v53  ;;  %v3007_v32 = vrot.slane %v2993_v29, %v14630_v13  ;;  %v13614_v29 = vld [vmem:[%s14613_s21 + $0x148] ss:$784 sps:$4 sm:$0xff]  }
 0x26f   : > { %v5112_v58 = vpop.f32.mrb[18].mxu1  ;;  %v13582_v56 = vld [vmem:[%s14613_s21 + $0x1388] ss:$784 sps:$4 sm:$0xff]  }
 0x270   : > { %v5113_v60 = vadd.f32 %v5112_v58, %v5043_v55  ;;  %v5114_v61 = vpop.f32.mrb[19].mxu1  ;;  %v3009_v37 = vcombine.high %v3007_v32, %v3007_v32  ;;  %v13583_v55 = vld [vmem:[%s14613_s21 + $0x134] ss:$784 sps:$4 sm:$0xff]   ;;  %v13587_v58 = vld [vmem:[%s14613_s21 + $0x13c] ss:$784 sps:$4 sm:$0xff]  }
 0x271   : > { %v13585_v61 = vld [vmem:[%s14613_s21 + $0x130] ss:$784 sps:$4 sm:$0xff]  }
 0x273   : > { %11215 = vmatpush1.bf16.xpose.msra.mxu0 %v13529_v59  ;;  %v3017_v59 = vrot.slane %v2608_v50, %v14630_v13 }
 0x274   : > { %11233 = vmatprep.subr.bf16.mxu0 %v13533_v62 }
 0x275   : > { %11231 = vmatpush1.bf16.xpose.msra.mxu1 %v13532_v63  ;;  %v3025_v62 = vcombine.high %v3017_v59, %v3017_v59  ;;  %v13590_v63 = vld [vmem:[%s14613_s21 + $0x754] ss:$784 sps:$4 sm:$0xff]  }
 0x276   : > { %11249 = vmatprep.subr.bf16.mxu1 %v13537_v1 }
 0x27a   : > { %6021 = vmatmul.mubr.f32.vlgmr.msra.gmra.mrb[32].mxu0 %v2966_v38  ;;  %v13568_v38 = vld [vmem:[%s14613_s21 + $0x74c] ss:$784 sps:$4 sm:$0xff]  }
 0x27b   : > { %11235 = vmatpush1.bf16.xpose.msra.mxu0 %v13535_v4  ;;  %6160 = vmatprep.mubr.f32.mxu0 %v2991_v5  ;;  %v13596_v4 = vld [vmem:[%s14613_s21 + $0xd74] ss:$784 sps:$4 sm:$0xff]   ;;  %v13595_v5 = vld [vmem:[%s14613_s21 + $0x758] ss:$784 sps:$4 sm:$0xff]  }
 0x27c   : > { %6091 = vmatmul.mubr.f32.vlgmr.msra.gmra.mrb[32].mxu1 %v2973_v39  ;;  %11237 = vmatprep.subr.bf16.mxu0 %v13540_v6  ;;  %v13567_v39 = vld [vmem:[%s14613_s21 + $0x740] ss:$784 sps:$4 sm:$0xff]   ;;  %v13599_v6 = vld [vmem:[%s14613_s21 + $0xd7c] ss:$784 sps:$4 sm:$0xff]  }
 0x27d   : > { %11251 = vmatpush1.bf16.xpose.msra.mxu1 %v13539_v7  ;;  %6230 = vmatprep.mubr.f32.mxu1 %v2992_v8  ;;  %v13598_v7 = vld [vmem:[%s14613_s21 + $0xd70] ss:$784 sps:$4 sm:$0xff]   ;;  %v13602_v8 = vld [vmem:[%s14613_s21 + $0x1394] ss:$784 sps:$4 sm:$0xff]  }
 0x27e   : > { %11253 = vmatprep.subr.bf16.mxu1 %v13543_v9  ;;  %v13601_v9 = vld [vmem:[%s14613_s21 + $0xd78] ss:$784 sps:$4 sm:$0xff]  }
 0x283   : > { %11239 = vmatpush1.bf16.xpose.msra.mxu0 %v13542_v10  ;;  %v13605_v10 = vld [vmem:[%s14613_s21 + $0x139c] ss:$784 sps:$4 sm:$0xff]  }
 0x284   : > { %11241 = vmatprep.subr.bf16.mxu0 %v13546_v11 }
 0x285   : > { %11255 = vmatpush1.bf16.xpose.msra.mxu1 %v13545_v12 }
 0x286   : > { %11257 = vmatprep.subr.bf16.mxu1 %v13549_v14 }
 0x28b   : > { %11243 = vmatpush1.bf16.xpose.msra.mxu0 %v13548_v15  ;;  %v2609_v15 = vld [vmem:[%s14607_s7 + $0xa0] sm:$0xff] }
 0x28c   : > { %11245 = vmatprep.subr.bf16.mxu0 %v13552_v16  ;;  %v3027_v22 = vcombine.high %v2609_v15, %v2609_v15 }
 0x28d   : > { %11259 = vmatpush1.bf16.xpose.msra.mxu1 %v13551_v17  ;;  %v5182_v19 = vpop.f32.mrb[20].mxu0  ;;  %v13604_v17 = vld [vmem:[%s14613_s21 + $0x1390] ss:$784 sps:$4 sm:$0xff]  }
 0x28e   : > { %v5183_v20 = vadd.f32 %v5182_v19, %v5113_v60  ;;  %v5184_v21 = vpop.f32.mrb[21].mxu0  ;;  %11261 = vmatprep.subr.bf16.mxu1 %v13555_v18  ;;  %v3024_v60 = vrot.slane %v3010_v57, %v14630_v13  ;;  %v13639_v57 = vld [vmem:[%s14613_s21 + $0x158] ss:$784 sps:$4 sm:$0xff]  }
 0x28f   : > { %v5252_v23 = vpop.f32.mrb[20].mxu1  ;;  %v13607_v21 = vld [vmem:[%s14613_s21 + $0x1398] ss:$784 sps:$4 sm:$0xff]  }
 0x290   : > { %v5253_v25 = vadd.f32 %v5252_v23, %v5183_v20  ;;  %v5254_v26 = vpop.f32.mrb[21].mxu1  ;;  %v3026_v1 = vcombine.high %v3024_v60, %v3024_v60  ;;  %v13608_v20 = vld [vmem:[%s14613_s21 + $0x144] ss:$784 sps:$4 sm:$0xff]   ;;  %v13612_v23 = vld [vmem:[%s14613_s21 + $0x14c] ss:$784 sps:$4 sm:$0xff]  }
 0x291   : > { %v13610_v26 = vld [vmem:[%s14613_s21 + $0x140] ss:$784 sps:$4 sm:$0xff]  }
 0x293   : > { %11247 = vmatpush1.bf16.xpose.msra.mxu0 %v13554_v24  ;;  %v3034_v24 = vrot.slane %v2609_v15, %v14630_v13 }
 0x294   : > { %11265 = vmatprep.subr.bf16.mxu0 %v13558_v27 }
 0x295   : > { %11263 = vmatpush1.bf16.xpose.msra.mxu1 %v13557_v28  ;;  %v3042_v27 = vcombine.high %v3034_v24, %v3034_v24  ;;  %v13615_v28 = vld [vmem:[%s14613_s21 + $0x764] ss:$784 sps:$4 sm:$0xff]  }
 0x296   : > { %11281 = vmatprep.subr.bf16.mxu1 %v13562_v30 }
 0x29a   : > { %6161 = vmatmul.mubr.f32.vlgmr.msra.gmra.mrb[34].mxu0 %v2983_v2  ;;  %v13593_v2 = vld [vmem:[%s14613_s21 + $0x75c] ss:$784 sps:$4 sm:$0xff]  }
 0x29b   : > { %11267 = vmatpush1.bf16.xpose.msra.mxu0 %v13560_v33  ;;  %6300 = vmatprep.mubr.f32.mxu0 %v3008_v34  ;;  %v13621_v33 = vld [vmem:[%s14613_s21 + $0xd84] ss:$784 sps:$4 sm:$0xff]   ;;  %v13620_v34 = vld [vmem:[%s14613_s21 + $0x768] ss:$784 sps:$4 sm:$0xff]  }
 0x29c   : > { %6231 = vmatmul.mubr.f32.vlgmr.msra.gmra.mrb[34].mxu1 %v2990_v3  ;;  %11269 = vmatprep.subr.bf16.mxu0 %v13565_v35  ;;  %v13592_v3 = vld [vmem:[%s14613_s21 + $0x750] ss:$784 sps:$4 sm:$0xff]   ;;  %v13624_v35 = vld [vmem:[%s14613_s21 + $0xd8c] ss:$784 sps:$4 sm:$0xff]  }
 0x29d   : > { %11283 = vmatpush1.bf16.xpose.msra.mxu1 %v13564_v36  ;;  %6370 = vmatprep.mubr.f32.mxu1 %v3009_v37  ;;  %v13623_v36 = vld [vmem:[%s14613_s21 + $0xd80] ss:$784 sps:$4 sm:$0xff]   ;;  %v13627_v37 = vld [vmem:[%s14613_s21 + $0x13a4] ss:$784 sps:$4 sm:$0xff]  }
 0x29e   : > { %11285 = vmatprep.subr.bf16.mxu1 %v13568_v38  ;;  %v13626_v38 = vld [vmem:[%s14613_s21 + $0xd88] ss:$784 sps:$4 sm:$0xff]  }
 0x2a3   : > { %11271 = vmatpush1.bf16.xpose.msra.mxu0 %v13567_v39  ;;  %v13630_v39 = vld [vmem:[%s14613_s21 + $0x13ac] ss:$784 sps:$4 sm:$0xff]  }
 0x2a4   : > { %11273 = vmatprep.subr.bf16.mxu0 %v13571_v40 }
 0x2a5   : > { %11287 = vmatpush1.bf16.xpose.msra.mxu1 %v13570_v41 }
 0x2a6   : > { %11289 = vmatprep.subr.bf16.mxu1 %v13574_v42 }
 0x2ab   : > { %11275 = vmatpush1.bf16.xpose.msra.mxu0 %v13573_v43  ;;  %v2610_v43 = vld [vmem:[%s14607_s7 + $0xa8] sm:$0xff] }
 0x2ac   : > { %11277 = vmatprep.subr.bf16.mxu0 %v13577_v44  ;;  %v3044_v50 = vcombine.high %v2610_v43, %v2610_v43 }
 0x2ad   : > { %11291 = vmatpush1.bf16.xpose.msra.mxu1 %v13576_v45  ;;  %v5322_v47 = vpop.f32.mrb[22].mxu0  ;;  %v13629_v45 = vld [vmem:[%s14613_s21 + $0x13a0] ss:$784 sps:$4 sm:$0xff]  }
 0x2ae   : > { %v5323_v48 = vadd.f32 %v5322_v47, %v5253_v25  ;;  %v5324_v49 = vpop.f32.mrb[23].mxu0  ;;  %11293 = vmatprep.subr.bf16.mxu1 %v13580_v46  ;;  %v3041_v25 = vrot.slane %v3027_v22, %v14630_v13  ;;  %v13664_v22 = vld [vmem:[%s14613_s21 + $0x168] ss:$784 sps:$4 sm:$0xff]  }
 0x2af   : > { %v5392_v51 = vpop.f32.mrb[22].mxu1  ;;  %v13632_v49 = vld [vmem:[%s14613_s21 + $0x13a8] ss:$784 sps:$4 sm:$0xff]  }
 0x2b0   : > { %v5393_v53 = vadd.f32 %v5392_v51, %v5323_v48  ;;  %v5394_v54 = vpop.f32.mrb[23].mxu1  ;;  %v3043_v30 = vcombine.high %v3041_v25, %v3041_v25  ;;  %v13633_v48 = vld [vmem:[%s14613_s21 + $0x154] ss:$784 sps:$4 sm:$0xff]   ;;  %v13637_v51 = vld [vmem:[%s14613_s21 + $0x15c] ss:$784 sps:$4 sm:$0xff]  }
 0x2b1   : > { %v13635_v54 = vld [vmem:[%s14613_s21 + $0x150] ss:$784 sps:$4 sm:$0xff]  }
 0x2b3   : > { %11279 = vmatpush1.bf16.xpose.msra.mxu0 %v13579_v52  ;;  %v3051_v52 = vrot.slane %v2610_v43, %v14630_v13 }
 0x2b4   : > { %11297 = vmatprep.subr.bf16.mxu0 %v13583_v55 }
 0x2b5   : > { %11295 = vmatpush1.bf16.xpose.msra.mxu1 %v13582_v56  ;;  %v3059_v55 = vcombine.high %v3051_v52, %v3051_v52  ;;  %v13640_v56 = vld [vmem:[%s14613_s21 + $0x774] ss:$784 sps:$4 sm:$0xff]  }
 0x2b6   : > { %11313 = vmatprep.subr.bf16.mxu1 %v13587_v58 }
 0x2ba   : > { %6301 = vmatmul.mubr.f32.vlgmr.msra.gmra.mrb[36].mxu0 %v3000_v31  ;;  %v13618_v31 = vld [vmem:[%s14613_s21 + $0x76c] ss:$784 sps:$4 sm:$0xff]  }
 0x2bb   : > { %11299 = vmatpush1.bf16.xpose.msra.mxu0 %v13585_v61  ;;  %6440 = vmatprep.mubr.f32.mxu0 %v3025_v62  ;;  %v13646_v61 = vld [vmem:[%s14613_s21 + $0xd94] ss:$784 sps:$4 sm:$0xff]   ;;  %v13645_v62 = vld [vmem:[%s14613_s21 + $0x778] ss:$784 sps:$4 sm:$0xff]  }
 0x2bc   : > { %6371 = vmatmul.mubr.f32.vlgmr.msra.gmra.mrb[36].mxu1 %v3007_v32  ;;  %11301 = vmatprep.subr.bf16.mxu0 %v13590_v63  ;;  %v13617_v32 = vld [vmem:[%s14613_s21 + $0x760] ss:$784 sps:$4 sm:$0xff]   ;;  %v13649_v63 = vld [vmem:[%s14613_s21 + $0xd9c] ss:$784 sps:$4 sm:$0xff]  }
 0x2bd   : > { %11315 = vmatpush1.bf16.xpose.msra.mxu1 %v13589_v0  ;;  %6510 = vmatprep.mubr.f32.mxu1 %v3026_v1  ;;  %v13648_v0 = vld [vmem:[%s14613_s21 + $0xd90] ss:$784 sps:$4 sm:$0xff]   ;;  %v13652_v1 = vld [vmem:[%s14613_s21 + $0x13b4] ss:$784 sps:$4 sm:$0xff]  }
 0x2be   : > { %11317 = vmatprep.subr.bf16.mxu1 %v13593_v2  ;;  %v13651_v2 = vld [vmem:[%s14613_s21 + $0xd98] ss:$784 sps:$4 sm:$0xff]  }
 0x2c3   : > { %11303 = vmatpush1.bf16.xpose.msra.mxu0 %v13592_v3  ;;  %v13655_v3 = vld [vmem:[%s14613_s21 + $0x13bc] ss:$784 sps:$4 sm:$0xff]  }
 0x2c4   : > { %11305 = vmatprep.subr.bf16.mxu0 %v13596_v4 }
 0x2c5   : > { %11319 = vmatpush1.bf16.xpose.msra.mxu1 %v13595_v5 }
 0x2c6   : > { %11321 = vmatprep.subr.bf16.mxu1 %v13599_v6 }
 0x2cb   : > { %11307 = vmatpush1.bf16.xpose.msra.mxu0 %v13598_v7  ;;  %v2611_v7 = vld [vmem:[%s14607_s7 + $0xb0] sm:$0xff] }
 0x2cc   : > { %11309 = vmatprep.subr.bf16.mxu0 %v13602_v8  ;;  %v3061_v15 = vcombine.high %v2611_v7, %v2611_v7 }
 0x2cd   : > { %11323 = vmatpush1.bf16.xpose.msra.mxu1 %v13601_v9  ;;  %v5462_v11 = vpop.f32.mrb[24].mxu0  ;;  %v13654_v9 = vld [vmem:[%s14613_s21 + $0x13b0] ss:$784 sps:$4 sm:$0xff]  }
 0x2ce   : > { %v5463_v12 = vadd.f32 %v5462_v11, %v5393_v53  ;;  %v5464_v14 = vpop.f32.mrb[25].mxu0  ;;  %11325 = vmatprep.subr.bf16.mxu1 %v13605_v10  ;;  %v3058_v53 = vrot.slane %v3044_v50, %v14630_v13  ;;  %v13689_v50 = vld [vmem:[%s14613_s21 + $0x178] ss:$784 sps:$4 sm:$0xff]  }
 0x2cf   : > { %v5532_v16 = vpop.f32.mrb[24].mxu1  ;;  %v13657_v14 = vld [vmem:[%s14613_s21 + $0x13b8] ss:$784 sps:$4 sm:$0xff]  }
 0x2d0   : > { %v5533_v18 = vadd.f32 %v5532_v16, %v5463_v12  ;;  %v5534_v19 = vpop.f32.mrb[25].mxu1  ;;  %v3060_v58 = vcombine.high %v3058_v53, %v3058_v53  ;;  %v13658_v12 = vld [vmem:[%s14613_s21 + $0x164] ss:$784 sps:$4 sm:$0xff]   ;;  %v13662_v16 = vld [vmem:[%s14613_s21 + $0x16c] ss:$784 sps:$4 sm:$0xff]  }
 0x2d1   : > { %v13660_v19 = vld [vmem:[%s14613_s21 + $0x160] ss:$784 sps:$4 sm:$0xff]  }
 0x2d3   : > { %11311 = vmatpush1.bf16.xpose.msra.mxu0 %v13604_v17  ;;  %v3068_v17 = vrot.slane %v2611_v7, %v14630_v13 }
 0x2d4   : > { %11329 = vmatprep.subr.bf16.mxu0 %v13608_v20 }
 0x2d5   : > { %11327 = vmatpush1.bf16.xpose.msra.mxu1 %v13607_v21  ;;  %v3076_v20 = vcombine.high %v3068_v17, %v3068_v17  ;;  %v13665_v21 = vld [vmem:[%s14613_s21 + $0x784] ss:$784 sps:$4 sm:$0xff]  }
 0x2d6   : > { %11345 = vmatprep.subr.bf16.mxu1 %v13612_v23 }
 0x2da   : > { %6441 = vmatmul.mubr.f32.vlgmr.msra.gmra.mrb[38].mxu0 %v3017_v59  ;;  %v13643_v59 = vld [vmem:[%s14613_s21 + $0x77c] ss:$784 sps:$4 sm:$0xff]  }
 0x2db   : > { %11331 = vmatpush1.bf16.xpose.msra.mxu0 %v13610_v26  ;;  %6580 = vmatprep.mubr.f32.mxu0 %v3042_v27  ;;  %v13671_v26 = vld [vmem:[%s14613_s21 + $0xda4] ss:$784 sps:$4 sm:$0xff]   ;;  %v13670_v27 = vld [vmem:[%s14613_s21 + $0x788] ss:$784 sps:$4 sm:$0xff]  }
 0x2dc   : > { %6511 = vmatmul.mubr.f32.vlgmr.msra.gmra.mrb[38].mxu1 %v3024_v60  ;;  %11333 = vmatprep.subr.bf16.mxu0 %v13615_v28  ;;  %v13642_v60 = vld [vmem:[%s14613_s21 + $0x770] ss:$784 sps:$4 sm:$0xff]   ;;  %v13674_v28 = vld [vmem:[%s14613_s21 + $0xdac] ss:$784 sps:$4 sm:$0xff]  }
 0x2dd   : > { %11347 = vmatpush1.bf16.xpose.msra.mxu1 %v13614_v29  ;;  %6650 = vmatprep.mubr.f32.mxu1 %v3043_v30  ;;  %v13673_v29 = vld [vmem:[%s14613_s21 + $0xda0] ss:$784 sps:$4 sm:$0xff]   ;;  %v13677_v30 = vld [vmem:[%s14613_s21 + $0x13c4] ss:$784 sps:$4 sm:$0xff]  }
 0x2de   : > { %11349 = vmatprep.subr.bf16.mxu1 %v13618_v31  ;;  %v13676_v31 = vld [vmem:[%s14613_s21 + $0xda8] ss:$784 sps:$4 sm:$0xff]  }
 0x2e3   : > { %11335 = vmatpush1.bf16.xpose.msra.mxu0 %v13617_v32  ;;  %v13680_v32 = vld [vmem:[%s14613_s21 + $0x13cc] ss:$784 sps:$4 sm:$0xff]  }
 0x2e4   : > { %11337 = vmatprep.subr.bf16.mxu0 %v13621_v33 }
 0x2e5   : > { %11351 = vmatpush1.bf16.xpose.msra.mxu1 %v13620_v34 }
 0x2e6   : > { %11353 = vmatprep.subr.bf16.mxu1 %v13624_v35 }
 0x2eb   : > { %11339 = vmatpush1.bf16.xpose.msra.mxu0 %v13623_v36  ;;  %v2612_v36 = vld [vmem:[%s14607_s7 + $0xb8] sm:$0xff] }
 0x2ec   : > { %11341 = vmatprep.subr.bf16.mxu0 %v13627_v37  ;;  %v3078_v43 = vcombine.high %v2612_v36, %v2612_v36 }
 0x2ed   : > { %11355 = vmatpush1.bf16.xpose.msra.mxu1 %v13626_v38  ;;  %v5602_v40 = vpop.f32.mrb[26].mxu0  ;;  %v13679_v38 = vld [vmem:[%s14613_s21 + $0x13c0] ss:$784 sps:$4 sm:$0xff]  }
 0x2ee   : > { %v5603_v41 = vadd.f32 %v5602_v40, %v5533_v18  ;;  %v5604_v42 = vpop.f32.mrb[27].mxu0  ;;  %11357 = vmatprep.subr.bf16.mxu1 %v13630_v39  ;;  %v3075_v18 = vrot.slane %v3061_v15, %v14630_v13  ;;  %v13714_v15 = vld [vmem:[%s14613_s21 + $0x188] ss:$784 sps:$4 sm:$0xff]  }
 0x2ef   : > { %v5672_v44 = vpop.f32.mrb[26].mxu1  ;;  %v13682_v42 = vld [vmem:[%s14613_s21 + $0x13c8] ss:$784 sps:$4 sm:$0xff]  }
 0x2f0   : > { %v5673_v46 = vadd.f32 %v5672_v44, %v5603_v41  ;;  %v5674_v47 = vpop.f32.mrb[27].mxu1  ;;  %v3077_v23 = vcombine.high %v3075_v18, %v3075_v18  ;;  %v13683_v41 = vld [vmem:[%s14613_s21 + $0x174] ss:$784 sps:$4 sm:$0xff]   ;;  %v13687_v44 = vld [vmem:[%s14613_s21 + $0x17c] ss:$784 sps:$4 sm:$0xff]  }
 0x2f1   : > { %v13685_v47 = vld [vmem:[%s14613_s21 + $0x170] ss:$784 sps:$4 sm:$0xff]  }
 0x2f3   : > { %11343 = vmatpush1.bf16.xpose.msra.mxu0 %v13629_v45  ;;  %v3085_v45 = vrot.slane %v2612_v36, %v14630_v13 }
 0x2f4   : > { %11361 = vmatprep.subr.bf16.mxu0 %v13633_v48 }
 0x2f5   : > { %11359 = vmatpush1.bf16.xpose.msra.mxu1 %v13632_v49  ;;  %v3093_v48 = vcombine.high %v3085_v45, %v3085_v45  ;;  %v13690_v49 = vld [vmem:[%s14613_s21 + $0x794] ss:$784 sps:$4 sm:$0xff]  }
 0x2f6   : > { %11377 = vmatprep.subr.bf16.mxu1 %v13637_v51 }
 0x2fa   : > { %6581 = vmatmul.mubr.f32.vlgmr.msra.gmra.mrb[40].mxu0 %v3034_v24  ;;  %v13668_v24 = vld [vmem:[%s14613_s21 + $0x78c] ss:$784 sps:$4 sm:$0xff]  }
 0x2fb   : > { %11363 = vmatpush1.bf16.xpose.msra.mxu0 %v13635_v54  ;;  %6720 = vmatprep.mubr.f32.mxu0 %v3059_v55  ;;  %v13696_v54 = vld [vmem:[%s14613_s21 + $0xdb4] ss:$784 sps:$4 sm:$0xff]   ;;  %v13695_v55 = vld [vmem:[%s14613_s21 + $0x798] ss:$784 sps:$4 sm:$0xff]  }
 0x2fc   : > { %6651 = vmatmul.mubr.f32.vlgmr.msra.gmra.mrb[40].mxu1 %v3041_v25  ;;  %11365 = vmatprep.subr.bf16.mxu0 %v13640_v56  ;;  %v13667_v25 = vld [vmem:[%s14613_s21 + $0x780] ss:$784 sps:$4 sm:$0xff]   ;;  %v13699_v56 = vld [vmem:[%s14613_s21 + $0xdbc] ss:$784 sps:$4 sm:$0xff]  }
 0x2fd   : > { %11379 = vmatpush1.bf16.xpose.msra.mxu1 %v13639_v57  ;;  %6790 = vmatprep.mubr.f32.mxu1 %v3060_v58  ;;  %v13698_v57 = vld [vmem:[%s14613_s21 + $0xdb0] ss:$784 sps:$4 sm:$0xff]   ;;  %v13702_v58 = vld [vmem:[%s14613_s21 + $0x13d4] ss:$784 sps:$4 sm:$0xff]  }
 0x2fe   : > { %11381 = vmatprep.subr.bf16.mxu1 %v13643_v59  ;;  %v13701_v59 = vld [vmem:[%s14613_s21 + $0xdb8] ss:$784 sps:$4 sm:$0xff]  }
 0x303   : > { %11367 = vmatpush1.bf16.xpose.msra.mxu0 %v13642_v60  ;;  %v13705_v60 = vld [vmem:[%s14613_s21 + $0x13dc] ss:$784 sps:$4 sm:$0xff]  }
 0x304   : > { %11369 = vmatprep.subr.bf16.mxu0 %v13646_v61 }
 0x305   : > { %11383 = vmatpush1.bf16.xpose.msra.mxu1 %v13645_v62 }
 0x306   : > { %11385 = vmatprep.subr.bf16.mxu1 %v13649_v63 }
 0x30b   : > { %11371 = vmatpush1.bf16.xpose.msra.mxu0 %v13648_v0  ;;  %v2613_v0 = vld [vmem:[%s14607_s7 + $0xc0] sm:$0xff] }
 0x30c   : > { %11373 = vmatprep.subr.bf16.mxu0 %v13652_v1  ;;  %v3095_v7 = vcombine.high %v2613_v0, %v2613_v0 }
 0x30d   : > { %11387 = vmatpush1.bf16.xpose.msra.mxu1 %v13651_v2  ;;  %v5742_v4 = vpop.f32.mrb[28].mxu0  ;;  %v13704_v2 = vld [vmem:[%s14613_s21 + $0x13d0] ss:$784 sps:$4 sm:$0xff]  }
 0x30e   : > { %v5743_v5 = vadd.f32 %v5742_v4, %v5673_v46  ;;  %v5744_v6 = vpop.f32.mrb[29].mxu0  ;;  %11389 = vmatprep.subr.bf16.mxu1 %v13655_v3  ;;  %v3092_v46 = vrot.slane %v3078_v43, %v14630_v13  ;;  %v13739_v43 = vld [vmem:[%s14613_s21 + $0x198] ss:$784 sps:$4 sm:$0xff]  }
 0x30f   : > { %v5812_v8 = vpop.f32.mrb[28].mxu1  ;;  %v13707_v6 = vld [vmem:[%s14613_s21 + $0x13d8] ss:$784 sps:$4 sm:$0xff]  }
 0x310   : > { %v5813_v10 = vadd.f32 %v5812_v8, %v5743_v5  ;;  %v5814_v11 = vpop.f32.mrb[29].mxu1  ;;  %v3094_v51 = vcombine.high %v3092_v46, %v3092_v46  ;;  %v13708_v5 = vld [vmem:[%s14613_s21 + $0x184] ss:$784 sps:$4 sm:$0xff]   ;;  %v13712_v8 = vld [vmem:[%s14613_s21 + $0x18c] ss:$784 sps:$4 sm:$0xff]  }
 0x311   : > { %v13710_v11 = vld [vmem:[%s14613_s21 + $0x180] ss:$784 sps:$4 sm:$0xff]  }
 0x313   : > { %11375 = vmatpush1.bf16.xpose.msra.mxu0 %v13654_v9  ;;  %v3102_v9 = vrot.slane %v2613_v0, %v14630_v13 }
 0x314   : > { %11393 = vmatprep.subr.bf16.mxu0 %v13658_v12 }
 0x315   : > { %11391 = vmatpush1.bf16.xpose.msra.mxu1 %v13657_v14  ;;  %v3110_v12 = vcombine.high %v3102_v9, %v3102_v9  ;;  %v13715_v14 = vld [vmem:[%s14613_s21 + $0x7a4] ss:$784 sps:$4 sm:$0xff]  }
 0x316   : > { %11409 = vmatprep.subr.bf16.mxu1 %v13662_v16 }
 0x31a   : > { %6721 = vmatmul.mubr.f32.vlgmr.msra.gmra.mrb[42].mxu0 %v3051_v52  ;;  %v13693_v52 = vld [vmem:[%s14613_s21 + $0x79c] ss:$784 sps:$4 sm:$0xff]  }
 0x31b   : > { %11395 = vmatpush1.bf16.xpose.msra.mxu0 %v13660_v19  ;;  %6860 = vmatprep.mubr.f32.mxu0 %v3076_v20  ;;  %v13721_v19 = vld [vmem:[%s14613_s21 + $0xdc4] ss:$784 sps:$4 sm:$0xff]   ;;  %v13720_v20 = vld [vmem:[%s14613_s21 + $0x7a8] ss:$784 sps:$4 sm:$0xff]  }
 0x31c   : > { %6791 = vmatmul.mubr.f32.vlgmr.msra.gmra.mrb[42].mxu1 %v3058_v53  ;;  %11397 = vmatprep.subr.bf16.mxu0 %v13665_v21  ;;  %v13692_v53 = vld [vmem:[%s14613_s21 + $0x790] ss:$784 sps:$4 sm:$0xff]   ;;  %v13724_v21 = vld [vmem:[%s14613_s21 + $0xdcc] ss:$784 sps:$4 sm:$0xff]  }
 0x31d   : > { %11411 = vmatpush1.bf16.xpose.msra.mxu1 %v13664_v22  ;;  %6930 = vmatprep.mubr.f32.mxu1 %v3077_v23  ;;  %v13723_v22 = vld [vmem:[%s14613_s21 + $0xdc0] ss:$784 sps:$4 sm:$0xff]   ;;  %v13727_v23 = vld [vmem:[%s14613_s21 + $0x13e4] ss:$784 sps:$4 sm:$0xff]  }
 0x31e   : > { %11413 = vmatprep.subr.bf16.mxu1 %v13668_v24  ;;  %v13726_v24 = vld [vmem:[%s14613_s21 + $0xdc8] ss:$784 sps:$4 sm:$0xff]  }
 0x323   : > { %11399 = vmatpush1.bf16.xpose.msra.mxu0 %v13667_v25  ;;  %v13730_v25 = vld [vmem:[%s14613_s21 + $0x13ec] ss:$784 sps:$4 sm:$0xff]  }
 0x324   : > { %11401 = vmatprep.subr.bf16.mxu0 %v13671_v26 }
 0x325   : > { %11415 = vmatpush1.bf16.xpose.msra.mxu1 %v13670_v27 }
 0x326   : > { %11417 = vmatprep.subr.bf16.mxu1 %v13674_v28 }
 0x32b   : > { %11403 = vmatpush1.bf16.xpose.msra.mxu0 %v13673_v29  ;;  %v2614_v29 = vld [vmem:[%s14607_s7 + $0xc8] sm:$0xff] }
 0x32c   : > { %11405 = vmatprep.subr.bf16.mxu0 %v13677_v30  ;;  %v3112_v36 = vcombine.high %v2614_v29, %v2614_v29 }
 0x32d   : > { %11419 = vmatpush1.bf16.xpose.msra.mxu1 %v13676_v31  ;;  %v5882_v33 = vpop.f32.mrb[30].mxu0  ;;  %v13729_v31 = vld [vmem:[%s14613_s21 + $0x13e0] ss:$784 sps:$4 sm:$0xff]  }
 0x32e   : > { %v5883_v34 = vadd.f32 %v5882_v33, %v5813_v10  ;;  %v5884_v35 = vpop.f32.mrb[31].mxu0  ;;  %11421 = vmatprep.subr.bf16.mxu1 %v13680_v32  ;;  %v3109_v10 = vrot.slane %v3095_v7, %v14630_v13  ;;  %v13764_v7 = vld [vmem:[%s14613_s21 + $0x1a8] ss:$784 sps:$4 sm:$0xff]  }
 0x32f   : > { %v5952_v37 = vpop.f32.mrb[30].mxu1  ;;  %v13732_v35 = vld [vmem:[%s14613_s21 + $0x13e8] ss:$784 sps:$4 sm:$0xff]  }
 0x330   : > { %v5953_v39 = vadd.f32 %v5952_v37, %v5883_v34  ;;  %v5954_v40 = vpop.f32.mrb[31].mxu1  ;;  %v3111_v16 = vcombine.high %v3109_v10, %v3109_v10  ;;  %v13733_v34 = vld [vmem:[%s14613_s21 + $0x194] ss:$784 sps:$4 sm:$0xff]   ;;  %v13737_v37 = vld [vmem:[%s14613_s21 + $0x19c] ss:$784 sps:$4 sm:$0xff]  }
 0x331   : > { %v13735_v40 = vld [vmem:[%s14613_s21 + $0x190] ss:$784 sps:$4 sm:$0xff]  }
 0x333   : > { %11407 = vmatpush1.bf16.xpose.msra.mxu0 %v13679_v38  ;;  %v3119_v38 = vrot.slane %v2614_v29, %v14630_v13 }
 0x334   : > { %11425 = vmatprep.subr.bf16.mxu0 %v13683_v41 }
 0x335   : > { %11423 = vmatpush1.bf16.xpose.msra.mxu1 %v13682_v42  ;;  %v3127_v41 = vcombine.high %v3119_v38, %v3119_v38  ;;  %v13740_v42 = vld [vmem:[%s14613_s21 + $0x7b4] ss:$784 sps:$4 sm:$0xff]  }
 0x336   : > { %11441 = vmatprep.subr.bf16.mxu1 %v13687_v44 }
 0x33a   : > { %6861 = vmatmul.mubr.f32.vlgmr.msra.gmra.mrb[44].mxu0 %v3068_v17  ;;  %v13718_v17 = vld [vmem:[%s14613_s21 + $0x7ac] ss:$784 sps:$4 sm:$0xff]  }
 0x33b   : > { %11427 = vmatpush1.bf16.xpose.msra.mxu0 %v13685_v47  ;;  %7000 = vmatprep.mubr.f32.mxu0 %v3093_v48  ;;  %v13746_v47 = vld [vmem:[%s14613_s21 + $0xdd4] ss:$784 sps:$4 sm:$0xff]   ;;  %v13745_v48 = vld [vmem:[%s14613_s21 + $0x7b8] ss:$784 sps:$4 sm:$0xff]  }
 0x33c   : > { %6931 = vmatmul.mubr.f32.vlgmr.msra.gmra.mrb[44].mxu1 %v3075_v18  ;;  %11429 = vmatprep.subr.bf16.mxu0 %v13690_v49  ;;  %v13717_v18 = vld [vmem:[%s14613_s21 + $0x7a0] ss:$784 sps:$4 sm:$0xff]   ;;  %v13749_v49 = vld [vmem:[%s14613_s21 + $0xddc] ss:$784 sps:$4 sm:$0xff]  }
 0x33d   : > { %11443 = vmatpush1.bf16.xpose.msra.mxu1 %v13689_v50  ;;  %7070 = vmatprep.mubr.f32.mxu1 %v3094_v51  ;;  %v13748_v50 = vld [vmem:[%s14613_s21 + $0xdd0] ss:$784 sps:$4 sm:$0xff]   ;;  %v13752_v51 = vld [vmem:[%s14613_s21 + $0x13f4] ss:$784 sps:$4 sm:$0xff]  }
 0x33e   : > { %11445 = vmatprep.subr.bf16.mxu1 %v13693_v52  ;;  %v13751_v52 = vld [vmem:[%s14613_s21 + $0xdd8] ss:$784 sps:$4 sm:$0xff]  }
 0x343   : > { %11431 = vmatpush1.bf16.xpose.msra.mxu0 %v13692_v53  ;;  %v13755_v53 = vld [vmem:[%s14613_s21 + $0x13fc] ss:$784 sps:$4 sm:$0xff]  }
 0x344   : > { %11433 = vmatprep.subr.bf16.mxu0 %v13696_v54 }
 0x345   : > { %11447 = vmatpush1.bf16.xpose.msra.mxu1 %v13695_v55 }
 0x346   : > { %11449 = vmatprep.subr.bf16.mxu1 %v13699_v56 }
 0x34b   : > { %11435 = vmatpush1.bf16.xpose.msra.mxu0 %v13698_v57  ;;  %v2615_v57 = vld [vmem:[%s14607_s7 + $0xd0] sm:$0xff] }
 0x34c   : > { %11437 = vmatprep.subr.bf16.mxu0 %v13702_v58  ;;  %v3129_v0 = vcombine.high %v2615_v57, %v2615_v57 }
 0x34d   : > { %11451 = vmatpush1.bf16.xpose.msra.mxu1 %v13701_v59  ;;  %v6022_v61 = vpop.f32.mrb[32].mxu0  ;;  %v13754_v59 = vld [vmem:[%s14613_s21 + $0x13f0] ss:$784 sps:$4 sm:$0xff]  }
 0x34e   : > { %v6023_v62 = vadd.f32 %v6022_v61, %v5953_v39  ;;  %v6024_v63 = vpop.f32.mrb[33].mxu0  ;;  %11453 = vmatprep.subr.bf16.mxu1 %v13705_v60  ;;  %v3126_v39 = vrot.slane %v3112_v36, %v14630_v13  ;;  %v13789_v36 = vld [vmem:[%s14613_s21 + $0x1b8] ss:$784 sps:$4 sm:$0xff]  }
 0x34f   : > { %v6092_v1 = vpop.f32.mrb[32].mxu1  ;;  %v13757_v63 = vld [vmem:[%s14613_s21 + $0x13f8] ss:$784 sps:$4 sm:$0xff]  }
 0x350   : > { %v6093_v3 = vadd.f32 %v6092_v1, %v6023_v62  ;;  %v6094_v4 = vpop.f32.mrb[33].mxu1  ;;  %v3128_v44 = vcombine.high %v3126_v39, %v3126_v39  ;;  %v13758_v62 = vld [vmem:[%s14613_s21 + $0x1a4] ss:$784 sps:$4 sm:$0xff]   ;;  %v13762_v1 = vld [vmem:[%s14613_s21 + $0x1ac] ss:$784 sps:$4 sm:$0xff]  }
 0x351   : > { %v13760_v4 = vld [vmem:[%s14613_s21 + $0x1a0] ss:$784 sps:$4 sm:$0xff]  }
 0x353   : > { %11439 = vmatpush1.bf16.xpose.msra.mxu0 %v13704_v2  ;;  %v3136_v2 = vrot.slane %v2615_v57, %v14630_v13 }
 0x354   : > { %11457 = vmatprep.subr.bf16.mxu0 %v13708_v5 }
 0x355   : > { %11455 = vmatpush1.bf16.xpose.msra.mxu1 %v13707_v6  ;;  %v3144_v5 = vcombine.high %v3136_v2, %v3136_v2  ;;  %v13765_v6 = vld [vmem:[%s14613_s21 + $0x7c4] ss:$784 sps:$4 sm:$0xff]  }
 0x356   : > { %11473 = vmatprep.subr.bf16.mxu1 %v13712_v8 }
 0x35a   : > { %7001 = vmatmul.mubr.f32.vlgmr.msra.gmra.mrb[46].mxu0 %v3085_v45  ;;  %v13743_v45 = vld [vmem:[%s14613_s21 + $0x7bc] ss:$784 sps:$4 sm:$0xff]  }
 0x35b   : > { %11459 = vmatpush1.bf16.xpose.msra.mxu0 %v13710_v11  ;;  %7140 = vmatprep.mubr.f32.mxu0 %v3110_v12  ;;  %v13771_v11 = vld [vmem:[%s14613_s21 + $0xde4] ss:$784 sps:$4 sm:$0xff]   ;;  %v13770_v12 = vld [vmem:[%s14613_s21 + $0x7c8] ss:$784 sps:$4 sm:$0xff]  }
 0x35c   : > { %7071 = vmatmul.mubr.f32.vlgmr.msra.gmra.mrb[46].mxu1 %v3092_v46  ;;  %11461 = vmatprep.subr.bf16.mxu0 %v13715_v14  ;;  %v13742_v46 = vld [vmem:[%s14613_s21 + $0x7b0] ss:$784 sps:$4 sm:$0xff]   ;;  %v13774_v14 = vld [vmem:[%s14613_s21 + $0xdec] ss:$784 sps:$4 sm:$0xff]  }
 0x35d   : > { %11475 = vmatpush1.bf16.xpose.msra.mxu1 %v13714_v15  ;;  %7210 = vmatprep.mubr.f32.mxu1 %v3111_v16  ;;  %v13773_v15 = vld [vmem:[%s14613_s21 + $0xde0] ss:$784 sps:$4 sm:$0xff]   ;;  %v13777_v16 = vld [vmem:[%s14613_s21 + $0x1404] ss:$784 sps:$4 sm:$0xff]  }
 0x35e   : > { %11477 = vmatprep.subr.bf16.mxu1 %v13718_v17  ;;  %v13776_v17 = vld [vmem:[%s14613_s21 + $0xde8] ss:$784 sps:$4 sm:$0xff]  }
 0x363   : > { %11463 = vmatpush1.bf16.xpose.msra.mxu0 %v13717_v18  ;;  %v13780_v18 = vld [vmem:[%s14613_s21 + $0x140c] ss:$784 sps:$4 sm:$0xff]  }
 0x364   : > { %11465 = vmatprep.subr.bf16.mxu0 %v13721_v19 }
 0x365   : > { %11479 = vmatpush1.bf16.xpose.msra.mxu1 %v13720_v20 }
 0x366   : > { %11481 = vmatprep.subr.bf16.mxu1 %v13724_v21 }
 0x36b   : > { %11467 = vmatpush1.bf16.xpose.msra.mxu0 %v13723_v22  ;;  %v2616_v22 = vld [vmem:[%s14607_s7 + $0xd8] sm:$0xff] }
 0x36c   : > { %11469 = vmatprep.subr.bf16.mxu0 %v13727_v23  ;;  %v3146_v29 = vcombine.high %v2616_v22, %v2616_v22 }
 0x36d   : > { %11483 = vmatpush1.bf16.xpose.msra.mxu1 %v13726_v24  ;;  %v6162_v26 = vpop.f32.mrb[34].mxu0  ;;  %v13779_v24 = vld [vmem:[%s14613_s21 + $0x1400] ss:$784 sps:$4 sm:$0xff]  }
 0x36e   : > { %v6163_v27 = vadd.f32 %v6162_v26, %v6093_v3  ;;  %v6164_v28 = vpop.f32.mrb[35].mxu0  ;;  %11485 = vmatprep.subr.bf16.mxu1 %v13730_v25  ;;  %v3143_v3 = vrot.slane %v3129_v0, %v14630_v13  ;;  %v13814_v0 = vld [vmem:[%s14613_s21 + $0x1c8] ss:$784 sps:$4 sm:$0xff]  }
 0x36f   : > { %v6232_v30 = vpop.f32.mrb[34].mxu1  ;;  %v13782_v28 = vld [vmem:[%s14613_s21 + $0x1408] ss:$784 sps:$4 sm:$0xff]  }
 0x370   : > { %v6233_v32 = vadd.f32 %v6232_v30, %v6163_v27  ;;  %v6234_v33 = vpop.f32.mrb[35].mxu1  ;;  %v3145_v8 = vcombine.high %v3143_v3, %v3143_v3  ;;  %v13783_v27 = vld [vmem:[%s14613_s21 + $0x1b4] ss:$784 sps:$4 sm:$0xff]   ;;  %v13787_v30 = vld [vmem:[%s14613_s21 + $0x1bc] ss:$784 sps:$4 sm:$0xff]  }
 0x371   : > { %v13785_v33 = vld [vmem:[%s14613_s21 + $0x1b0] ss:$784 sps:$4 sm:$0xff]  }
 0x373   : > { %11471 = vmatpush1.bf16.xpose.msra.mxu0 %v13729_v31  ;;  %v3153_v31 = vrot.slane %v2616_v22, %v14630_v13 }
 0x374   : > { %11489 = vmatprep.subr.bf16.mxu0 %v13733_v34 }
 0x375   : > { %11487 = vmatpush1.bf16.xpose.msra.mxu1 %v13732_v35  ;;  %v3161_v34 = vcombine.high %v3153_v31, %v3153_v31  ;;  %v13790_v35 = vld [vmem:[%s14613_s21 + $0x7d4] ss:$784 sps:$4 sm:$0xff]  }
 0x376   : > { %11505 = vmatprep.subr.bf16.mxu1 %v13737_v37 }
 0x37a   : > { %7141 = vmatmul.mubr.f32.vlgmr.msra.gmra.mrb[48].mxu0 %v3102_v9  ;;  %v13768_v9 = vld [vmem:[%s14613_s21 + $0x7cc] ss:$784 sps:$4 sm:$0xff]  }
 0x37b   : > { %11491 = vmatpush1.bf16.xpose.msra.mxu0 %v13735_v40  ;;  %7280 = vmatprep.mubr.f32.mxu0 %v3127_v41  ;;  %v13796_v40 = vld [vmem:[%s14613_s21 + $0xdf4] ss:$784 sps:$4 sm:$0xff]   ;;  %v13795_v41 = vld [vmem:[%s14613_s21 + $0x7d8] ss:$784 sps:$4 sm:$0xff]  }
 0x37c   : > { %7211 = vmatmul.mubr.f32.vlgmr.msra.gmra.mrb[48].mxu1 %v3109_v10  ;;  %11493 = vmatprep.subr.bf16.mxu0 %v13740_v42  ;;  %v13767_v10 = vld [vmem:[%s14613_s21 + $0x7c0] ss:$784 sps:$4 sm:$0xff]   ;;  %v13799_v42 = vld [vmem:[%s14613_s21 + $0xdfc] ss:$784 sps:$4 sm:$0xff]  }
 0x37d   : > { %11507 = vmatpush1.bf16.xpose.msra.mxu1 %v13739_v43  ;;  %7350 = vmatprep.mubr.f32.mxu1 %v3128_v44  ;;  %v13798_v43 = vld [vmem:[%s14613_s21 + $0xdf0] ss:$784 sps:$4 sm:$0xff]   ;;  %v13802_v44 = vld [vmem:[%s14613_s21 + $0x1414] ss:$784 sps:$4 sm:$0xff]  }
 0x37e   : > { %11509 = vmatprep.subr.bf16.mxu1 %v13743_v45  ;;  %v13801_v45 = vld [vmem:[%s14613_s21 + $0xdf8] ss:$784 sps:$4 sm:$0xff]  }
 0x383   : > { %11495 = vmatpush1.bf16.xpose.msra.mxu0 %v13742_v46  ;;  %v13805_v46 = vld [vmem:[%s14613_s21 + $0x141c] ss:$784 sps:$4 sm:$0xff]  }
 0x384   : > { %11497 = vmatprep.subr.bf16.mxu0 %v13746_v47 }
 0x385   : > { %11511 = vmatpush1.bf16.xpose.msra.mxu1 %v13745_v48 }
 0x386   : > { %11513 = vmatprep.subr.bf16.mxu1 %v13749_v49 }
 0x38b   : > { %11499 = vmatpush1.bf16.xpose.msra.mxu0 %v13748_v50  ;;  %v2617_v50 = vld [vmem:[%s14607_s7 + $0xe0] sm:$0xff] }
 0x38c   : > { %11501 = vmatprep.subr.bf16.mxu0 %v13752_v51  ;;  %v3163_v57 = vcombine.high %v2617_v50, %v2617_v50 }
 0x38d   : > { %11515 = vmatpush1.bf16.xpose.msra.mxu1 %v13751_v52  ;;  %v6302_v54 = vpop.f32.mrb[36].mxu0  ;;  %v13804_v52 = vld [vmem:[%s14613_s21 + $0x1410] ss:$784 sps:$4 sm:$0xff]  }
 0x38e   : > { %v6303_v55 = vadd.f32 %v6302_v54, %v6233_v32  ;;  %v6304_v56 = vpop.f32.mrb[37].mxu0  ;;  %11517 = vmatprep.subr.bf16.mxu1 %v13755_v53  ;;  %v3160_v32 = vrot.slane %v3146_v29, %v14630_v13  ;;  %v13839_v29 = vld [vmem:[%s14613_s21 + $0x1d8] ss:$784 sps:$4 sm:$0xff]  }
 0x38f   : > { %v6372_v58 = vpop.f32.mrb[36].mxu1  ;;  %v13807_v56 = vld [vmem:[%s14613_s21 + $0x1418] ss:$784 sps:$4 sm:$0xff]  }
 0x390   : > { %v6373_v60 = vadd.f32 %v6372_v58, %v6303_v55  ;;  %v6374_v61 = vpop.f32.mrb[37].mxu1  ;;  %v3162_v37 = vcombine.high %v3160_v32, %v3160_v32  ;;  %v13808_v55 = vld [vmem:[%s14613_s21 + $0x1c4] ss:$784 sps:$4 sm:$0xff]   ;;  %v13812_v58 = vld [vmem:[%s14613_s21 + $0x1cc] ss:$784 sps:$4 sm:$0xff]  }
 0x391   : > { %v13810_v61 = vld [vmem:[%s14613_s21 + $0x1c0] ss:$784 sps:$4 sm:$0xff]  }
 0x393   : > { %11503 = vmatpush1.bf16.xpose.msra.mxu0 %v13754_v59  ;;  %v3170_v59 = vrot.slane %v2617_v50, %v14630_v13 }
 0x394   : > { %11521 = vmatprep.subr.bf16.mxu0 %v13758_v62 }
 0x395   : > { %11519 = vmatpush1.bf16.xpose.msra.mxu1 %v13757_v63  ;;  %v3178_v62 = vcombine.high %v3170_v59, %v3170_v59  ;;  %v13815_v63 = vld [vmem:[%s14613_s21 + $0x7e4] ss:$784 sps:$4 sm:$0xff]  }
 0x396   : > { %11537 = vmatprep.subr.bf16.mxu1 %v13762_v1 }
 0x39a   : > { %7281 = vmatmul.mubr.f32.vlgmr.msra.gmra.mrb[50].mxu0 %v3119_v38  ;;  %v13793_v38 = vld [vmem:[%s14613_s21 + $0x7dc] ss:$784 sps:$4 sm:$0xff]  }
 0x39b   : > { %11523 = vmatpush1.bf16.xpose.msra.mxu0 %v13760_v4  ;;  %7420 = vmatprep.mubr.f32.mxu0 %v3144_v5  ;;  %v13821_v4 = vld [vmem:[%s14613_s21 + $0xe04] ss:$784 sps:$4 sm:$0xff]   ;;  %v13820_v5 = vld [vmem:[%s14613_s21 + $0x7e8] ss:$784 sps:$4 sm:$0xff]  }
 0x39c   : > { %7351 = vmatmul.mubr.f32.vlgmr.msra.gmra.mrb[50].mxu1 %v3126_v39  ;;  %11525 = vmatprep.subr.bf16.mxu0 %v13765_v6  ;;  %v13792_v39 = vld [vmem:[%s14613_s21 + $0x7d0] ss:$784 sps:$4 sm:$0xff]   ;;  %v13824_v6 = vld [vmem:[%s14613_s21 + $0xe0c] ss:$784 sps:$4 sm:$0xff]  }
 0x39d   : > { %11539 = vmatpush1.bf16.xpose.msra.mxu1 %v13764_v7  ;;  %7490 = vmatprep.mubr.f32.mxu1 %v3145_v8  ;;  %v13823_v7 = vld [vmem:[%s14613_s21 + $0xe00] ss:$784 sps:$4 sm:$0xff]   ;;  %v13827_v8 = vld [vmem:[%s14613_s21 + $0x1424] ss:$784 sps:$4 sm:$0xff]  }
 0x39e   : > { %11541 = vmatprep.subr.bf16.mxu1 %v13768_v9  ;;  %v13826_v9 = vld [vmem:[%s14613_s21 + $0xe08] ss:$784 sps:$4 sm:$0xff]  }
 0x3a3   : > { %11527 = vmatpush1.bf16.xpose.msra.mxu0 %v13767_v10  ;;  %v13830_v10 = vld [vmem:[%s14613_s21 + $0x142c] ss:$784 sps:$4 sm:$0xff]  }
 0x3a4   : > { %11529 = vmatprep.subr.bf16.mxu0 %v13771_v11 }
 0x3a5   : > { %11543 = vmatpush1.bf16.xpose.msra.mxu1 %v13770_v12 }
 0x3a6   : > { %11545 = vmatprep.subr.bf16.mxu1 %v13774_v14 }
 0x3ab   : > { %11531 = vmatpush1.bf16.xpose.msra.mxu0 %v13773_v15  ;;  %v2618_v15 = vld [vmem:[%s14607_s7 + $0xe8] sm:$0xff] }
 0x3ac   : > { %11533 = vmatprep.subr.bf16.mxu0 %v13777_v16  ;;  %v3180_v22 = vcombine.high %v2618_v15, %v2618_v15 }
 0x3ad   : > { %11547 = vmatpush1.bf16.xpose.msra.mxu1 %v13776_v17  ;;  %v6442_v19 = vpop.f32.mrb[38].mxu0  ;;  %v13829_v17 = vld [vmem:[%s14613_s21 + $0x1420] ss:$784 sps:$4 sm:$0xff]  }
 0x3ae   : > { %v6443_v20 = vadd.f32 %v6442_v19, %v6373_v60  ;;  %v6444_v21 = vpop.f32.mrb[39].mxu0  ;;  %11549 = vmatprep.subr.bf16.mxu1 %v13780_v18  ;;  %v3177_v60 = vrot.slane %v3163_v57, %v14630_v13  ;;  %v13864_v57 = vld [vmem:[%s14613_s21 + $0x1e8] ss:$784 sps:$4 sm:$0xff]  }
 0x3af   : > { %v6512_v23 = vpop.f32.mrb[38].mxu1  ;;  %v13832_v21 = vld [vmem:[%s14613_s21 + $0x1428] ss:$784 sps:$4 sm:$0xff]  }
 0x3b0   : > { %v6513_v25 = vadd.f32 %v6512_v23, %v6443_v20  ;;  %v6514_v26 = vpop.f32.mrb[39].mxu1  ;;  %v3179_v1 = vcombine.high %v3177_v60, %v3177_v60  ;;  %v13833_v20 = vld [vmem:[%s14613_s21 + $0x1d4] ss:$784 sps:$4 sm:$0xff]   ;;  %v13837_v23 = vld [vmem:[%s14613_s21 + $0x1dc] ss:$784 sps:$4 sm:$0xff]  }
 0x3b1   : > { %v13835_v26 = vld [vmem:[%s14613_s21 + $0x1d0] ss:$784 sps:$4 sm:$0xff]  }
 0x3b3   : > { %11535 = vmatpush1.bf16.xpose.msra.mxu0 %v13779_v24  ;;  %v3187_v24 = vrot.slane %v2618_v15, %v14630_v13 }
 0x3b4   : > { %11553 = vmatprep.subr.bf16.mxu0 %v13783_v27 }
 0x3b5   : > { %11551 = vmatpush1.bf16.xpose.msra.mxu1 %v13782_v28  ;;  %v3195_v27 = vcombine.high %v3187_v24, %v3187_v24  ;;  %v13840_v28 = vld [vmem:[%s14613_s21 + $0x7f4] ss:$784 sps:$4 sm:$0xff]  }
 0x3b6   : > { %11569 = vmatprep.subr.bf16.mxu1 %v13787_v30 }
 0x3ba   : > { %7421 = vmatmul.mubr.f32.vlgmr.msra.gmra.mrb[52].mxu0 %v3136_v2  ;;  %v13818_v2 = vld [vmem:[%s14613_s21 + $0x7ec] ss:$784 sps:$4 sm:$0xff]  }
 0x3bb   : > { %11555 = vmatpush1.bf16.xpose.msra.mxu0 %v13785_v33  ;;  %7560 = vmatprep.mubr.f32.mxu0 %v3161_v34  ;;  %v13846_v33 = vld [vmem:[%s14613_s21 + $0xe14] ss:$784 sps:$4 sm:$0xff]   ;;  %v13845_v34 = vld [vmem:[%s14613_s21 + $0x7f8] ss:$784 sps:$4 sm:$0xff]  }
 0x3bc   : > { %7491 = vmatmul.mubr.f32.vlgmr.msra.gmra.mrb[52].mxu1 %v3143_v3  ;;  %11557 = vmatprep.subr.bf16.mxu0 %v13790_v35  ;;  %v13817_v3 = vld [vmem:[%s14613_s21 + $0x7e0] ss:$784 sps:$4 sm:$0xff]   ;;  %v13849_v35 = vld [vmem:[%s14613_s21 + $0xe1c] ss:$784 sps:$4 sm:$0xff]  }
 0x3bd   : > { %11571 = vmatpush1.bf16.xpose.msra.mxu1 %v13789_v36  ;;  %7630 = vmatprep.mubr.f32.mxu1 %v3162_v37  ;;  %v13848_v36 = vld [vmem:[%s14613_s21 + $0xe10] ss:$784 sps:$4 sm:$0xff]   ;;  %v13852_v37 = vld [vmem:[%s14613_s21 + $0x1434] ss:$784 sps:$4 sm:$0xff]  }
 0x3be   : > { %11573 = vmatprep.subr.bf16.mxu1 %v13793_v38  ;;  %v13851_v38 = vld [vmem:[%s14613_s21 + $0xe18] ss:$784 sps:$4 sm:$0xff]  }
 0x3c3   : > { %11559 = vmatpush1.bf16.xpose.msra.mxu0 %v13792_v39  ;;  %v13855_v39 = vld [vmem:[%s14613_s21 + $0x143c] ss:$784 sps:$4 sm:$0xff]  }
 0x3c4   : > { %11561 = vmatprep.subr.bf16.mxu0 %v13796_v40 }
 0x3c5   : > { %11575 = vmatpush1.bf16.xpose.msra.mxu1 %v13795_v41 }
 0x3c6   : > { %11577 = vmatprep.subr.bf16.mxu1 %v13799_v42 }
 0x3cb   : > { %11563 = vmatpush1.bf16.xpose.msra.mxu0 %v13798_v43  ;;  %v2619_v43 = vld [vmem:[%s14607_s7 + $0xf0] sm:$0xff] }
 0x3cc   : > { %11565 = vmatprep.subr.bf16.mxu0 %v13802_v44  ;;  %v3197_v50 = vcombine.high %v2619_v43, %v2619_v43 }
 0x3cd   : > { %11579 = vmatpush1.bf16.xpose.msra.mxu1 %v13801_v45  ;;  %v6582_v47 = vpop.f32.mrb[40].mxu0  ;;  %v13854_v45 = vld [vmem:[%s14613_s21 + $0x1430] ss:$784 sps:$4 sm:$0xff]  }
 0x3ce   : > { %v6583_v48 = vadd.f32 %v6582_v47, %v6513_v25  ;;  %v6584_v49 = vpop.f32.mrb[41].mxu0  ;;  %11581 = vmatprep.subr.bf16.mxu1 %v13805_v46  ;;  %v3194_v25 = vrot.slane %v3180_v22, %v14630_v13  ;;  %v13889_v22 = vld [vmem:[%s14613_s21 + $0x1f8] ss:$784 sps:$4 sm:$0xff]  }
 0x3cf   : > { %v6652_v51 = vpop.f32.mrb[40].mxu1  ;;  %v13857_v49 = vld [vmem:[%s14613_s21 + $0x1438] ss:$784 sps:$4 sm:$0xff]  }
 0x3d0   : > { %v6653_v53 = vadd.f32 %v6652_v51, %v6583_v48  ;;  %v6654_v54 = vpop.f32.mrb[41].mxu1  ;;  %v3196_v30 = vcombine.high %v3194_v25, %v3194_v25  ;;  %v13858_v48 = vld [vmem:[%s14613_s21 + $0x1e4] ss:$784 sps:$4 sm:$0xff]   ;;  %v13862_v51 = vld [vmem:[%s14613_s21 + $0x1ec] ss:$784 sps:$4 sm:$0xff]  }
 0x3d1   : > { %v13860_v54 = vld [vmem:[%s14613_s21 + $0x1e0] ss:$784 sps:$4 sm:$0xff]  }
 0x3d3   : > { %11567 = vmatpush1.bf16.xpose.msra.mxu0 %v13804_v52  ;;  %v3204_v52 = vrot.slane %v2619_v43, %v14630_v13 }
 0x3d4   : > { %11585 = vmatprep.subr.bf16.mxu0 %v13808_v55 }
 0x3d5   : > { %11583 = vmatpush1.bf16.xpose.msra.mxu1 %v13807_v56  ;;  %v3212_v55 = vcombine.high %v3204_v52, %v3204_v52  ;;  %v13865_v56 = vld [vmem:[%s14613_s21 + $0x804] ss:$784 sps:$4 sm:$0xff]  }
 0x3d6   : > { %11601 = vmatprep.subr.bf16.mxu1 %v13812_v58 }
 0x3da   : > { %7561 = vmatmul.mubr.f32.vlgmr.msra.gmra.mrb[54].mxu0 %v3153_v31  ;;  %v13843_v31 = vld [vmem:[%s14613_s21 + $0x7fc] ss:$784 sps:$4 sm:$0xff]  }
 0x3db   : > { %11587 = vmatpush1.bf16.xpose.msra.mxu0 %v13810_v61  ;;  %7700 = vmatprep.mubr.f32.mxu0 %v3178_v62  ;;  %v13871_v61 = vld [vmem:[%s14613_s21 + $0xe24] ss:$784 sps:$4 sm:$0xff]   ;;  %v13870_v62 = vld [vmem:[%s14613_s21 + $0x808] ss:$784 sps:$4 sm:$0xff]  }
 0x3dc   : > { %7631 = vmatmul.mubr.f32.vlgmr.msra.gmra.mrb[54].mxu1 %v3160_v32  ;;  %11589 = vmatprep.subr.bf16.mxu0 %v13815_v63  ;;  %v13842_v32 = vld [vmem:[%s14613_s21 + $0x7f0] ss:$784 sps:$4 sm:$0xff]   ;;  %v13874_v63 = vld [vmem:[%s14613_s21 + $0xe2c] ss:$784 sps:$4 sm:$0xff]  }
 0x3dd   : > { %11603 = vmatpush1.bf16.xpose.msra.mxu1 %v13814_v0  ;;  %7770 = vmatprep.mubr.f32.mxu1 %v3179_v1  ;;  %v13873_v0 = vld [vmem:[%s14613_s21 + $0xe20] ss:$784 sps:$4 sm:$0xff]   ;;  %v13877_v1 = vld [vmem:[%s14613_s21 + $0x1444] ss:$784 sps:$4 sm:$0xff]  }
 0x3de   : > { %11605 = vmatprep.subr.bf16.mxu1 %v13818_v2  ;;  %v13876_v2 = vld [vmem:[%s14613_s21 + $0xe28] ss:$784 sps:$4 sm:$0xff]  }
 0x3e3   : > { %11591 = vmatpush1.bf16.xpose.msra.mxu0 %v13817_v3  ;;  %v13880_v3 = vld [vmem:[%s14613_s21 + $0x144c] ss:$784 sps:$4 sm:$0xff]  }
 0x3e4   : > { %11593 = vmatprep.subr.bf16.mxu0 %v13821_v4 }
 0x3e5   : > { %11607 = vmatpush1.bf16.xpose.msra.mxu1 %v13820_v5 }
 0x3e6   : > { %11609 = vmatprep.subr.bf16.mxu1 %v13824_v6 }
 0x3eb   : > { %11595 = vmatpush1.bf16.xpose.msra.mxu0 %v13823_v7  ;;  %v2620_v7 = vld [vmem:[%s14607_s7 + $0xf8] sm:$0xff] }
 0x3ec   : > { %11597 = vmatprep.subr.bf16.mxu0 %v13827_v8  ;;  %v3214_v15 = vcombine.high %v2620_v7, %v2620_v7 }
 0x3ed   : > { %11611 = vmatpush1.bf16.xpose.msra.mxu1 %v13826_v9  ;;  %v6722_v11 = vpop.f32.mrb[42].mxu0  ;;  %v13879_v9 = vld [vmem:[%s14613_s21 + $0x1440] ss:$784 sps:$4 sm:$0xff]  }
 0x3ee   : > { %v6723_v12 = vadd.f32 %v6722_v11, %v6653_v53  ;;  %v6724_v14 = vpop.f32.mrb[43].mxu0  ;;  %11613 = vmatprep.subr.bf16.mxu1 %v13830_v10  ;;  %v3211_v53 = vrot.slane %v3197_v50, %v14630_v13  ;;  %v13914_v50 = vld [vmem:[%s14613_s21 + $0x208] ss:$784 sps:$4 sm:$0xff]  }
 0x3ef   : > { %v6792_v16 = vpop.f32.mrb[42].mxu1  ;;  %v13882_v14 = vld [vmem:[%s14613_s21 + $0x1448] ss:$784 sps:$4 sm:$0xff]  }
 0x3f0   : > { %v6793_v18 = vadd.f32 %v6792_v16, %v6723_v12  ;;  %v6794_v19 = vpop.f32.mrb[43].mxu1  ;;  %v3213_v58 = vcombine.high %v3211_v53, %v3211_v53  ;;  %v13883_v12 = vld [vmem:[%s14613_s21 + $0x1f4] ss:$784 sps:$4 sm:$0xff]   ;;  %v13887_v16 = vld [vmem:[%s14613_s21 + $0x1fc] ss:$784 sps:$4 sm:$0xff]  }
 0x3f1   : > { %v13885_v19 = vld [vmem:[%s14613_s21 + $0x1f0] ss:$784 sps:$4 sm:$0xff]  }
 0x3f3   : > { %11599 = vmatpush1.bf16.xpose.msra.mxu0 %v13829_v17  ;;  %v3221_v17 = vrot.slane %v2620_v7, %v14630_v13 }
 0x3f4   : > { %11617 = vmatprep.subr.bf16.mxu0 %v13833_v20 }
 0x3f5   : > { %11615 = vmatpush1.bf16.xpose.msra.mxu1 %v13832_v21  ;;  %v3229_v20 = vcombine.high %v3221_v17, %v3221_v17  ;;  %v13890_v21 = vld [vmem:[%s14613_s21 + $0x814] ss:$784 sps:$4 sm:$0xff]  }
 0x3f6   : > { %11633 = vmatprep.subr.bf16.mxu1 %v13837_v23 }
 0x3fa   : > { %7701 = vmatmul.mubr.f32.vlgmr.msra.gmra.mrb[56].mxu0 %v3170_v59  ;;  %v13868_v59 = vld [vmem:[%s14613_s21 + $0x80c] ss:$784 sps:$4 sm:$0xff]  }
 0x3fb   : > { %11619 = vmatpush1.bf16.xpose.msra.mxu0 %v13835_v26  ;;  %7840 = vmatprep.mubr.f32.mxu0 %v3195_v27  ;;  %v13896_v26 = vld [vmem:[%s14613_s21 + $0xe34] ss:$784 sps:$4 sm:$0xff]   ;;  %v13895_v27 = vld [vmem:[%s14613_s21 + $0x818] ss:$784 sps:$4 sm:$0xff]  }
 0x3fc   : > { %7771 = vmatmul.mubr.f32.vlgmr.msra.gmra.mrb[56].mxu1 %v3177_v60  ;;  %11621 = vmatprep.subr.bf16.mxu0 %v13840_v28  ;;  %v13867_v60 = vld [vmem:[%s14613_s21 + $0x800] ss:$784 sps:$4 sm:$0xff]   ;;  %v13899_v28 = vld [vmem:[%s14613_s21 + $0xe3c] ss:$784 sps:$4 sm:$0xff]  }
 0x3fd   : > { %11635 = vmatpush1.bf16.xpose.msra.mxu1 %v13839_v29  ;;  %7910 = vmatprep.mubr.f32.mxu1 %v3196_v30  ;;  %v13898_v29 = vld [vmem:[%s14613_s21 + $0xe30] ss:$784 sps:$4 sm:$0xff]   ;;  %v13902_v30 = vld [vmem:[%s14613_s21 + $0x1454] ss:$784 sps:$4 sm:$0xff]  }
 0x3fe   : > { %11637 = vmatprep.subr.bf16.mxu1 %v13843_v31  ;;  %v13901_v31 = vld [vmem:[%s14613_s21 + $0xe38] ss:$784 sps:$4 sm:$0xff]  }
 0x403   : > { %11623 = vmatpush1.bf16.xpose.msra.mxu0 %v13842_v32  ;;  %v13905_v32 = vld [vmem:[%s14613_s21 + $0x145c] ss:$784 sps:$4 sm:$0xff]  }
 0x404   : > { %11625 = vmatprep.subr.bf16.mxu0 %v13846_v33 }
 0x405   : > { %11639 = vmatpush1.bf16.xpose.msra.mxu1 %v13845_v34 }
 0x406   : > { %11641 = vmatprep.subr.bf16.mxu1 %v13849_v35 }
 0x40b   : > { %11627 = vmatpush1.bf16.xpose.msra.mxu0 %v13848_v36  ;;  %v2621_v36 = vld [vmem:[%s14607_s7 + $0x100] sm:$0xff] }
 0x40c   : > { %11629 = vmatprep.subr.bf16.mxu0 %v13852_v37  ;;  %v3231_v43 = vcombine.high %v2621_v36, %v2621_v36 }
 0x40d   : > { %11643 = vmatpush1.bf16.xpose.msra.mxu1 %v13851_v38  ;;  %v6862_v40 = vpop.f32.mrb[44].mxu0  ;;  %v13904_v38 = vld [vmem:[%s14613_s21 + $0x1450] ss:$784 sps:$4 sm:$0xff]  }
 0x40e   : > { %v6863_v41 = vadd.f32 %v6862_v40, %v6793_v18  ;;  %v6864_v42 = vpop.f32.mrb[45].mxu0  ;;  %11645 = vmatprep.subr.bf16.mxu1 %v13855_v39  ;;  %v3228_v18 = vrot.slane %v3214_v15, %v14630_v13  ;;  %v13939_v15 = vld [vmem:[%s14613_s21 + $0x218] ss:$784 sps:$4 sm:$0xff]  }
 0x40f   : > { %v6932_v44 = vpop.f32.mrb[44].mxu1  ;;  %v13907_v42 = vld [vmem:[%s14613_s21 + $0x1458] ss:$784 sps:$4 sm:$0xff]  }
 0x410   : > { %v6933_v46 = vadd.f32 %v6932_v44, %v6863_v41  ;;  %v6934_v47 = vpop.f32.mrb[45].mxu1  ;;  %v3230_v23 = vcombine.high %v3228_v18, %v3228_v18  ;;  %v13908_v41 = vld [vmem:[%s14613_s21 + $0x204] ss:$784 sps:$4 sm:$0xff]   ;;  %v13912_v44 = vld [vmem:[%s14613_s21 + $0x20c] ss:$784 sps:$4 sm:$0xff]  }
 0x411   : > { %v13910_v47 = vld [vmem:[%s14613_s21 + $0x200] ss:$784 sps:$4 sm:$0xff]  }
 0x413   : > { %11631 = vmatpush1.bf16.xpose.msra.mxu0 %v13854_v45  ;;  %v3238_v45 = vrot.slane %v2621_v36, %v14630_v13 }
 0x414   : > { %11649 = vmatprep.subr.bf16.mxu0 %v13858_v48 }
 0x415   : > { %11647 = vmatpush1.bf16.xpose.msra.mxu1 %v13857_v49  ;;  %v3246_v48 = vcombine.high %v3238_v45, %v3238_v45  ;;  %v13915_v49 = vld [vmem:[%s14613_s21 + $0x824] ss:$784 sps:$4 sm:$0xff]  }
 0x416   : > { %11665 = vmatprep.subr.bf16.mxu1 %v13862_v51 }
 0x41a   : > { %7841 = vmatmul.mubr.f32.vlgmr.msra.gmra.mrb[58].mxu0 %v3187_v24  ;;  %v13893_v24 = vld [vmem:[%s14613_s21 + $0x81c] ss:$784 sps:$4 sm:$0xff]  }
 0x41b   : > { %11651 = vmatpush1.bf16.xpose.msra.mxu0 %v13860_v54  ;;  %7980 = vmatprep.mubr.f32.mxu0 %v3212_v55  ;;  %v13921_v54 = vld [vmem:[%s14613_s21 + $0xe44] ss:$784 sps:$4 sm:$0xff]   ;;  %v13920_v55 = vld [vmem:[%s14613_s21 + $0x828] ss:$784 sps:$4 sm:$0xff]  }
 0x41c   : > { %7911 = vmatmul.mubr.f32.vlgmr.msra.gmra.mrb[58].mxu1 %v3194_v25  ;;  %11653 = vmatprep.subr.bf16.mxu0 %v13865_v56  ;;  %v13892_v25 = vld [vmem:[%s14613_s21 + $0x810] ss:$784 sps:$4 sm:$0xff]   ;;  %v13924_v56 = vld [vmem:[%s14613_s21 + $0xe4c] ss:$784 sps:$4 sm:$0xff]  }
 0x41d   : > { %11667 = vmatpush1.bf16.xpose.msra.mxu1 %v13864_v57  ;;  %8050 = vmatprep.mubr.f32.mxu1 %v3213_v58  ;;  %v13923_v57 = vld [vmem:[%s14613_s21 + $0xe40] ss:$784 sps:$4 sm:$0xff]   ;;  %v13927_v58 = vld [vmem:[%s14613_s21 + $0x1464] ss:$784 sps:$4 sm:$0xff]  }
 0x41e   : > { %11669 = vmatprep.subr.bf16.mxu1 %v13868_v59  ;;  %v13926_v59 = vld [vmem:[%s14613_s21 + $0xe48] ss:$784 sps:$4 sm:$0xff]  }
 0x423   : > { %11655 = vmatpush1.bf16.xpose.msra.mxu0 %v13867_v60  ;;  %v13930_v60 = vld [vmem:[%s14613_s21 + $0x146c] ss:$784 sps:$4 sm:$0xff]  }
 0x424   : > { %11657 = vmatprep.subr.bf16.mxu0 %v13871_v61 }
 0x425   : > { %11671 = vmatpush1.bf16.xpose.msra.mxu1 %v13870_v62 }
 0x426   : > { %11673 = vmatprep.subr.bf16.mxu1 %v13874_v63 }
 0x42b   : > { %11659 = vmatpush1.bf16.xpose.msra.mxu0 %v13873_v0  ;;  %v2622_v0 = vld [vmem:[%s14607_s7 + $0x108] sm:$0xff] }
 0x42c   : > { %11661 = vmatprep.subr.bf16.mxu0 %v13877_v1  ;;  %v3248_v7 = vcombine.high %v2622_v0, %v2622_v0 }
 0x42d   : > { %11675 = vmatpush1.bf16.xpose.msra.mxu1 %v13876_v2  ;;  %v7002_v4 = vpop.f32.mrb[46].mxu0  ;;  %v13929_v2 = vld [vmem:[%s14613_s21 + $0x1460] ss:$784 sps:$4 sm:$0xff]  }
 0x42e   : > { %v7003_v5 = vadd.f32 %v7002_v4, %v6933_v46  ;;  %v7004_v6 = vpop.f32.mrb[47].mxu0  ;;  %11677 = vmatprep.subr.bf16.mxu1 %v13880_v3  ;;  %v3245_v46 = vrot.slane %v3231_v43, %v14630_v13  ;;  %v13964_v43 = vld [vmem:[%s14613_s21 + $0x228] ss:$784 sps:$4 sm:$0xff]  }
 0x42f   : > { %v7072_v8 = vpop.f32.mrb[46].mxu1  ;;  %v13932_v6 = vld [vmem:[%s14613_s21 + $0x1468] ss:$784 sps:$4 sm:$0xff]  }
 0x430   : > { %v7073_v10 = vadd.f32 %v7072_v8, %v7003_v5  ;;  %v7074_v11 = vpop.f32.mrb[47].mxu1  ;;  %v3247_v51 = vcombine.high %v3245_v46, %v3245_v46  ;;  %v13933_v5 = vld [vmem:[%s14613_s21 + $0x214] ss:$784 sps:$4 sm:$0xff]   ;;  %v13937_v8 = vld [vmem:[%s14613_s21 + $0x21c] ss:$784 sps:$4 sm:$0xff]  }
 0x431   : > { %v13935_v11 = vld [vmem:[%s14613_s21 + $0x210] ss:$784 sps:$4 sm:$0xff]  }
 0x433   : > { %11663 = vmatpush1.bf16.xpose.msra.mxu0 %v13879_v9  ;;  %v3255_v9 = vrot.slane %v2622_v0, %v14630_v13 }
 0x434   : > { %11681 = vmatprep.subr.bf16.mxu0 %v13883_v12 }
 0x435   : > { %11679 = vmatpush1.bf16.xpose.msra.mxu1 %v13882_v14  ;;  %v3263_v12 = vcombine.high %v3255_v9, %v3255_v9  ;;  %v13940_v14 = vld [vmem:[%s14613_s21 + $0x834] ss:$784 sps:$4 sm:$0xff]  }
 0x436   : > { %11697 = vmatprep.subr.bf16.mxu1 %v13887_v16 }
 0x43a   : > { %7981 = vmatmul.mubr.f32.vlgmr.msra.gmra.mrb[60].mxu0 %v3204_v52  ;;  %v13918_v52 = vld [vmem:[%s14613_s21 + $0x82c] ss:$784 sps:$4 sm:$0xff]  }
 0x43b   : > { %11683 = vmatpush1.bf16.xpose.msra.mxu0 %v13885_v19  ;;  %8120 = vmatprep.mubr.f32.mxu0 %v3229_v20  ;;  %v13946_v19 = vld [vmem:[%s14613_s21 + $0xe54] ss:$784 sps:$4 sm:$0xff]   ;;  %v13945_v20 = vld [vmem:[%s14613_s21 + $0x838] ss:$784 sps:$4 sm:$0xff]  }
 0x43c   : > { %8051 = vmatmul.mubr.f32.vlgmr.msra.gmra.mrb[60].mxu1 %v3211_v53  ;;  %11685 = vmatprep.subr.bf16.mxu0 %v13890_v21  ;;  %v13917_v53 = vld [vmem:[%s14613_s21 + $0x820] ss:$784 sps:$4 sm:$0xff]   ;;  %v13949_v21 = vld [vmem:[%s14613_s21 + $0xe5c] ss:$784 sps:$4 sm:$0xff]  }
 0x43d   : > { %11699 = vmatpush1.bf16.xpose.msra.mxu1 %v13889_v22  ;;  %8190 = vmatprep.mubr.f32.mxu1 %v3230_v23  ;;  %v13948_v22 = vld [vmem:[%s14613_s21 + $0xe50] ss:$784 sps:$4 sm:$0xff]   ;;  %v13952_v23 = vld [vmem:[%s14613_s21 + $0x1474] ss:$784 sps:$4 sm:$0xff]  }
 0x43e   : > { %11701 = vmatprep.subr.bf16.mxu1 %v13893_v24  ;;  %v13951_v24 = vld [vmem:[%s14613_s21 + $0xe58] ss:$784 sps:$4 sm:$0xff]  }
 0x443   : > { %11687 = vmatpush1.bf16.xpose.msra.mxu0 %v13892_v25  ;;  %v13955_v25 = vld [vmem:[%s14613_s21 + $0x147c] ss:$784 sps:$4 sm:$0xff]  }
 0x444   : > { %11689 = vmatprep.subr.bf16.mxu0 %v13896_v26 }
 0x445   : > { %11703 = vmatpush1.bf16.xpose.msra.mxu1 %v13895_v27 }
 0x446   : > { %11705 = vmatprep.subr.bf16.mxu1 %v13899_v28 }
 0x44b   : > { %11691 = vmatpush1.bf16.xpose.msra.mxu0 %v13898_v29  ;;  %v2623_v29 = vld [vmem:[%s14607_s7 + $0x110] sm:$0xff] }
 0x44c   : > { %11693 = vmatprep.subr.bf16.mxu0 %v13902_v30  ;;  %v3265_v36 = vcombine.high %v2623_v29, %v2623_v29 }
 0x44d   : > { %11707 = vmatpush1.bf16.xpose.msra.mxu1 %v13901_v31  ;;  %v7142_v33 = vpop.f32.mrb[48].mxu0  ;;  %v13954_v31 = vld [vmem:[%s14613_s21 + $0x1470] ss:$784 sps:$4 sm:$0xff]  }
 0x44e   : > { %v7143_v34 = vadd.f32 %v7142_v33, %v7073_v10  ;;  %v7144_v35 = vpop.f32.mrb[49].mxu0  ;;  %11709 = vmatprep.subr.bf16.mxu1 %v13905_v32  ;;  %v3262_v10 = vrot.slane %v3248_v7, %v14630_v13  ;;  %v13989_v7 = vld [vmem:[%s14613_s21 + $0x238] ss:$784 sps:$4 sm:$0xff]  }
 0x44f   : > { %v7212_v37 = vpop.f32.mrb[48].mxu1  ;;  %v13957_v35 = vld [vmem:[%s14613_s21 + $0x1478] ss:$784 sps:$4 sm:$0xff]  }
 0x450   : > { %v7213_v39 = vadd.f32 %v7212_v37, %v7143_v34  ;;  %v7214_v40 = vpop.f32.mrb[49].mxu1  ;;  %v3264_v16 = vcombine.high %v3262_v10, %v3262_v10  ;;  %v13958_v34 = vld [vmem:[%s14613_s21 + $0x224] ss:$784 sps:$4 sm:$0xff]   ;;  %v13962_v37 = vld [vmem:[%s14613_s21 + $0x22c] ss:$784 sps:$4 sm:$0xff]  }
 0x451   : > { %v13960_v40 = vld [vmem:[%s14613_s21 + $0x220] ss:$784 sps:$4 sm:$0xff]  }
 0x453   : > { %11695 = vmatpush1.bf16.xpose.msra.mxu0 %v13904_v38  ;;  %v3272_v38 = vrot.slane %v2623_v29, %v14630_v13 }
 0x454   : > { %11713 = vmatprep.subr.bf16.mxu0 %v13908_v41 }
 0x455   : > { %11711 = vmatpush1.bf16.xpose.msra.mxu1 %v13907_v42  ;;  %v3280_v41 = vcombine.high %v3272_v38, %v3272_v38  ;;  %v13965_v42 = vld [vmem:[%s14613_s21 + $0x844] ss:$784 sps:$4 sm:$0xff]  }
 0x456   : > { %11729 = vmatprep.subr.bf16.mxu1 %v13912_v44 }
 0x45a   : > { %8121 = vmatmul.mubr.f32.vlgmr.msra.gmra.mrb[62].mxu0 %v3221_v17  ;;  %v13943_v17 = vld [vmem:[%s14613_s21 + $0x83c] ss:$784 sps:$4 sm:$0xff]  }
 0x45b   : > { %11715 = vmatpush1.bf16.xpose.msra.mxu0 %v13910_v47  ;;  %8260 = vmatprep.mubr.f32.mxu0 %v3246_v48  ;;  %v13971_v47 = vld [vmem:[%s14613_s21 + $0xe64] ss:$784 sps:$4 sm:$0xff]   ;;  %v13970_v48 = vld [vmem:[%s14613_s21 + $0x848] ss:$784 sps:$4 sm:$0xff]  }
 0x45c   : > { %8191 = vmatmul.mubr.f32.vlgmr.msra.gmra.mrb[62].mxu1 %v3228_v18  ;;  %11717 = vmatprep.subr.bf16.mxu0 %v13915_v49  ;;  %v13942_v18 = vld [vmem:[%s14613_s21 + $0x830] ss:$784 sps:$4 sm:$0xff]   ;;  %v13974_v49 = vld [vmem:[%s14613_s21 + $0xe6c] ss:$784 sps:$4 sm:$0xff]  }
 0x45d   : > { %11731 = vmatpush1.bf16.xpose.msra.mxu1 %v13914_v50  ;;  %8330 = vmatprep.mubr.f32.mxu1 %v3247_v51  ;;  %v13973_v50 = vld [vmem:[%s14613_s21 + $0xe60] ss:$784 sps:$4 sm:$0xff]   ;;  %v13977_v51 = vld [vmem:[%s14613_s21 + $0x1484] ss:$784 sps:$4 sm:$0xff]  }
 0x45e   : > { %11733 = vmatprep.subr.bf16.mxu1 %v13918_v52  ;;  %v13976_v52 = vld [vmem:[%s14613_s21 + $0xe68] ss:$784 sps:$4 sm:$0xff]  }
 0x463   : > { %11719 = vmatpush1.bf16.xpose.msra.mxu0 %v13917_v53  ;;  %v13980_v53 = vld [vmem:[%s14613_s21 + $0x148c] ss:$784 sps:$4 sm:$0xff]  }
 0x464   : > { %11721 = vmatprep.subr.bf16.mxu0 %v13921_v54 }
 0x465   : > { %11735 = vmatpush1.bf16.xpose.msra.mxu1 %v13920_v55 }
 0x466   : > { %11737 = vmatprep.subr.bf16.mxu1 %v13924_v56 }
 0x46b   : > { %11723 = vmatpush1.bf16.xpose.msra.mxu0 %v13923_v57  ;;  %v2624_v57 = vld [vmem:[%s14607_s7 + $0x118] sm:$0xff] }
 0x46c   : > { %11725 = vmatprep.subr.bf16.mxu0 %v13927_v58  ;;  %v3282_v0 = vcombine.high %v2624_v57, %v2624_v57 }
 0x46d   : > { %11739 = vmatpush1.bf16.xpose.msra.mxu1 %v13926_v59  ;;  %v7282_v61 = vpop.f32.mrb[50].mxu0  ;;  %v13979_v59 = vld [vmem:[%s14613_s21 + $0x1480] ss:$784 sps:$4 sm:$0xff]  }
 0x46e   : > { %v7283_v62 = vadd.f32 %v7282_v61, %v7213_v39  ;;  %v7284_v63 = vpop.f32.mrb[51].mxu0  ;;  %11741 = vmatprep.subr.bf16.mxu1 %v13930_v60  ;;  %v3279_v39 = vrot.slane %v3265_v36, %v14630_v13  ;;  %v14014_v36 = vld [vmem:[%s14613_s21 + $0x248] ss:$784 sps:$4 sm:$0xff]  }
 0x46f   : > { %v7352_v1 = vpop.f32.mrb[50].mxu1  ;;  %v13982_v63 = vld [vmem:[%s14613_s21 + $0x1488] ss:$784 sps:$4 sm:$0xff]  }
 0x470   : > { %v7353_v3 = vadd.f32 %v7352_v1, %v7283_v62  ;;  %v7354_v4 = vpop.f32.mrb[51].mxu1  ;;  %v3281_v44 = vcombine.high %v3279_v39, %v3279_v39  ;;  %v13983_v62 = vld [vmem:[%s14613_s21 + $0x234] ss:$784 sps:$4 sm:$0xff]   ;;  %v13987_v1 = vld [vmem:[%s14613_s21 + $0x23c] ss:$784 sps:$4 sm:$0xff]  }
 0x471   : > { %v13985_v4 = vld [vmem:[%s14613_s21 + $0x230] ss:$784 sps:$4 sm:$0xff]  }
 0x473   : > { %11727 = vmatpush1.bf16.xpose.msra.mxu0 %v13929_v2  ;;  %v3289_v2 = vrot.slane %v2624_v57, %v14630_v13 }
 0x474   : > { %11745 = vmatprep.subr.bf16.mxu0 %v13933_v5 }
 0x475   : > { %11743 = vmatpush1.bf16.xpose.msra.mxu1 %v13932_v6  ;;  %v3297_v5 = vcombine.high %v3289_v2, %v3289_v2  ;;  %v13990_v6 = vld [vmem:[%s14613_s21 + $0x854] ss:$784 sps:$4 sm:$0xff]  }
 0x476   : > { %11761 = vmatprep.subr.bf16.mxu1 %v13937_v8 }
 0x47a   : > { %8261 = vmatmul.mubr.f32.vlgmr.msra.gmra.mrb[64].mxu0 %v3238_v45  ;;  %v13968_v45 = vld [vmem:[%s14613_s21 + $0x84c] ss:$784 sps:$4 sm:$0xff]  }
 0x47b   : > { %11747 = vmatpush1.bf16.xpose.msra.mxu0 %v13935_v11  ;;  %8400 = vmatprep.mubr.f32.mxu0 %v3263_v12  ;;  %v13996_v11 = vld [vmem:[%s14613_s21 + $0xe74] ss:$784 sps:$4 sm:$0xff]   ;;  %v13995_v12 = vld [vmem:[%s14613_s21 + $0x858] ss:$784 sps:$4 sm:$0xff]  }
 0x47c   : > { %8331 = vmatmul.mubr.f32.vlgmr.msra.gmra.mrb[64].mxu1 %v3245_v46  ;;  %11749 = vmatprep.subr.bf16.mxu0 %v13940_v14  ;;  %v13967_v46 = vld [vmem:[%s14613_s21 + $0x840] ss:$784 sps:$4 sm:$0xff]   ;;  %v13999_v14 = vld [vmem:[%s14613_s21 + $0xe7c] ss:$784 sps:$4 sm:$0xff]  }
 0x47d   : > { %11763 = vmatpush1.bf16.xpose.msra.mxu1 %v13939_v15  ;;  %8470 = vmatprep.mubr.f32.mxu1 %v3264_v16  ;;  %v13998_v15 = vld [vmem:[%s14613_s21 + $0xe70] ss:$784 sps:$4 sm:$0xff]   ;;  %v14002_v16 = vld [vmem:[%s14613_s21 + $0x1494] ss:$784 sps:$4 sm:$0xff]  }
 0x47e   : > { %11765 = vmatprep.subr.bf16.mxu1 %v13943_v17  ;;  %v14001_v17 = vld [vmem:[%s14613_s21 + $0xe78] ss:$784 sps:$4 sm:$0xff]  }
 0x483   : > { %11751 = vmatpush1.bf16.xpose.msra.mxu0 %v13942_v18  ;;  %v14005_v18 = vld [vmem:[%s14613_s21 + $0x149c] ss:$784 sps:$4 sm:$0xff]  }
 0x484   : > { %11753 = vmatprep.subr.bf16.mxu0 %v13946_v19 }
 0x485   : > { %11767 = vmatpush1.bf16.xpose.msra.mxu1 %v13945_v20 }
 0x486   : > { %11769 = vmatprep.subr.bf16.mxu1 %v13949_v21 }
 0x48b   : > { %11755 = vmatpush1.bf16.xpose.msra.mxu0 %v13948_v22  ;;  %v2625_v22 = vld [vmem:[%s14607_s7 + $0x120] sm:$0xff] }
 0x48c   : > { %11757 = vmatprep.subr.bf16.mxu0 %v13952_v23  ;;  %v3299_v29 = vcombine.high %v2625_v22, %v2625_v22 }
 0x48d   : > { %11771 = vmatpush1.bf16.xpose.msra.mxu1 %v13951_v24  ;;  %v7422_v26 = vpop.f32.mrb[52].mxu0  ;;  %v14004_v24 = vld [vmem:[%s14613_s21 + $0x1490] ss:$784 sps:$4 sm:$0xff]  }
 0x48e   : > { %v7423_v27 = vadd.f32 %v7422_v26, %v7353_v3  ;;  %v7424_v28 = vpop.f32.mrb[53].mxu0  ;;  %11773 = vmatprep.subr.bf16.mxu1 %v13955_v25  ;;  %v3296_v3 = vrot.slane %v3282_v0, %v14630_v13  ;;  %v14039_v0 = vld [vmem:[%s14613_s21 + $0x258] ss:$784 sps:$4 sm:$0xff]  }
 0x48f   : > { %v7492_v30 = vpop.f32.mrb[52].mxu1  ;;  %v14007_v28 = vld [vmem:[%s14613_s21 + $0x1498] ss:$784 sps:$4 sm:$0xff]  }
 0x490   : > { %v7493_v32 = vadd.f32 %v7492_v30, %v7423_v27  ;;  %v7494_v33 = vpop.f32.mrb[53].mxu1  ;;  %v3298_v8 = vcombine.high %v3296_v3, %v3296_v3  ;;  %v14008_v27 = vld [vmem:[%s14613_s21 + $0x244] ss:$784 sps:$4 sm:$0xff]   ;;  %v14012_v30 = vld [vmem:[%s14613_s21 + $0x24c] ss:$784 sps:$4 sm:$0xff]  }
 0x491   : > { %v14010_v33 = vld [vmem:[%s14613_s21 + $0x240] ss:$784 sps:$4 sm:$0xff]  }
 0x493   : > { %11759 = vmatpush1.bf16.xpose.msra.mxu0 %v13954_v31  ;;  %v3306_v31 = vrot.slane %v2625_v22, %v14630_v13 }
 0x494   : > { %11777 = vmatprep.subr.bf16.mxu0 %v13958_v34 }
 0x495   : > { %11775 = vmatpush1.bf16.xpose.msra.mxu1 %v13957_v35  ;;  %v3314_v34 = vcombine.high %v3306_v31, %v3306_v31  ;;  %v14015_v35 = vld [vmem:[%s14613_s21 + $0x864] ss:$784 sps:$4 sm:$0xff]  }
 0x496   : > { %11793 = vmatprep.subr.bf16.mxu1 %v13962_v37 }
 0x49a   : > { %8401 = vmatmul.mubr.f32.vlgmr.msra.gmra.mrb[66].mxu0 %v3255_v9  ;;  %v13993_v9 = vld [vmem:[%s14613_s21 + $0x85c] ss:$784 sps:$4 sm:$0xff]  }
 0x49b   : > { %11779 = vmatpush1.bf16.xpose.msra.mxu0 %v13960_v40  ;;  %8540 = vmatprep.mubr.f32.mxu0 %v3280_v41  ;;  %v14021_v40 = vld [vmem:[%s14613_s21 + $0xe84] ss:$784 sps:$4 sm:$0xff]   ;;  %v14020_v41 = vld [vmem:[%s14613_s21 + $0x868] ss:$784 sps:$4 sm:$0xff]  }
 0x49c   : > { %8471 = vmatmul.mubr.f32.vlgmr.msra.gmra.mrb[66].mxu1 %v3262_v10  ;;  %11781 = vmatprep.subr.bf16.mxu0 %v13965_v42  ;;  %v13992_v10 = vld [vmem:[%s14613_s21 + $0x850] ss:$784 sps:$4 sm:$0xff]   ;;  %v14024_v42 = vld [vmem:[%s14613_s21 + $0xe8c] ss:$784 sps:$4 sm:$0xff]  }
 0x49d   : > { %11795 = vmatpush1.bf16.xpose.msra.mxu1 %v13964_v43  ;;  %8610 = vmatprep.mubr.f32.mxu1 %v3281_v44  ;;  %v14023_v43 = vld [vmem:[%s14613_s21 + $0xe80] ss:$784 sps:$4 sm:$0xff]   ;;  %v14027_v44 = vld [vmem:[%s14613_s21 + $0x14a4] ss:$784 sps:$4 sm:$0xff]  }
 0x49e   : > { %11797 = vmatprep.subr.bf16.mxu1 %v13968_v45  ;;  %v14026_v45 = vld [vmem:[%s14613_s21 + $0xe88] ss:$784 sps:$4 sm:$0xff]  }
 0x4a3   : > { %11783 = vmatpush1.bf16.xpose.msra.mxu0 %v13967_v46  ;;  %v14030_v46 = vld [vmem:[%s14613_s21 + $0x14ac] ss:$784 sps:$4 sm:$0xff]  }
 0x4a4   : > { %11785 = vmatprep.subr.bf16.mxu0 %v13971_v47 }
 0x4a5   : > { %11799 = vmatpush1.bf16.xpose.msra.mxu1 %v13970_v48 }
 0x4a6   : > { %11801 = vmatprep.subr.bf16.mxu1 %v13974_v49 }
 0x4ab   : > { %11787 = vmatpush1.bf16.xpose.msra.mxu0 %v13973_v50  ;;  %v2626_v50 = vld [vmem:[%s14607_s7 + $0x128] sm:$0xff] }
 0x4ac   : > { %11789 = vmatprep.subr.bf16.mxu0 %v13977_v51  ;;  %v3316_v57 = vcombine.high %v2626_v50, %v2626_v50 }
 0x4ad   : > { %11803 = vmatpush1.bf16.xpose.msra.mxu1 %v13976_v52  ;;  %v7562_v54 = vpop.f32.mrb[54].mxu0  ;;  %v14029_v52 = vld [vmem:[%s14613_s21 + $0x14a0] ss:$784 sps:$4 sm:$0xff]  }
 0x4ae   : > { %v7563_v55 = vadd.f32 %v7562_v54, %v7493_v32  ;;  %v7564_v56 = vpop.f32.mrb[55].mxu0  ;;  %11805 = vmatprep.subr.bf16.mxu1 %v13980_v53  ;;  %v3313_v32 = vrot.slane %v3299_v29, %v14630_v13  ;;  %v14064_v29 = vld [vmem:[%s14613_s21 + $0x268] ss:$784 sps:$4 sm:$0xff]  }
 0x4af   : > { %v7632_v58 = vpop.f32.mrb[54].mxu1  ;;  %v14032_v56 = vld [vmem:[%s14613_s21 + $0x14a8] ss:$784 sps:$4 sm:$0xff]  }
 0x4b0   : > { %v7633_v60 = vadd.f32 %v7632_v58, %v7563_v55  ;;  %v7634_v61 = vpop.f32.mrb[55].mxu1  ;;  %v3315_v37 = vcombine.high %v3313_v32, %v3313_v32  ;;  %v14033_v55 = vld [vmem:[%s14613_s21 + $0x254] ss:$784 sps:$4 sm:$0xff]   ;;  %v14037_v58 = vld [vmem:[%s14613_s21 + $0x25c] ss:$784 sps:$4 sm:$0xff]  }
 0x4b1   : > { %v14035_v61 = vld [vmem:[%s14613_s21 + $0x250] ss:$784 sps:$4 sm:$0xff]  }
 0x4b3   : > { %11791 = vmatpush1.bf16.xpose.msra.mxu0 %v13979_v59  ;;  %v3323_v59 = vrot.slane %v2626_v50, %v14630_v13 }
 0x4b4   : > { %11809 = vmatprep.subr.bf16.mxu0 %v13983_v62 }
 0x4b5   : > { %11807 = vmatpush1.bf16.xpose.msra.mxu1 %v13982_v63  ;;  %v3331_v62 = vcombine.high %v3323_v59, %v3323_v59  ;;  %v14040_v63 = vld [vmem:[%s14613_s21 + $0x874] ss:$784 sps:$4 sm:$0xff]  }
 0x4b6   : > { %11825 = vmatprep.subr.bf16.mxu1 %v13987_v1 }
 0x4ba   : > { %8541 = vmatmul.mubr.f32.vlgmr.msra.gmra.mrb[68].mxu0 %v3272_v38  ;;  %v14018_v38 = vld [vmem:[%s14613_s21 + $0x86c] ss:$784 sps:$4 sm:$0xff]  }
 0x4bb   : > { %11811 = vmatpush1.bf16.xpose.msra.mxu0 %v13985_v4  ;;  %8680 = vmatprep.mubr.f32.mxu0 %v3297_v5  ;;  %v14046_v4 = vld [vmem:[%s14613_s21 + $0xe94] ss:$784 sps:$4 sm:$0xff]   ;;  %v14045_v5 = vld [vmem:[%s14613_s21 + $0x878] ss:$784 sps:$4 sm:$0xff]  }
 0x4bc   : > { %8611 = vmatmul.mubr.f32.vlgmr.msra.gmra.mrb[68].mxu1 %v3279_v39  ;;  %11813 = vmatprep.subr.bf16.mxu0 %v13990_v6  ;;  %v14017_v39 = vld [vmem:[%s14613_s21 + $0x860] ss:$784 sps:$4 sm:$0xff]   ;;  %v14049_v6 = vld [vmem:[%s14613_s21 + $0xe9c] ss:$784 sps:$4 sm:$0xff]  }
 0x4bd   : > { %11827 = vmatpush1.bf16.xpose.msra.mxu1 %v13989_v7  ;;  %8750 = vmatprep.mubr.f32.mxu1 %v3298_v8  ;;  %v14048_v7 = vld [vmem:[%s14613_s21 + $0xe90] ss:$784 sps:$4 sm:$0xff]   ;;  %v14052_v8 = vld [vmem:[%s14613_s21 + $0x14b4] ss:$784 sps:$4 sm:$0xff]  }
 0x4be   : > { %11829 = vmatprep.subr.bf16.mxu1 %v13993_v9  ;;  %v14051_v9 = vld [vmem:[%s14613_s21 + $0xe98] ss:$784 sps:$4 sm:$0xff]  }
 0x4c3   : > { %11815 = vmatpush1.bf16.xpose.msra.mxu0 %v13992_v10  ;;  %v14055_v10 = vld [vmem:[%s14613_s21 + $0x14bc] ss:$784 sps:$4 sm:$0xff]  }
 0x4c4   : > { %11817 = vmatprep.subr.bf16.mxu0 %v13996_v11 }
 0x4c5   : > { %11831 = vmatpush1.bf16.xpose.msra.mxu1 %v13995_v12 }
 0x4c6   : > { %11833 = vmatprep.subr.bf16.mxu1 %v13999_v14 }
 0x4cb   : > { %11819 = vmatpush1.bf16.xpose.msra.mxu0 %v13998_v15  ;;  %v2627_v15 = vld [vmem:[%s14607_s7 + $0x130] sm:$0xff] }
 0x4cc   : > { %11821 = vmatprep.subr.bf16.mxu0 %v14002_v16  ;;  %v3333_v22 = vcombine.high %v2627_v15, %v2627_v15 }
 0x4cd   : > { %11835 = vmatpush1.bf16.xpose.msra.mxu1 %v14001_v17  ;;  %v7702_v19 = vpop.f32.mrb[56].mxu0  ;;  %v14054_v17 = vld [vmem:[%s14613_s21 + $0x14b0] ss:$784 sps:$4 sm:$0xff]  }
 0x4ce   : > { %v7703_v20 = vadd.f32 %v7702_v19, %v7633_v60  ;;  %v7704_v21 = vpop.f32.mrb[57].mxu0  ;;  %11837 = vmatprep.subr.bf16.mxu1 %v14005_v18  ;;  %v3330_v60 = vrot.slane %v3316_v57, %v14630_v13  ;;  %v14089_v57 = vld [vmem:[%s14613_s21 + $0x278] ss:$784 sps:$4 sm:$0xff]  }
 0x4cf   : > { %v7772_v23 = vpop.f32.mrb[56].mxu1  ;;  %v14057_v21 = vld [vmem:[%s14613_s21 + $0x14b8] ss:$784 sps:$4 sm:$0xff]  }
 0x4d0   : > { %v7773_v25 = vadd.f32 %v7772_v23, %v7703_v20  ;;  %v7774_v26 = vpop.f32.mrb[57].mxu1  ;;  %v3332_v1 = vcombine.high %v3330_v60, %v3330_v60  ;;  %v14058_v20 = vld [vmem:[%s14613_s21 + $0x264] ss:$784 sps:$4 sm:$0xff]   ;;  %v14062_v23 = vld [vmem:[%s14613_s21 + $0x26c] ss:$784 sps:$4 sm:$0xff]  }
 0x4d1   : > { %v14060_v26 = vld [vmem:[%s14613_s21 + $0x260] ss:$784 sps:$4 sm:$0xff]  }
 0x4d3   : > { %11823 = vmatpush1.bf16.xpose.msra.mxu0 %v14004_v24  ;;  %v3340_v24 = vrot.slane %v2627_v15, %v14630_v13 }
 0x4d4   : > { %11841 = vmatprep.subr.bf16.mxu0 %v14008_v27 }
 0x4d5   : > { %11839 = vmatpush1.bf16.xpose.msra.mxu1 %v14007_v28  ;;  %v3348_v27 = vcombine.high %v3340_v24, %v3340_v24  ;;  %v14065_v28 = vld [vmem:[%s14613_s21 + $0x884] ss:$784 sps:$4 sm:$0xff]  }
 0x4d6   : > { %11857 = vmatprep.subr.bf16.mxu1 %v14012_v30 }
 0x4da   : > { %8681 = vmatmul.mubr.f32.vlgmr.msra.gmra.mrb[70].mxu0 %v3289_v2  ;;  %v14043_v2 = vld [vmem:[%s14613_s21 + $0x87c] ss:$784 sps:$4 sm:$0xff]  }
 0x4db   : > { %11843 = vmatpush1.bf16.xpose.msra.mxu0 %v14010_v33  ;;  %8820 = vmatprep.mubr.f32.mxu0 %v3314_v34  ;;  %v14071_v33 = vld [vmem:[%s14613_s21 + $0xea4] ss:$784 sps:$4 sm:$0xff]   ;;  %v14070_v34 = vld [vmem:[%s14613_s21 + $0x888] ss:$784 sps:$4 sm:$0xff]  }
 0x4dc   : > { %8751 = vmatmul.mubr.f32.vlgmr.msra.gmra.mrb[70].mxu1 %v3296_v3  ;;  %11845 = vmatprep.subr.bf16.mxu0 %v14015_v35  ;;  %v14042_v3 = vld [vmem:[%s14613_s21 + $0x870] ss:$784 sps:$4 sm:$0xff]   ;;  %v14074_v35 = vld [vmem:[%s14613_s21 + $0xeac] ss:$784 sps:$4 sm:$0xff]  }
 0x4dd   : > { %11859 = vmatpush1.bf16.xpose.msra.mxu1 %v14014_v36  ;;  %8890 = vmatprep.mubr.f32.mxu1 %v3315_v37  ;;  %v14073_v36 = vld [vmem:[%s14613_s21 + $0xea0] ss:$784 sps:$4 sm:$0xff]   ;;  %v14077_v37 = vld [vmem:[%s14613_s21 + $0x14c4] ss:$784 sps:$4 sm:$0xff]  }
 0x4de   : > { %11861 = vmatprep.subr.bf16.mxu1 %v14018_v38  ;;  %v14076_v38 = vld [vmem:[%s14613_s21 + $0xea8] ss:$784 sps:$4 sm:$0xff]  }
 0x4e3   : > { %11847 = vmatpush1.bf16.xpose.msra.mxu0 %v14017_v39  ;;  %v14080_v39 = vld [vmem:[%s14613_s21 + $0x14cc] ss:$784 sps:$4 sm:$0xff]  }
 0x4e4   : > { %11849 = vmatprep.subr.bf16.mxu0 %v14021_v40 }
 0x4e5   : > { %11863 = vmatpush1.bf16.xpose.msra.mxu1 %v14020_v41 }
 0x4e6   : > { %11865 = vmatprep.subr.bf16.mxu1 %v14024_v42 }
 0x4eb   : > { %11851 = vmatpush1.bf16.xpose.msra.mxu0 %v14023_v43  ;;  %v2628_v43 = vld [vmem:[%s14607_s7 + $0x138] sm:$0xff] }
 0x4ec   : > { %11853 = vmatprep.subr.bf16.mxu0 %v14027_v44  ;;  %v3350_v50 = vcombine.high %v2628_v43, %v2628_v43 }
 0x4ed   : > { %11867 = vmatpush1.bf16.xpose.msra.mxu1 %v14026_v45  ;;  %v7842_v47 = vpop.f32.mrb[58].mxu0  ;;  %v14079_v45 = vld [vmem:[%s14613_s21 + $0x14c0] ss:$784 sps:$4 sm:$0xff]  }
 0x4ee   : > { %v7843_v48 = vadd.f32 %v7842_v47, %v7773_v25  ;;  %v7844_v49 = vpop.f32.mrb[59].mxu0  ;;  %11869 = vmatprep.subr.bf16.mxu1 %v14030_v46  ;;  %v3347_v25 = vrot.slane %v3333_v22, %v14630_v13  ;;  %v14114_v22 = vld [vmem:[%s14613_s21 + $0x288] ss:$784 sps:$4 sm:$0xff]  }
 0x4ef   : > { %v7912_v51 = vpop.f32.mrb[58].mxu1  ;;  %v14082_v49 = vld [vmem:[%s14613_s21 + $0x14c8] ss:$784 sps:$4 sm:$0xff]  }
 0x4f0   : > { %v7913_v53 = vadd.f32 %v7912_v51, %v7843_v48  ;;  %v7914_v54 = vpop.f32.mrb[59].mxu1  ;;  %v3349_v30 = vcombine.high %v3347_v25, %v3347_v25  ;;  %v14083_v48 = vld [vmem:[%s14613_s21 + $0x274] ss:$784 sps:$4 sm:$0xff]   ;;  %v14087_v51 = vld [vmem:[%s14613_s21 + $0x27c] ss:$784 sps:$4 sm:$0xff]  }
 0x4f1   : > { %v14085_v54 = vld [vmem:[%s14613_s21 + $0x270] ss:$784 sps:$4 sm:$0xff]  }
 0x4f3   : > { %11855 = vmatpush1.bf16.xpose.msra.mxu0 %v14029_v52  ;;  %v3357_v52 = vrot.slane %v2628_v43, %v14630_v13 }
 0x4f4   : > { %11873 = vmatprep.subr.bf16.mxu0 %v14033_v55 }
 0x4f5   : > { %11871 = vmatpush1.bf16.xpose.msra.mxu1 %v14032_v56  ;;  %v3365_v55 = vcombine.high %v3357_v52, %v3357_v52  ;;  %v14090_v56 = vld [vmem:[%s14613_s21 + $0x894] ss:$784 sps:$4 sm:$0xff]  }
 0x4f6   : > { %11889 = vmatprep.subr.bf16.mxu1 %v14037_v58 }
 0x4fa   : > { %8821 = vmatmul.mubr.f32.vlgmr.msra.gmra.mrb[72].mxu0 %v3306_v31  ;;  %v14068_v31 = vld [vmem:[%s14613_s21 + $0x88c] ss:$784 sps:$4 sm:$0xff]  }
 0x4fb   : > { %11875 = vmatpush1.bf16.xpose.msra.mxu0 %v14035_v61  ;;  %8960 = vmatprep.mubr.f32.mxu0 %v3331_v62  ;;  %v14096_v61 = vld [vmem:[%s14613_s21 + $0xeb4] ss:$784 sps:$4 sm:$0xff]   ;;  %v14095_v62 = vld [vmem:[%s14613_s21 + $0x898] ss:$784 sps:$4 sm:$0xff]  }
 0x4fc   : > { %8891 = vmatmul.mubr.f32.vlgmr.msra.gmra.mrb[72].mxu1 %v3313_v32  ;;  %11877 = vmatprep.subr.bf16.mxu0 %v14040_v63  ;;  %v14067_v32 = vld [vmem:[%s14613_s21 + $0x880] ss:$784 sps:$4 sm:$0xff]   ;;  %v14099_v63 = vld [vmem:[%s14613_s21 + $0xebc] ss:$784 sps:$4 sm:$0xff]  }
 0x4fd   : > { %11891 = vmatpush1.bf16.xpose.msra.mxu1 %v14039_v0  ;;  %9030 = vmatprep.mubr.f32.mxu1 %v3332_v1  ;;  %v14098_v0 = vld [vmem:[%s14613_s21 + $0xeb0] ss:$784 sps:$4 sm:$0xff]   ;;  %v14102_v1 = vld [vmem:[%s14613_s21 + $0x14d4] ss:$784 sps:$4 sm:$0xff]  }
 0x4fe   : > { %11893 = vmatprep.subr.bf16.mxu1 %v14043_v2  ;;  %v14101_v2 = vld [vmem:[%s14613_s21 + $0xeb8] ss:$784 sps:$4 sm:$0xff]  }
 0x503   : > { %11879 = vmatpush1.bf16.xpose.msra.mxu0 %v14042_v3  ;;  %v14105_v3 = vld [vmem:[%s14613_s21 + $0x14dc] ss:$784 sps:$4 sm:$0xff]  }
 0x504   : > { %11881 = vmatprep.subr.bf16.mxu0 %v14046_v4 }
 0x505   : > { %11895 = vmatpush1.bf16.xpose.msra.mxu1 %v14045_v5 }
 0x506   : > { %11897 = vmatprep.subr.bf16.mxu1 %v14049_v6 }
 0x50b   : > { %11883 = vmatpush1.bf16.xpose.msra.mxu0 %v14048_v7  ;;  %v2629_v7 = vld [vmem:[%s14607_s7 + $0x140] sm:$0xff] }
 0x50c   : > { %11885 = vmatprep.subr.bf16.mxu0 %v14052_v8  ;;  %v3367_v15 = vcombine.high %v2629_v7, %v2629_v7 }
 0x50d   : > { %11899 = vmatpush1.bf16.xpose.msra.mxu1 %v14051_v9  ;;  %v7982_v11 = vpop.f32.mrb[60].mxu0  ;;  %v14104_v9 = vld [vmem:[%s14613_s21 + $0x14d0] ss:$784 sps:$4 sm:$0xff]  }
 0x50e   : > { %v7983_v12 = vadd.f32 %v7982_v11, %v7913_v53  ;;  %v7984_v14 = vpop.f32.mrb[61].mxu0  ;;  %11901 = vmatprep.subr.bf16.mxu1 %v14055_v10  ;;  %v3364_v53 = vrot.slane %v3350_v50, %v14630_v13  ;;  %v14139_v50 = vld [vmem:[%s14613_s21 + $0x298] ss:$784 sps:$4 sm:$0xff]  }
 0x50f   : > { %v8052_v16 = vpop.f32.mrb[60].mxu1  ;;  %v14107_v14 = vld [vmem:[%s14613_s21 + $0x14d8] ss:$784 sps:$4 sm:$0xff]  }
 0x510   : > { %v8053_v18 = vadd.f32 %v8052_v16, %v7983_v12  ;;  %v8054_v19 = vpop.f32.mrb[61].mxu1  ;;  %v3366_v58 = vcombine.high %v3364_v53, %v3364_v53  ;;  %v14108_v12 = vld [vmem:[%s14613_s21 + $0x284] ss:$784 sps:$4 sm:$0xff]   ;;  %v14112_v16 = vld [vmem:[%s14613_s21 + $0x28c] ss:$784 sps:$4 sm:$0xff]  }
 0x511   : > { %v14110_v19 = vld [vmem:[%s14613_s21 + $0x280] ss:$784 sps:$4 sm:$0xff]  }
 0x513   : > { %11887 = vmatpush1.bf16.xpose.msra.mxu0 %v14054_v17  ;;  %v3374_v17 = vrot.slane %v2629_v7, %v14630_v13 }
 0x514   : > { %11905 = vmatprep.subr.bf16.mxu0 %v14058_v20 }
 0x515   : > { %11903 = vmatpush1.bf16.xpose.msra.mxu1 %v14057_v21  ;;  %v3382_v20 = vcombine.high %v3374_v17, %v3374_v17  ;;  %v14115_v21 = vld [vmem:[%s14613_s21 + $0x8a4] ss:$784 sps:$4 sm:$0xff]  }
 0x516   : > { %11921 = vmatprep.subr.bf16.mxu1 %v14062_v23 }
 0x51a   : > { %8961 = vmatmul.mubr.f32.vlgmr.msra.gmra.mrb[74].mxu0 %v3323_v59  ;;  %v14093_v59 = vld [vmem:[%s14613_s21 + $0x89c] ss:$784 sps:$4 sm:$0xff]  }
 0x51b   : > { %11907 = vmatpush1.bf16.xpose.msra.mxu0 %v14060_v26  ;;  %9100 = vmatprep.mubr.f32.mxu0 %v3348_v27  ;;  %v14121_v26 = vld [vmem:[%s14613_s21 + $0xec4] ss:$784 sps:$4 sm:$0xff]   ;;  %v14120_v27 = vld [vmem:[%s14613_s21 + $0x8a8] ss:$784 sps:$4 sm:$0xff]  }
 0x51c   : > { %9031 = vmatmul.mubr.f32.vlgmr.msra.gmra.mrb[74].mxu1 %v3330_v60  ;;  %11909 = vmatprep.subr.bf16.mxu0 %v14065_v28  ;;  %v14092_v60 = vld [vmem:[%s14613_s21 + $0x890] ss:$784 sps:$4 sm:$0xff]   ;;  %v14124_v28 = vld [vmem:[%s14613_s21 + $0xecc] ss:$784 sps:$4 sm:$0xff]  }
 0x51d   : > { %11923 = vmatpush1.bf16.xpose.msra.mxu1 %v14064_v29  ;;  %9170 = vmatprep.mubr.f32.mxu1 %v3349_v30  ;;  %v14123_v29 = vld [vmem:[%s14613_s21 + $0xec0] ss:$784 sps:$4 sm:$0xff]   ;;  %v14127_v30 = vld [vmem:[%s14613_s21 + $0x14e4] ss:$784 sps:$4 sm:$0xff]  }
 0x51e   : > { %11925 = vmatprep.subr.bf16.mxu1 %v14068_v31  ;;  %v14126_v31 = vld [vmem:[%s14613_s21 + $0xec8] ss:$784 sps:$4 sm:$0xff]  }
 0x523   : > { %11911 = vmatpush1.bf16.xpose.msra.mxu0 %v14067_v32  ;;  %v14130_v32 = vld [vmem:[%s14613_s21 + $0x14ec] ss:$784 sps:$4 sm:$0xff]  }
 0x524   : > { %11913 = vmatprep.subr.bf16.mxu0 %v14071_v33 }
 0x525   : > { %11927 = vmatpush1.bf16.xpose.msra.mxu1 %v14070_v34 }
 0x526   : > { %11929 = vmatprep.subr.bf16.mxu1 %v14074_v35 }
 0x52b   : > { %11915 = vmatpush1.bf16.xpose.msra.mxu0 %v14073_v36  ;;  %v2630_v36 = vld [vmem:[%s14607_s7 + $0x148] sm:$0xff] }
 0x52c   : > { %11917 = vmatprep.subr.bf16.mxu0 %v14077_v37  ;;  %v3384_v43 = vcombine.high %v2630_v36, %v2630_v36 }
 0x52d   : > { %11931 = vmatpush1.bf16.xpose.msra.mxu1 %v14076_v38  ;;  %v8122_v40 = vpop.f32.mrb[62].mxu0  ;;  %v14129_v38 = vld [vmem:[%s14613_s21 + $0x14e0] ss:$784 sps:$4 sm:$0xff]  }
 0x52e   : > { %v8123_v41 = vadd.f32 %v8122_v40, %v8053_v18  ;;  %v8124_v42 = vpop.f32.mrb[63].mxu0  ;;  %11933 = vmatprep.subr.bf16.mxu1 %v14080_v39  ;;  %v3381_v18 = vrot.slane %v3367_v15, %v14630_v13  ;;  %v14164_v15 = vld [vmem:[%s14613_s21 + $0x2a8] ss:$784 sps:$4 sm:$0xff]  }
 0x52f   : > { %v8192_v44 = vpop.f32.mrb[62].mxu1  ;;  %v14132_v42 = vld [vmem:[%s14613_s21 + $0x14e8] ss:$784 sps:$4 sm:$0xff]  }
 0x530   : > { %v8193_v46 = vadd.f32 %v8192_v44, %v8123_v41  ;;  %v8194_v47 = vpop.f32.mrb[63].mxu1  ;;  %v3383_v23 = vcombine.high %v3381_v18, %v3381_v18  ;;  %v14133_v41 = vld [vmem:[%s14613_s21 + $0x294] ss:$784 sps:$4 sm:$0xff]   ;;  %v14137_v44 = vld [vmem:[%s14613_s21 + $0x29c] ss:$784 sps:$4 sm:$0xff]  }
 0x531   : > { %v14135_v47 = vld [vmem:[%s14613_s21 + $0x290] ss:$784 sps:$4 sm:$0xff]  }
 0x533   : > { %11919 = vmatpush1.bf16.xpose.msra.mxu0 %v14079_v45  ;;  %v3391_v45 = vrot.slane %v2630_v36, %v14630_v13 }
 0x534   : > { %11937 = vmatprep.subr.bf16.mxu0 %v14083_v48 }
 0x535   : > { %11935 = vmatpush1.bf16.xpose.msra.mxu1 %v14082_v49  ;;  %v3399_v48 = vcombine.high %v3391_v45, %v3391_v45  ;;  %v14140_v49 = vld [vmem:[%s14613_s21 + $0x8b4] ss:$784 sps:$4 sm:$0xff]  }
 0x536   : > { %11953 = vmatprep.subr.bf16.mxu1 %v14087_v51 }
 0x53a   : > { %9101 = vmatmul.mubr.f32.vlgmr.msra.gmra.mrb[76].mxu0 %v3340_v24  ;;  %v14118_v24 = vld [vmem:[%s14613_s21 + $0x8ac] ss:$784 sps:$4 sm:$0xff]  }
 0x53b   : > { %11939 = vmatpush1.bf16.xpose.msra.mxu0 %v14085_v54  ;;  %9240 = vmatprep.mubr.f32.mxu0 %v3365_v55  ;;  %v14146_v54 = vld [vmem:[%s14613_s21 + $0xed4] ss:$784 sps:$4 sm:$0xff]   ;;  %v14145_v55 = vld [vmem:[%s14613_s21 + $0x8b8] ss:$784 sps:$4 sm:$0xff]  }
 0x53c   : > { %9171 = vmatmul.mubr.f32.vlgmr.msra.gmra.mrb[76].mxu1 %v3347_v25  ;;  %11941 = vmatprep.subr.bf16.mxu0 %v14090_v56  ;;  %v14117_v25 = vld [vmem:[%s14613_s21 + $0x8a0] ss:$784 sps:$4 sm:$0xff]   ;;  %v14149_v56 = vld [vmem:[%s14613_s21 + $0xedc] ss:$784 sps:$4 sm:$0xff]  }
 0x53d   : > { %11955 = vmatpush1.bf16.xpose.msra.mxu1 %v14089_v57  ;;  %9310 = vmatprep.mubr.f32.mxu1 %v3366_v58  ;;  %v14148_v57 = vld [vmem:[%s14613_s21 + $0xed0] ss:$784 sps:$4 sm:$0xff]   ;;  %v14152_v58 = vld [vmem:[%s14613_s21 + $0x14f4] ss:$784 sps:$4 sm:$0xff]  }
 0x53e   : > { %11957 = vmatprep.subr.bf16.mxu1 %v14093_v59  ;;  %v14151_v59 = vld [vmem:[%s14613_s21 + $0xed8] ss:$784 sps:$4 sm:$0xff]  }
 0x543   : > { %11943 = vmatpush1.bf16.xpose.msra.mxu0 %v14092_v60  ;;  %v14155_v60 = vld [vmem:[%s14613_s21 + $0x14fc] ss:$784 sps:$4 sm:$0xff]  }
 0x544   : > { %11945 = vmatprep.subr.bf16.mxu0 %v14096_v61 }
 0x545   : > { %11959 = vmatpush1.bf16.xpose.msra.mxu1 %v14095_v62 }
 0x546   : > { %11961 = vmatprep.subr.bf16.mxu1 %v14099_v63 }
 0x54b   : > { %11947 = vmatpush1.bf16.xpose.msra.mxu0 %v14098_v0  ;;  %v2631_v0 = vld [vmem:[%s14607_s7 + $0x150] sm:$0xff] }
 0x54c   : > { %11949 = vmatprep.subr.bf16.mxu0 %v14102_v1  ;;  %v3401_v7 = vcombine.high %v2631_v0, %v2631_v0 }
 0x54d   : > { %11963 = vmatpush1.bf16.xpose.msra.mxu1 %v14101_v2  ;;  %v8262_v4 = vpop.f32.mrb[64].mxu0  ;;  %v14154_v2 = vld [vmem:[%s14613_s21 + $0x14f0] ss:$784 sps:$4 sm:$0xff]  }
 0x54e   : > { %v8263_v5 = vadd.f32 %v8262_v4, %v8193_v46  ;;  %v8264_v6 = vpop.f32.mrb[65].mxu0  ;;  %11965 = vmatprep.subr.bf16.mxu1 %v14105_v3  ;;  %v3398_v46 = vrot.slane %v3384_v43, %v14630_v13  ;;  %v14189_v43 = vld [vmem:[%s14613_s21 + $0x2b8] ss:$784 sps:$4 sm:$0xff]  }
 0x54f   : > { %v8332_v8 = vpop.f32.mrb[64].mxu1  ;;  %v14157_v6 = vld [vmem:[%s14613_s21 + $0x14f8] ss:$784 sps:$4 sm:$0xff]  }
 0x550   : > { %v8333_v10 = vadd.f32 %v8332_v8, %v8263_v5  ;;  %v8334_v11 = vpop.f32.mrb[65].mxu1  ;;  %v3400_v51 = vcombine.high %v3398_v46, %v3398_v46  ;;  %v14158_v5 = vld [vmem:[%s14613_s21 + $0x2a4] ss:$784 sps:$4 sm:$0xff]   ;;  %v14162_v8 = vld [vmem:[%s14613_s21 + $0x2ac] ss:$784 sps:$4 sm:$0xff]  }
 0x551   : > { %v14160_v11 = vld [vmem:[%s14613_s21 + $0x2a0] ss:$784 sps:$4 sm:$0xff]  }
 0x553   : > { %11951 = vmatpush1.bf16.xpose.msra.mxu0 %v14104_v9  ;;  %v3408_v9 = vrot.slane %v2631_v0, %v14630_v13 }
 0x554   : > { %11969 = vmatprep.subr.bf16.mxu0 %v14108_v12 }
 0x555   : > { %11967 = vmatpush1.bf16.xpose.msra.mxu1 %v14107_v14  ;;  %v3416_v12 = vcombine.high %v3408_v9, %v3408_v9  ;;  %v14165_v14 = vld [vmem:[%s14613_s21 + $0x8c4] ss:$784 sps:$4 sm:$0xff]  }
 0x556   : > { %11985 = vmatprep.subr.bf16.mxu1 %v14112_v16 }
 0x55a   : > { %9241 = vmatmul.mubr.f32.vlgmr.msra.gmra.mrb[78].mxu0 %v3357_v52  ;;  %v14143_v52 = vld [vmem:[%s14613_s21 + $0x8bc] ss:$784 sps:$4 sm:$0xff]  }
 0x55b   : > { %11971 = vmatpush1.bf16.xpose.msra.mxu0 %v14110_v19  ;;  %9380 = vmatprep.mubr.f32.mxu0 %v3382_v20  ;;  %v14171_v19 = vld [vmem:[%s14613_s21 + $0xee4] ss:$784 sps:$4 sm:$0xff]   ;;  %v14170_v20 = vld [vmem:[%s14613_s21 + $0x8c8] ss:$784 sps:$4 sm:$0xff]  }
 0x55c   : > { %9311 = vmatmul.mubr.f32.vlgmr.msra.gmra.mrb[78].mxu1 %v3364_v53  ;;  %11973 = vmatprep.subr.bf16.mxu0 %v14115_v21  ;;  %v14142_v53 = vld [vmem:[%s14613_s21 + $0x8b0] ss:$784 sps:$4 sm:$0xff]   ;;  %v14174_v21 = vld [vmem:[%s14613_s21 + $0xeec] ss:$784 sps:$4 sm:$0xff]  }
 0x55d   : > { %11987 = vmatpush1.bf16.xpose.msra.mxu1 %v14114_v22  ;;  %9450 = vmatprep.mubr.f32.mxu1 %v3383_v23  ;;  %v14173_v22 = vld [vmem:[%s14613_s21 + $0xee0] ss:$784 sps:$4 sm:$0xff]   ;;  %v14177_v23 = vld [vmem:[%s14613_s21 + $0x1504] ss:$784 sps:$4 sm:$0xff]  }
 0x55e   : > { %11989 = vmatprep.subr.bf16.mxu1 %v14118_v24  ;;  %v14176_v24 = vld [vmem:[%s14613_s21 + $0xee8] ss:$784 sps:$4 sm:$0xff]  }
 0x563   : > { %11975 = vmatpush1.bf16.xpose.msra.mxu0 %v14117_v25  ;;  %v14180_v25 = vld [vmem:[%s14613_s21 + $0x150c] ss:$784 sps:$4 sm:$0xff]  }
 0x564   : > { %11977 = vmatprep.subr.bf16.mxu0 %v14121_v26 }
 0x565   : > { %11991 = vmatpush1.bf16.xpose.msra.mxu1 %v14120_v27 }
 0x566   : > { %11993 = vmatprep.subr.bf16.mxu1 %v14124_v28 }
 0x56b   : > { %11979 = vmatpush1.bf16.xpose.msra.mxu0 %v14123_v29  ;;  %v2632_v29 = vld [vmem:[%s14607_s7 + $0x158] sm:$0xff] }
 0x56c   : > { %11981 = vmatprep.subr.bf16.mxu0 %v14127_v30  ;;  %v3418_v36 = vcombine.high %v2632_v29, %v2632_v29 }
 0x56d   : > { %11995 = vmatpush1.bf16.xpose.msra.mxu1 %v14126_v31  ;;  %v8402_v33 = vpop.f32.mrb[66].mxu0  ;;  %v14179_v31 = vld [vmem:[%s14613_s21 + $0x1500] ss:$784 sps:$4 sm:$0xff]  }
 0x56e   : > { %v8403_v34 = vadd.f32 %v8402_v33, %v8333_v10  ;;  %v8404_v35 = vpop.f32.mrb[67].mxu0  ;;  %11997 = vmatprep.subr.bf16.mxu1 %v14130_v32  ;;  %v3415_v10 = vrot.slane %v3401_v7, %v14630_v13  ;;  %v14214_v7 = vld [vmem:[%s14613_s21 + $0x2c8] ss:$784 sps:$4 sm:$0xff]  }
 0x56f   : > { %v8472_v37 = vpop.f32.mrb[66].mxu1  ;;  %v14182_v35 = vld [vmem:[%s14613_s21 + $0x1508] ss:$784 sps:$4 sm:$0xff]  }
 0x570   : > { %v8473_v39 = vadd.f32 %v8472_v37, %v8403_v34  ;;  %v8474_v40 = vpop.f32.mrb[67].mxu1  ;;  %v3417_v16 = vcombine.high %v3415_v10, %v3415_v10  ;;  %v14183_v34 = vld [vmem:[%s14613_s21 + $0x2b4] ss:$784 sps:$4 sm:$0xff]   ;;  %v14187_v37 = vld [vmem:[%s14613_s21 + $0x2bc] ss:$784 sps:$4 sm:$0xff]  }
 0x571   : > { %v14185_v40 = vld [vmem:[%s14613_s21 + $0x2b0] ss:$784 sps:$4 sm:$0xff]  }
 0x573   : > { %11983 = vmatpush1.bf16.xpose.msra.mxu0 %v14129_v38  ;;  %v3425_v38 = vrot.slane %v2632_v29, %v14630_v13 }
 0x574   : > { %12001 = vmatprep.subr.bf16.mxu0 %v14133_v41 }
 0x575   : > { %11999 = vmatpush1.bf16.xpose.msra.mxu1 %v14132_v42  ;;  %v3433_v41 = vcombine.high %v3425_v38, %v3425_v38  ;;  %v14190_v42 = vld [vmem:[%s14613_s21 + $0x8d4] ss:$784 sps:$4 sm:$0xff]  }
 0x576   : > { %12017 = vmatprep.subr.bf16.mxu1 %v14137_v44 }
 0x57a   : > { %9381 = vmatmul.mubr.f32.vlgmr.msra.gmra.mrb[80].mxu0 %v3374_v17  ;;  %v14168_v17 = vld [vmem:[%s14613_s21 + $0x8cc] ss:$784 sps:$4 sm:$0xff]  }
 0x57b   : > { %12003 = vmatpush1.bf16.xpose.msra.mxu0 %v14135_v47  ;;  %9520 = vmatprep.mubr.f32.mxu0 %v3399_v48  ;;  %v14196_v47 = vld [vmem:[%s14613_s21 + $0xef4] ss:$784 sps:$4 sm:$0xff]   ;;  %v14195_v48 = vld [vmem:[%s14613_s21 + $0x8d8] ss:$784 sps:$4 sm:$0xff]  }
 0x57c   : > { %9451 = vmatmul.mubr.f32.vlgmr.msra.gmra.mrb[80].mxu1 %v3381_v18  ;;  %12005 = vmatprep.subr.bf16.mxu0 %v14140_v49  ;;  %v14167_v18 = vld [vmem:[%s14613_s21 + $0x8c0] ss:$784 sps:$4 sm:$0xff]   ;;  %v14199_v49 = vld [vmem:[%s14613_s21 + $0xefc] ss:$784 sps:$4 sm:$0xff]  }
 0x57d   : > { %12019 = vmatpush1.bf16.xpose.msra.mxu1 %v14139_v50  ;;  %9590 = vmatprep.mubr.f32.mxu1 %v3400_v51  ;;  %v14198_v50 = vld [vmem:[%s14613_s21 + $0xef0] ss:$784 sps:$4 sm:$0xff]   ;;  %v14202_v51 = vld [vmem:[%s14613_s21 + $0x1514] ss:$784 sps:$4 sm:$0xff]  }
 0x57e   : > { %12021 = vmatprep.subr.bf16.mxu1 %v14143_v52  ;;  %v14201_v52 = vld [vmem:[%s14613_s21 + $0xef8] ss:$784 sps:$4 sm:$0xff]  }
 0x583   : > { %12007 = vmatpush1.bf16.xpose.msra.mxu0 %v14142_v53  ;;  %v14205_v53 = vld [vmem:[%s14613_s21 + $0x151c] ss:$784 sps:$4 sm:$0xff]  }
 0x584   : > { %12009 = vmatprep.subr.bf16.mxu0 %v14146_v54 }
 0x585   : > { %12023 = vmatpush1.bf16.xpose.msra.mxu1 %v14145_v55 }
 0x586   : > { %12025 = vmatprep.subr.bf16.mxu1 %v14149_v56 }
 0x58b   : > { %12011 = vmatpush1.bf16.xpose.msra.mxu0 %v14148_v57  ;;  %v2633_v57 = vld [vmem:[%s14607_s7 + $0x160] sm:$0xff] }
 0x58c   : > { %12013 = vmatprep.subr.bf16.mxu0 %v14152_v58  ;;  %v3435_v0 = vcombine.high %v2633_v57, %v2633_v57 }
 0x58d   : > { %12027 = vmatpush1.bf16.xpose.msra.mxu1 %v14151_v59  ;;  %v8542_v61 = vpop.f32.mrb[68].mxu0  ;;  %v14204_v59 = vld [vmem:[%s14613_s21 + $0x1510] ss:$784 sps:$4 sm:$0xff]  }
 0x58e   : > { %v8543_v62 = vadd.f32 %v8542_v61, %v8473_v39  ;;  %v8544_v63 = vpop.f32.mrb[69].mxu0  ;;  %12029 = vmatprep.subr.bf16.mxu1 %v14155_v60  ;;  %v3432_v39 = vrot.slane %v3418_v36, %v14630_v13  ;;  %v14239_v36 = vld [vmem:[%s14613_s21 + $0x2d8] ss:$784 sps:$4 sm:$0xff]  }
 0x58f   : > { %v8612_v1 = vpop.f32.mrb[68].mxu1  ;;  %v14207_v63 = vld [vmem:[%s14613_s21 + $0x1518] ss:$784 sps:$4 sm:$0xff]  }
 0x590   : > { %v8613_v3 = vadd.f32 %v8612_v1, %v8543_v62  ;;  %v8614_v4 = vpop.f32.mrb[69].mxu1  ;;  %v3434_v44 = vcombine.high %v3432_v39, %v3432_v39  ;;  %v14208_v62 = vld [vmem:[%s14613_s21 + $0x2c4] ss:$784 sps:$4 sm:$0xff]   ;;  %v14212_v1 = vld [vmem:[%s14613_s21 + $0x2cc] ss:$784 sps:$4 sm:$0xff]  }
 0x591   : > { %v14210_v4 = vld [vmem:[%s14613_s21 + $0x2c0] ss:$784 sps:$4 sm:$0xff]  }
 0x593   : > { %12015 = vmatpush1.bf16.xpose.msra.mxu0 %v14154_v2  ;;  %v3442_v2 = vrot.slane %v2633_v57, %v14630_v13 }
 0x594   : > { %12033 = vmatprep.subr.bf16.mxu0 %v14158_v5 }
 0x595   : > { %12031 = vmatpush1.bf16.xpose.msra.mxu1 %v14157_v6  ;;  %v3450_v5 = vcombine.high %v3442_v2, %v3442_v2  ;;  %v14215_v6 = vld [vmem:[%s14613_s21 + $0x8e4] ss:$784 sps:$4 sm:$0xff]  }
 0x596   : > { %12049 = vmatprep.subr.bf16.mxu1 %v14162_v8 }
 0x59a   : > { %9521 = vmatmul.mubr.f32.vlgmr.msra.gmra.mrb[82].mxu0 %v3391_v45  ;;  %v14193_v45 = vld [vmem:[%s14613_s21 + $0x8dc] ss:$784 sps:$4 sm:$0xff]  }
 0x59b   : > { %12035 = vmatpush1.bf16.xpose.msra.mxu0 %v14160_v11  ;;  %9660 = vmatprep.mubr.f32.mxu0 %v3416_v12  ;;  %v14221_v11 = vld [vmem:[%s14613_s21 + $0xf04] ss:$784 sps:$4 sm:$0xff]   ;;  %v14220_v12 = vld [vmem:[%s14613_s21 + $0x8e8] ss:$784 sps:$4 sm:$0xff]  }
 0x59c   : > { %9591 = vmatmul.mubr.f32.vlgmr.msra.gmra.mrb[82].mxu1 %v3398_v46  ;;  %12037 = vmatprep.subr.bf16.mxu0 %v14165_v14  ;;  %v14192_v46 = vld [vmem:[%s14613_s21 + $0x8d0] ss:$784 sps:$4 sm:$0xff]   ;;  %v14224_v14 = vld [vmem:[%s14613_s21 + $0xf0c] ss:$784 sps:$4 sm:$0xff]  }
 0x59d   : > { %12051 = vmatpush1.bf16.xpose.msra.mxu1 %v14164_v15  ;;  %9730 = vmatprep.mubr.f32.mxu1 %v3417_v16  ;;  %v14223_v15 = vld [vmem:[%s14613_s21 + $0xf00] ss:$784 sps:$4 sm:$0xff]   ;;  %v14227_v16 = vld [vmem:[%s14613_s21 + $0x1524] ss:$784 sps:$4 sm:$0xff]  }
 0x59e   : > { %12053 = vmatprep.subr.bf16.mxu1 %v14168_v17  ;;  %v14226_v17 = vld [vmem:[%s14613_s21 + $0xf08] ss:$784 sps:$4 sm:$0xff]  }
 0x5a3   : > { %12039 = vmatpush1.bf16.xpose.msra.mxu0 %v14167_v18  ;;  %v14230_v18 = vld [vmem:[%s14613_s21 + $0x152c] ss:$784 sps:$4 sm:$0xff]  }
 0x5a4   : > { %12041 = vmatprep.subr.bf16.mxu0 %v14171_v19 }
 0x5a5   : > { %12055 = vmatpush1.bf16.xpose.msra.mxu1 %v14170_v20 }
 0x5a6   : > { %12057 = vmatprep.subr.bf16.mxu1 %v14174_v21 }
 0x5ab   : > { %12043 = vmatpush1.bf16.xpose.msra.mxu0 %v14173_v22  ;;  %v2634_v22 = vld [vmem:[%s14607_s7 + $0x168] sm:$0xff] }
 0x5ac   : > { %12045 = vmatprep.subr.bf16.mxu0 %v14177_v23  ;;  %v3452_v29 = vcombine.high %v2634_v22, %v2634_v22 }
 0x5ad   : > { %12059 = vmatpush1.bf16.xpose.msra.mxu1 %v14176_v24  ;;  %v8682_v26 = vpop.f32.mrb[70].mxu0  ;;  %v14229_v24 = vld [vmem:[%s14613_s21 + $0x1520] ss:$784 sps:$4 sm:$0xff]  }
 0x5ae   : > { %v8683_v27 = vadd.f32 %v8682_v26, %v8613_v3  ;;  %v8684_v28 = vpop.f32.mrb[71].mxu0  ;;  %12061 = vmatprep.subr.bf16.mxu1 %v14180_v25  ;;  %v3449_v3 = vrot.slane %v3435_v0, %v14630_v13  ;;  %v14264_v0 = vld [vmem:[%s14613_s21 + $0x2e8] ss:$784 sps:$4 sm:$0xff]  }
 0x5af   : > { %v8752_v30 = vpop.f32.mrb[70].mxu1  ;;  %v14232_v28 = vld [vmem:[%s14613_s21 + $0x1528] ss:$784 sps:$4 sm:$0xff]  }
 0x5b0   : > { %v8753_v32 = vadd.f32 %v8752_v30, %v8683_v27  ;;  %v8754_v33 = vpop.f32.mrb[71].mxu1  ;;  %v3451_v8 = vcombine.high %v3449_v3, %v3449_v3  ;;  %v14233_v27 = vld [vmem:[%s14613_s21 + $0x2d4] ss:$784 sps:$4 sm:$0xff]   ;;  %v14237_v30 = vld [vmem:[%s14613_s21 + $0x2dc] ss:$784 sps:$4 sm:$0xff]  }
 0x5b1   : > { %v14235_v33 = vld [vmem:[%s14613_s21 + $0x2d0] ss:$784 sps:$4 sm:$0xff]  }
 0x5b3   : > { %12047 = vmatpush1.bf16.xpose.msra.mxu0 %v14179_v31  ;;  %v3459_v31 = vrot.slane %v2634_v22, %v14630_v13 }
 0x5b4   : > { %12065 = vmatprep.subr.bf16.mxu0 %v14183_v34 }
 0x5b5   : > { %12063 = vmatpush1.bf16.xpose.msra.mxu1 %v14182_v35  ;;  %v3467_v34 = vcombine.high %v3459_v31, %v3459_v31  ;;  %v14240_v35 = vld [vmem:[%s14613_s21 + $0x8f4] ss:$784 sps:$4 sm:$0xff]  }
 0x5b6   : > { %12081 = vmatprep.subr.bf16.mxu1 %v14187_v37 }
 0x5ba   : > { %9661 = vmatmul.mubr.f32.vlgmr.msra.gmra.mrb[84].mxu0 %v3408_v9  ;;  %v14218_v9 = vld [vmem:[%s14613_s21 + $0x8ec] ss:$784 sps:$4 sm:$0xff]  }
 0x5bb   : > { %12067 = vmatpush1.bf16.xpose.msra.mxu0 %v14185_v40  ;;  %9800 = vmatprep.mubr.f32.mxu0 %v3433_v41  ;;  %v14246_v40 = vld [vmem:[%s14613_s21 + $0xf14] ss:$784 sps:$4 sm:$0xff]   ;;  %v14245_v41 = vld [vmem:[%s14613_s21 + $0x8f8] ss:$784 sps:$4 sm:$0xff]  }
 0x5bc   : > { %9731 = vmatmul.mubr.f32.vlgmr.msra.gmra.mrb[84].mxu1 %v3415_v10  ;;  %12069 = vmatprep.subr.bf16.mxu0 %v14190_v42  ;;  %v14217_v10 = vld [vmem:[%s14613_s21 + $0x8e0] ss:$784 sps:$4 sm:$0xff]   ;;  %v14249_v42 = vld [vmem:[%s14613_s21 + $0xf1c] ss:$784 sps:$4 sm:$0xff]  }
 0x5bd   : > { %12083 = vmatpush1.bf16.xpose.msra.mxu1 %v14189_v43  ;;  %9870 = vmatprep.mubr.f32.mxu1 %v3434_v44  ;;  %v14248_v43 = vld [vmem:[%s14613_s21 + $0xf10] ss:$784 sps:$4 sm:$0xff]   ;;  %v14252_v44 = vld [vmem:[%s14613_s21 + $0x1534] ss:$784 sps:$4 sm:$0xff]  }
 0x5be   : > { %12085 = vmatprep.subr.bf16.mxu1 %v14193_v45  ;;  %v14251_v45 = vld [vmem:[%s14613_s21 + $0xf18] ss:$784 sps:$4 sm:$0xff]  }
 0x5c3   : > { %12071 = vmatpush1.bf16.xpose.msra.mxu0 %v14192_v46  ;;  %v14255_v46 = vld [vmem:[%s14613_s21 + $0x153c] ss:$784 sps:$4 sm:$0xff]  }
 0x5c4   : > { %12073 = vmatprep.subr.bf16.mxu0 %v14196_v47 }
 0x5c5   : > { %12087 = vmatpush1.bf16.xpose.msra.mxu1 %v14195_v48 }
 0x5c6   : > { %12089 = vmatprep.subr.bf16.mxu1 %v14199_v49 }
 0x5cb   : > { %12075 = vmatpush1.bf16.xpose.msra.mxu0 %v14198_v50  ;;  %v2635_v50 = vld [vmem:[%s14607_s7 + $0x170] sm:$0xff] }
 0x5cc   : > { %12077 = vmatprep.subr.bf16.mxu0 %v14202_v51  ;;  %v3469_v57 = vcombine.high %v2635_v50, %v2635_v50 }
 0x5cd   : > { %12091 = vmatpush1.bf16.xpose.msra.mxu1 %v14201_v52  ;;  %v8822_v54 = vpop.f32.mrb[72].mxu0  ;;  %v14254_v52 = vld [vmem:[%s14613_s21 + $0x1530] ss:$784 sps:$4 sm:$0xff]  }
 0x5ce   : > { %v8823_v55 = vadd.f32 %v8822_v54, %v8753_v32  ;;  %v8824_v56 = vpop.f32.mrb[73].mxu0  ;;  %12093 = vmatprep.subr.bf16.mxu1 %v14205_v53  ;;  %v3466_v32 = vrot.slane %v3452_v29, %v14630_v13  ;;  %v14289_v29 = vld [vmem:[%s14613_s21 + $0x2f8] ss:$784 sps:$4 sm:$0xff]  }
 0x5cf   : > { %v8892_v58 = vpop.f32.mrb[72].mxu1  ;;  %v14257_v56 = vld [vmem:[%s14613_s21 + $0x1538] ss:$784 sps:$4 sm:$0xff]  }
 0x5d0   : > { %v8893_v60 = vadd.f32 %v8892_v58, %v8823_v55  ;;  %v8894_v61 = vpop.f32.mrb[73].mxu1  ;;  %v3468_v37 = vcombine.high %v3466_v32, %v3466_v32  ;;  %v14258_v55 = vld [vmem:[%s14613_s21 + $0x2e4] ss:$784 sps:$4 sm:$0xff]   ;;  %v14262_v58 = vld [vmem:[%s14613_s21 + $0x2ec] ss:$784 sps:$4 sm:$0xff]  }
 0x5d1   : > { %v14260_v61 = vld [vmem:[%s14613_s21 + $0x2e0] ss:$784 sps:$4 sm:$0xff]  }
 0x5d3   : > { %12079 = vmatpush1.bf16.xpose.msra.mxu0 %v14204_v59  ;;  %v3476_v59 = vrot.slane %v2635_v50, %v14630_v13 }
 0x5d4   : > { %12097 = vmatprep.subr.bf16.mxu0 %v14208_v62 }
 0x5d5   : > { %12095 = vmatpush1.bf16.xpose.msra.mxu1 %v14207_v63  ;;  %v3484_v62 = vcombine.high %v3476_v59, %v3476_v59  ;;  %v14265_v63 = vld [vmem:[%s14613_s21 + $0x904] ss:$784 sps:$4 sm:$0xff]  }
 0x5d6   : > { %12113 = vmatprep.subr.bf16.mxu1 %v14212_v1 }
 0x5da   : > { %9801 = vmatmul.mubr.f32.vlgmr.msra.gmra.mrb[86].mxu0 %v3425_v38  ;;  %v14243_v38 = vld [vmem:[%s14613_s21 + $0x8fc] ss:$784 sps:$4 sm:$0xff]  }
 0x5db   : > { %12099 = vmatpush1.bf16.xpose.msra.mxu0 %v14210_v4  ;;  %9940 = vmatprep.mubr.f32.mxu0 %v3450_v5  ;;  %v14271_v4 = vld [vmem:[%s14613_s21 + $0xf24] ss:$784 sps:$4 sm:$0xff]   ;;  %v14270_v5 = vld [vmem:[%s14613_s21 + $0x908] ss:$784 sps:$4 sm:$0xff]  }
 0x5dc   : > { %9871 = vmatmul.mubr.f32.vlgmr.msra.gmra.mrb[86].mxu1 %v3432_v39  ;;  %12101 = vmatprep.subr.bf16.mxu0 %v14215_v6  ;;  %v14242_v39 = vld [vmem:[%s14613_s21 + $0x8f0] ss:$784 sps:$4 sm:$0xff]   ;;  %v14274_v6 = vld [vmem:[%s14613_s21 + $0xf2c] ss:$784 sps:$4 sm:$0xff]  }
 0x5dd   : > { %12115 = vmatpush1.bf16.xpose.msra.mxu1 %v14214_v7  ;;  %10010 = vmatprep.mubr.f32.mxu1 %v3451_v8  ;;  %v14273_v7 = vld [vmem:[%s14613_s21 + $0xf20] ss:$784 sps:$4 sm:$0xff]   ;;  %v14277_v8 = vld [vmem:[%s14613_s21 + $0x1544] ss:$784 sps:$4 sm:$0xff]  }
 0x5de   : > { %12117 = vmatprep.subr.bf16.mxu1 %v14218_v9  ;;  %v14276_v9 = vld [vmem:[%s14613_s21 + $0xf28] ss:$784 sps:$4 sm:$0xff]  }
 0x5e3   : > { %12103 = vmatpush1.bf16.xpose.msra.mxu0 %v14217_v10  ;;  %v14280_v10 = vld [vmem:[%s14613_s21 + $0x154c] ss:$784 sps:$4 sm:$0xff]  }
 0x5e4   : > { %12105 = vmatprep.subr.bf16.mxu0 %v14221_v11 }
 0x5e5   : > { %12119 = vmatpush1.bf16.xpose.msra.mxu1 %v14220_v12 }
 0x5e6   : > { %12121 = vmatprep.subr.bf16.mxu1 %v14224_v14 }
 0x5eb   : > { %12107 = vmatpush1.bf16.xpose.msra.mxu0 %v14223_v15  ;;  %v2636_v15 = vld [vmem:[%s14607_s7 + $0x178] sm:$0xff] }
 0x5ec   : > { %12109 = vmatprep.subr.bf16.mxu0 %v14227_v16  ;;  %v3486_v22 = vcombine.high %v2636_v15, %v2636_v15 }
 0x5ed   : > { %12123 = vmatpush1.bf16.xpose.msra.mxu1 %v14226_v17  ;;  %v8962_v19 = vpop.f32.mrb[74].mxu0  ;;  %v14279_v17 = vld [vmem:[%s14613_s21 + $0x1540] ss:$784 sps:$4 sm:$0xff]  }
 0x5ee   : > { %v8963_v20 = vadd.f32 %v8962_v19, %v8893_v60  ;;  %v8964_v21 = vpop.f32.mrb[75].mxu0  ;;  %12125 = vmatprep.subr.bf16.mxu1 %v14230_v18  ;;  %v3483_v60 = vrot.slane %v3469_v57, %v14630_v13  ;;  %v14314_v57 = vld [vmem:[%s14613_s21 + $0x308] ss:$784 sps:$4 sm:$0xff]  }
 0x5ef   : > { %v9032_v23 = vpop.f32.mrb[74].mxu1  ;;  %v14282_v21 = vld [vmem:[%s14613_s21 + $0x1548] ss:$784 sps:$4 sm:$0xff]  }
 0x5f0   : > { %v9033_v25 = vadd.f32 %v9032_v23, %v8963_v20  ;;  %v9034_v26 = vpop.f32.mrb[75].mxu1  ;;  %v3485_v1 = vcombine.high %v3483_v60, %v3483_v60  ;;  %v14283_v20 = vld [vmem:[%s14613_s21 + $0x2f4] ss:$784 sps:$4 sm:$0xff]   ;;  %v14287_v23 = vld [vmem:[%s14613_s21 + $0x2fc] ss:$784 sps:$4 sm:$0xff]  }
 0x5f1   : > { %v14285_v26 = vld [vmem:[%s14613_s21 + $0x2f0] ss:$784 sps:$4 sm:$0xff]  }
 0x5f3   : > { %12111 = vmatpush1.bf16.xpose.msra.mxu0 %v14229_v24  ;;  %v3493_v24 = vrot.slane %v2636_v15, %v14630_v13 }
 0x5f4   : > { %12129 = vmatprep.subr.bf16.mxu0 %v14233_v27 }
 0x5f5   : > { %12127 = vmatpush1.bf16.xpose.msra.mxu1 %v14232_v28  ;;  %v3501_v27 = vcombine.high %v3493_v24, %v3493_v24  ;;  %v14290_v28 = vld [vmem:[%s14613_s21 + $0x914] ss:$784 sps:$4 sm:$0xff]  }
 0x5f6   : > { %12145 = vmatprep.subr.bf16.mxu1 %v14237_v30 }
 0x5fa   : > { %9941 = vmatmul.mubr.f32.vlgmr.msra.gmra.mrb[88].mxu0 %v3442_v2  ;;  %v14268_v2 = vld [vmem:[%s14613_s21 + $0x90c] ss:$784 sps:$4 sm:$0xff]  }
 0x5fb   : > { %12131 = vmatpush1.bf16.xpose.msra.mxu0 %v14235_v33  ;;  %10080 = vmatprep.mubr.f32.mxu0 %v3467_v34  ;;  %v14296_v33 = vld [vmem:[%s14613_s21 + $0xf34] ss:$784 sps:$4 sm:$0xff]   ;;  %v14295_v34 = vld [vmem:[%s14613_s21 + $0x918] ss:$784 sps:$4 sm:$0xff]  }
 0x5fc   : > { %10011 = vmatmul.mubr.f32.vlgmr.msra.gmra.mrb[88].mxu1 %v3449_v3  ;;  %12133 = vmatprep.subr.bf16.mxu0 %v14240_v35  ;;  %v14267_v3 = vld [vmem:[%s14613_s21 + $0x900] ss:$784 sps:$4 sm:$0xff]   ;;  %v14299_v35 = vld [vmem:[%s14613_s21 + $0xf3c] ss:$784 sps:$4 sm:$0xff]  }
 0x5fd   : > { %12147 = vmatpush1.bf16.xpose.msra.mxu1 %v14239_v36  ;;  %10150 = vmatprep.mubr.f32.mxu1 %v3468_v37  ;;  %v14298_v36 = vld [vmem:[%s14613_s21 + $0xf30] ss:$784 sps:$4 sm:$0xff]   ;;  %v14302_v37 = vld [vmem:[%s14613_s21 + $0x1554] ss:$784 sps:$4 sm:$0xff]  }
 0x5fe   : > { %12149 = vmatprep.subr.bf16.mxu1 %v14243_v38  ;;  %v14301_v38 = vld [vmem:[%s14613_s21 + $0xf38] ss:$784 sps:$4 sm:$0xff]  }
 0x603   : > { %12135 = vmatpush1.bf16.xpose.msra.mxu0 %v14242_v39  ;;  %v14305_v39 = vld [vmem:[%s14613_s21 + $0x155c] ss:$784 sps:$4 sm:$0xff]  }
 0x604   : > { %12137 = vmatprep.subr.bf16.mxu0 %v14246_v40 }
 0x605   : > { %12151 = vmatpush1.bf16.xpose.msra.mxu1 %v14245_v41 }
 0x606   : > { %12153 = vmatprep.subr.bf16.mxu1 %v14249_v42 }
 0x60b   : > { %12139 = vmatpush1.bf16.xpose.msra.mxu0 %v14248_v43  ;;  %v2637_v43 = vld [vmem:[%s14607_s7 + $0x180] sm:$0xff] }
 0x60c   : > { %12141 = vmatprep.subr.bf16.mxu0 %v14252_v44  ;;  %v3503_v50 = vcombine.high %v2637_v43, %v2637_v43 }
 0x60d   : > { %12155 = vmatpush1.bf16.xpose.msra.mxu1 %v14251_v45  ;;  %v9102_v47 = vpop.f32.mrb[76].mxu0  ;;  %v14304_v45 = vld [vmem:[%s14613_s21 + $0x1550] ss:$784 sps:$4 sm:$0xff]  }
 0x60e   : > { %v9103_v48 = vadd.f32 %v9102_v47, %v9033_v25  ;;  %v9104_v49 = vpop.f32.mrb[77].mxu0  ;;  %12157 = vmatprep.subr.bf16.mxu1 %v14255_v46  ;;  %v3500_v25 = vrot.slane %v3486_v22, %v14630_v13 }
 0x60f   : > { %v9172_v51 = vpop.f32.mrb[76].mxu1  ;;  %v14307_v49 = vld [vmem:[%s14613_s21 + $0x1558] ss:$784 sps:$4 sm:$0xff]  }
 0x610   : > { %v9173_v53 = vadd.f32 %v9172_v51, %v9103_v48  ;;  %v9174_v54 = vpop.f32.mrb[77].mxu1  ;;  %v3502_v30 = vcombine.high %v3500_v25, %v3500_v25  ;;  %v14308_v48 = vld [vmem:[%s14613_s21 + $0x304] ss:$784 sps:$4 sm:$0xff]   ;;  %v14312_v51 = vld [vmem:[%s14613_s21 + $0x30c] ss:$784 sps:$4 sm:$0xff]  }
 0x611   : > { %v14310_v54 = vld [vmem:[%s14613_s21 + $0x300] ss:$784 sps:$4 sm:$0xff]  }
 0x613   : > { %12143 = vmatpush1.bf16.xpose.msra.mxu0 %v14254_v52  ;;  %v3510_v52 = vrot.slane %v2637_v43, %v14630_v13 }
 0x614   : > { %12161 = vmatprep.subr.bf16.mxu0 %v14258_v55 }
 0x615   : > { %12159 = vmatpush1.bf16.xpose.msra.mxu1 %v14257_v56  ;;  %v3518_v55 = vcombine.high %v3510_v52, %v3510_v52  ;;  %v14315_v56 = vld [vmem:[%s14613_s21 + $0x924] ss:$784 sps:$4 sm:$0xff]  }
 0x616   : > { %12177 = vmatprep.subr.bf16.mxu1 %v14262_v58 }
 0x61a   : > { %10081 = vmatmul.mubr.f32.vlgmr.msra.gmra.mrb[90].mxu0 %v3459_v31  ;;  %v14293_v31 = vld [vmem:[%s14613_s21 + $0x91c] ss:$784 sps:$4 sm:$0xff]  }
 0x61b   : > { %12163 = vmatpush1.bf16.xpose.msra.mxu0 %v14260_v61  ;;  %10220 = vmatprep.mubr.f32.mxu0 %v3484_v62  ;;  %v14320_v61 = vld [vmem:[%s14613_s21 + $0x928] ss:$784 sps:$4 sm:$0xff]   ;;  %v14324_v62 = vld [vmem:[%s14613_s21 + $0xf4c] ss:$784 sps:$4 sm:$0xff]  }
 0x61c   : > { %10151 = vmatmul.mubr.f32.vlgmr.msra.gmra.mrb[90].mxu1 %v3466_v32  ;;  %12165 = vmatprep.subr.bf16.mxu0 %v14265_v63  ;;  %v14292_v32 = vld [vmem:[%s14613_s21 + $0x910] ss:$784 sps:$4 sm:$0xff]  }
 0x61d   : > { %12179 = vmatpush1.bf16.xpose.msra.mxu1 %v14264_v0  ;;  %10290 = vmatprep.mubr.f32.mxu1 %v3485_v1  ;;  %v14323_v63 = vld [vmem:[%s14613_s21 + $0xf40] ss:$784 sps:$4 sm:$0xff]   ;;  %v14327_v0 = vld [vmem:[%s14613_s21 + $0x1564] ss:$784 sps:$4 sm:$0xff]   ;;  %v14326_v1 = vld [vmem:[%s14613_s21 + $0xf48] ss:$784 sps:$4 sm:$0xff]  }
 0x61e   : > { %12181 = vmatprep.subr.bf16.mxu1 %v14268_v2  ;;  %v14330_v2 = vld [vmem:[%s14613_s21 + $0x156c] ss:$784 sps:$4 sm:$0xff]  }
 0x623   : > { %12167 = vmatpush1.bf16.xpose.msra.mxu0 %v14267_v3 }
 0x624   : > { %12169 = vmatprep.subr.bf16.mxu0 %v14271_v4 }
 0x625   : > { %12183 = vmatpush1.bf16.xpose.msra.mxu1 %v14270_v5 }
 0x626   : > { %12185 = vmatprep.subr.bf16.mxu1 %v14274_v6 }
 0x62b   : > { %12171 = vmatpush1.bf16.xpose.msra.mxu0 %v14273_v7  ;;  %v14329_v7 = vld [vmem:[%s14613_s21 + $0x1560] ss:$784 sps:$4 sm:$0xff]  }
 0x62c   : > { %12173 = vmatprep.subr.bf16.mxu0 %v14277_v8 }
 0x62d   : > { %12187 = vmatpush1.bf16.xpose.msra.mxu1 %v14276_v9  ;;  %v9242_v11 = vpop.f32.mrb[78].mxu0 }
 0x62e   : > { %v9243_v12 = vadd.f32 %v9242_v11, %v9173_v53  ;;  %v9244_v14 = vpop.f32.mrb[79].mxu0  ;;  %12189 = vmatprep.subr.bf16.mxu1 %v14280_v10  ;;  %v3517_v53 = vrot.slane %v3503_v50, %v14630_v13  ;;  %v14317_v13 = vld [vmem:[%s14613_s21 + $0x920] ss:$784 sps:$4 sm:$0xff]   ;;  %v14332_v10 = vld [vmem:[%s14613_s21 + $0x1568] ss:$784 sps:$4 sm:$0xff]  }
 0x62f   : > { %v9312_v16 = vpop.f32.mrb[78].mxu1 }
 0x630   : > { %v9313_v18 = vadd.f32 %v9312_v16, %v9243_v12  ;;  %v9314_v19 = vpop.f32.mrb[79].mxu1  ;;  %v3519_v58 = vcombine.high %v3517_v53, %v3517_v53 }
 0x633   : > { %12175 = vmatpush1.bf16.xpose.msra.mxu0 %v14279_v17 }
 0x634   : > { %12193 = vmatprep.subr.bf16.mxu0 %v14283_v20 }
 0x635   : > { %12191 = vmatpush1.bf16.xpose.msra.mxu1 %v14282_v21 }
 0x636   : > { %12209 = vmatprep.subr.bf16.mxu1 %v14287_v23 }
 0x63a   : > { %10221 = vmatmul.mubr.f32.vlgmr.msra.gmra.mrb[92].mxu0 %v3476_v59  ;;  %v14318_v59 = vld [vmem:[%s14613_s21 + $0x92c] ss:$784 sps:$4 sm:$0xff]  }
 0x63b   : > { %12195 = vmatpush1.bf16.xpose.msra.mxu0 %v14285_v26  ;;  %10360 = vmatprep.mubr.f32.mxu0 %v3501_v27 }
 0x63c   : > { %10291 = vmatmul.mubr.f32.vlgmr.msra.gmra.mrb[92].mxu1 %v3483_v60  ;;  %12197 = vmatprep.subr.bf16.mxu0 %v14290_v28  ;;  %v14321_v60 = vld [vmem:[%s14613_s21 + $0xf44] ss:$784 sps:$4 sm:$0xff]  }
 0x63d   : > { %12211 = vmatpush1.bf16.xpose.msra.mxu1 %v14289_v29  ;;  %10430 = vmatprep.mubr.f32.mxu1 %v3502_v30 }
 0x63e   : > { %12213 = vmatprep.subr.bf16.mxu1 %v14293_v31 }
 0x643   : > { %12199 = vmatpush1.bf16.xpose.msra.mxu0 %v14292_v32 }
 0x644   : > { %12201 = vmatprep.subr.bf16.mxu0 %v14296_v33 }
 0x645   : > { %12215 = vmatpush1.bf16.xpose.msra.mxu1 %v14295_v34 }
 0x646   : > { %12217 = vmatprep.subr.bf16.mxu1 %v14299_v35 }
 0x64b   : > { %12203 = vmatpush1.bf16.xpose.msra.mxu0 %v14298_v36 }
 0x64c   : > { %12205 = vmatprep.subr.bf16.mxu0 %v14302_v37 }
 0x64d   : > { %12219 = vmatpush1.bf16.xpose.msra.mxu1 %v14301_v38  ;;  %v9382_v40 = vpop.f32.mrb[80].mxu0 }
 0x64e   : > { %v9383_v41 = vadd.f32 %v9382_v40, %v9313_v18  ;;  %v9384_v42 = vpop.f32.mrb[81].mxu0  ;;  %12221 = vmatprep.subr.bf16.mxu1 %v14305_v39 }
 0x64f   : > { %v9452_v44 = vpop.f32.mrb[80].mxu1 }
 0x650   : > { %v9453_v46 = vadd.f32 %v9452_v44, %v9383_v41  ;;  %v9454_v47 = vpop.f32.mrb[81].mxu1 }
 0x653   : > { %12207 = vmatpush1.bf16.xpose.msra.mxu0 %v14304_v45 }
 0x654   : > { %12225 = vmatprep.subr.bf16.mxu0 %v14308_v48 }
 0x655   : > { %12223 = vmatpush1.bf16.xpose.msra.mxu1 %v14307_v49 }
 0x656   : > { %12241 = vmatprep.subr.bf16.mxu1 %v14312_v51  ;;  %v2588_v51 = vld [vmem:[%s15582_s2] sm:$0x3] }
 0x65a   : > { %10361 = vmatmul.mubr.f32.vlgmr.msra.gmra.mrb[94].mxu0 %v3493_v24 }
 0x65b   : > { %12227 = vmatpush1.bf16.xpose.msra.mxu0 %v14310_v54  ;;  %10500 = vmatprep.mubr.f32.mxu0 %v3518_v55 }
 0x65c   : > { %10431 = vmatmul.mubr.f32.vlgmr.msra.gmra.mrb[94].mxu1 %v3500_v25  ;;  %12229 = vmatprep.subr.bf16.mxu0 %v14315_v56 }
 0x65d   : > { %12243 = vmatpush1.bf16.xpose.msra.mxu1 %v14314_v57  ;;  %10570 = vmatprep.mubr.f32.mxu1 %v3519_v58 }
 0x65e   : > { %12245 = vmatprep.subr.bf16.mxu1 %v14318_v59 }
 0x663   : > { %12231 = vmatpush1.bf16.xpose.msra.mxu0 %v14317_v13 }
 0x664   : > { %12233 = vmatprep.subr.bf16.mxu0 %v14321_v60 }
 0x665   : > { %12247 = vmatpush1.bf16.xpose.msra.mxu1 %v14320_v61 }
 0x666   : > { %12249 = vmatprep.subr.bf16.mxu1 %v14324_v62 }
 0x66b   : > { %12235 = vmatpush1.bf16.xpose.msra.mxu0 %v14323_v63 }
 0x66c   : > { %12237 = vmatprep.subr.bf16.mxu0 %v14327_v0 }
 0x66d   : > { %12251 = vmatpush1.bf16.xpose.msra.mxu1 %v14326_v1  ;;  %v9522_v3 = vpop.f32.mrb[82].mxu0 }
 0x66e   : > { %v9523_v4 = vadd.f32 %v9522_v3, %v9453_v46  ;;  %v9524_v5 = vpop.f32.mrb[83].mxu0  ;;  %12253 = vmatprep.subr.bf16.mxu1 %v14330_v2 }
 0x66f   : > { %v9592_v6 = vpop.f32.mrb[82].mxu1 }
 0x670   : > { %v9593_v8 = vadd.f32 %v9592_v6, %v9523_v4  ;;  %v9594_v9 = vpop.f32.mrb[83].mxu1 }
 0x673   : > { %12239 = vmatpush1.bf16.xpose.msra.mxu0 %v14329_v7 }
 0x675   : > { %12255 = vmatpush1.bf16.xpose.msra.mxu1 %v14332_v10 }
 0x67a   : > { %10501 = vmatmul.mubr.f32.vlgmr.msra.gmra.mrb[96].mxu0 %v3510_v52 }
 0x67c   : > { %10571 = vmatmul.mubr.f32.vlgmr.msra.gmra.mrb[96].mxu1 %v3517_v53 }
 0x68d   : > { %v9662_v11 = vpop.f32.mrb[84].mxu0 }
 0x68e   : > { %v9663_v12 = vadd.f32 %v9662_v11, %v9593_v8  ;;  %v9664_v14 = vpop.f32.mrb[85].mxu0 }
 0x68f   : > { %v9732_v15 = vpop.f32.mrb[84].mxu1 }
 0x690   : > { %v9733_v16 = vadd.f32 %v9732_v15, %v9663_v12  ;;  %v9734_v17 = vpop.f32.mrb[85].mxu1 }
 0x6ad   : > { %v9802_v18 = vpop.f32.mrb[86].mxu0 }
 0x6ae   : > { %v9803_v19 = vadd.f32 %v9802_v18, %v9733_v16  ;;  %v9804_v20 = vpop.f32.mrb[87].mxu0 }
 0x6af   : > { %v9872_v21 = vpop.f32.mrb[86].mxu1 }
 0x6b0   : > { %v9873_v22 = vadd.f32 %v9872_v21, %v9803_v19  ;;  %v9874_v23 = vpop.f32.mrb[87].mxu1 }
 0x6cd   : > { %v9942_v24 = vpop.f32.mrb[88].mxu0 }
 0x6ce   : > { %v9943_v25 = vadd.f32 %v9942_v24, %v9873_v22  ;;  %v9944_v26 = vpop.f32.mrb[89].mxu0 }
 0x6cf   : > { %v10012_v27 = vpop.f32.mrb[88].mxu1 }
 0x6d0   : > { %v10013_v28 = vadd.f32 %v10012_v27, %v9943_v25  ;;  %v10014_v29 = vpop.f32.mrb[89].mxu1 }
 0x6ed   : > { %v10082_v30 = vpop.f32.mrb[90].mxu0 }
 0x6ee   : > { %v10083_v31 = vadd.f32 %v10082_v30, %v10013_v28  ;;  %v10084_v32 = vpop.f32.mrb[91].mxu0 }
 0x6ef   : > { %v10152_v33 = vpop.f32.mrb[90].mxu1 }
 0x6f0   : > { %v10153_v34 = vadd.f32 %v10152_v33, %v10083_v31  ;;  %v10154_v35 = vpop.f32.mrb[91].mxu1 }
 0x70d   : > { %v10222_v36 = vpop.f32.mrb[92].mxu0 }
 0x70e   : > { %v10223_v37 = vadd.f32 %v10222_v36, %v10153_v34  ;;  %v10224_v38 = vpop.f32.mrb[93].mxu0 }
 0x70f   : > { %v10292_v39 = vpop.f32.mrb[92].mxu1 }
 0x710   : > { %v10293_v40 = vadd.f32 %v10292_v39, %v10223_v37  ;;  %v10294_v41 = vpop.f32.mrb[93].mxu1 }
 0x72d   : > { %v10362_v42 = vpop.f32.mrb[94].mxu0 }
 0x72e   : > { %v10363_v43 = vadd.f32 %v10362_v42, %v10293_v40  ;;  %v10364_v44 = vpop.f32.mrb[95].mxu0 }
 0x72f   : > { %v10432_v45 = vpop.f32.mrb[94].mxu1 }
 0x730   : > { %v10433_v46 = vadd.f32 %v10432_v45, %v10363_v43  ;;  %v10434_v47 = vpop.f32.mrb[95].mxu1 }
 0x74d   : > { %v10502_v48 = vpop.f32.mrb[96].mxu0 }
 0x74e   : > { %v10503_v49 = vadd.f32 %v10502_v48, %v10433_v46  ;;  %v10504_v50 = vpop.f32.mrb[97].mxu0 }
 0x74f   : > { %v10572_v52 = vpop.f32.mrb[96].mxu1 }
 0x750   : > { %v10573_v53 = vadd.f32 %v10572_v52, %v10503_v49  ;;  %v10574_v54 = vpop.f32.mrb[97].mxu1 }
 0x752   : > { %v10576_v55 = vadd.f32 %v10573_v53, %v2588_v51 }
 0x754   : > { %10578 = vst.msk [vmem:[%s15582_s2] sm:$0x3] %vm10577_vm1, %v10576_v55 }
 0x755 PF: > { %s18_s14 = sadd.s32 1, %s14448_s14   ;;  %s15588_s9 = smov %s14432_s10 }
 0x756   : > { %p15_p11 = scmp.ge.s32.totalorder %s18_s14, 6   ;;  %s15589_s10 = smov %s14436_s11 }
 0x757   : > { %s15590_s11 = smov %s14517_s20  ;;  %s15591_s12 = smov %s14444_s13 }
 0x758   : > { %s15592_s13 = smov %s15594_s16  ;;  %17 = sbr.rel (!%p15_p11) target bundleno = 6 (0x6), region = 85 }
 0x75f   :  { %10598 = vsyncpa [#allocation3], 1 }
 0x760   :  { %10600 = vsyncpa [#allocation3 + $0x1], 1 }
 0x761   :  { %10601 = vsyncpa [#allocation5], 1 }
 0x762   :  { %10603 = vsyncpa [#allocation5 + $0x1], 1 }

</bundles_post_ra>
